<compile_context>
chip_gen: v7x
topology: tpu7x:2x2x1
jax: 0.10.0
libtpu: 0.0.40
codegen_flags: <defaults>
</compile_context>

<pallas_src>
import functools

import jax
import jax.numpy as jnp
from jax import lax
from jax.experimental import pallas as pl
from jax.experimental.pallas import tpu as pltpu

EMBED = 32           # nn.MultiheadAttention(embed_dim=32, ...)
NUM_HEADS = 2
HEAD_DIM = EMBED // NUM_HEADS
PIX_C = 3            # model2 "pixel" channels
NEG_INF = -1e30

# --- per-(point,image) row slab column layout (rows, IMG_W) ------------------
C_W1X = 0                      # w1[:, 0, :]          (32)
C_W1Y = 32                     # w1[:, 1, :]          (32)
C_B1 = 64                      # b1                   (32)
C_W2 = 96                      # w2[:, :, c], c=0..2  (3 x 32)
C_B2 = 192                     # b2                   (3)
C_PROJ = 208                   # proj.reshape(N, 12): col = C_PROJ + 4*k + j
IMG_W = 256

# --- weight slab layout (W_ROWS, W_COLS) -------------------------------------
# rows 0:32, cols [0:96)    = wq | wk | wv
# rows 0:32, cols [128:160) = wo
# row  32,   cols [0:96)    = bq | bk | bv
# row  32,   cols [96:128)  = bo
# row  32,   cols [128:160) = wm^T
# row  32,   col  160       = bm
C_WQKV = 0
C_WO = 128
BIAS_ROW = EMBED
C_BQKV = 0
C_BO = 96
C_WM = 128
C_BM = 160
W_ROWS = 40
W_COLS = 256


def _tile_points(n_img):
    """Points per grid step: rows = tile_p * n_img ~ 128, tile_p multiple of 8."""
    base = pl.cdiv(128, n_img)
    return int(((base + 7) // 8) * 8)


def _explorer_kernel(pts_ref, img_ref, w_ref, out_ref, *, n_img):
    f32 = jnp.float32
    rows = pts_ref.shape[0]              # = tile_p * n_img
    tile_p = rows // n_img
    inv_n = 1.0 / n_img

    # --- homogeneous projection + perspective divide, one row per (point, img)
    x = pts_ref[:, 0:1]
    y = pts_ref[:, 1:2]
    z = pts_ref[:, 2:3]

    def prow(k):                         # proj[img, k, :] . [x, y, z, 1]
        c = C_PROJ + 4 * k
        return (x * img_ref[:, c:c + 1] + y * img_ref[:, c + 1:c + 2]
                + z * img_ref[:, c + 2:c + 3] + img_ref[:, c + 3:c + 4])

    px, py, pz = prow(0), prow(1), prow(2)                          # (rows, 1)
    inv_z = pl.reciprocal(pz, approx=False)                         # EUP, exact
    pix_x = px * inv_z
    pix_y = py * inv_z

    # --- per-image model1: Linear(2->32) + ReLU (weights pre-tiled per row) --
    feat = jnp.maximum(
        pix_x * img_ref[:, C_W1X:C_W1X + EMBED]
        + pix_y * img_ref[:, C_W1Y:C_W1Y + EMBED]
        + img_ref[:, C_B1:C_B1 + EMBED],
        0.0)                                                        # (rows, 32)

    # --- fused QKV projection: one MXU matmul with M = rows (=128) ----------
    qkv = (jnp.dot(feat, w_ref[0:EMBED, C_WQKV:C_WQKV + 3 * EMBED],
                   preferred_element_type=f32)
           + w_ref[BIAS_ROW:BIAS_ROW + 1, C_BQKV:C_BQKV + 3 * EMBED])  # (rows, 96)

    # --- block-diagonal 2-head self-attention over each point's N images ----
    # point id per row/col via float floor (avoids vector integer division).
    rid = jnp.floor(
        (lax.broadcasted_iota(jnp.int32, (rows, rows), 0).astype(f32) + 0.5)
        * inv_n)
    cid = jnp.floor(
        (lax.broadcasted_iota(jnp.int32, (rows, rows), 1).astype(f32) + 0.5)
        * inv_n)
    same_pt = rid == cid

    scale = 1.0 / (HEAD_DIM ** 0.5)
    dn = (((1,), (1,)), ((), ()))        # contract axis 1 of both (no explicit .T)
    fused = w_ref[BIAS_ROW:BIAS_ROW + 1, C_BO:C_BO + EMBED]         # bo (1, 32)
    for h in range(NUM_HEADS):                                      # static, H=2
        q_h = qkv[:, h * HEAD_DIM:(h + 1) * HEAD_DIM] * scale
        k_h = qkv[:, EMBED + h * HEAD_DIM:EMBED + (h + 1) * HEAD_DIM]
        v_h = qkv[:, 2 * EMBED + h * HEAD_DIM:2 * EMBED + (h + 1) * HEAD_DIM]
        s = lax.dot_general(q_h, k_h, dn, preferred_element_type=f32)  # (rows, rows)
        s = jnp.where(same_pt, s, NEG_INF)
        s = s - jnp.max(s, axis=-1, keepdims=True)
        e = jnp.exp(s)                   # masked entries underflow to exactly 0
        p = e * pl.reciprocal(jnp.sum(e, axis=-1, keepdims=True), approx=False)
        ho = jnp.dot(p, v_h, preferred_element_type=f32)               # (rows, 16)
        wo_h = w_ref[h * HEAD_DIM:(h + 1) * HEAD_DIM, C_WO:C_WO + EMBED]
        fused = fused + jnp.dot(ho, wo_h, preferred_element_type=f32)  # (rows, 32)

    # --- per-image model2: Linear(32->3) + sigmoid; per-row pixel stats ------
    row_sum = jnp.zeros((rows, 1), f32)
    row_sq = jnp.zeros((rows, 1), f32)
    for c in range(PIX_C):                                            # static, 3
        w2c = img_ref[:, C_W2 + c * EMBED:C_W2 + (c + 1) * EMBED]     # (rows, 32)
        b2c = img_ref[:, C_B2 + c:C_B2 + c + 1]                       # (rows, 1)
        pix = jax.nn.sigmoid(
            jnp.sum(feat * w2c, axis=-1, keepdims=True) + b2c)        # (rows, 1)
        row_sum = row_sum + pix
        row_sq = row_sq + pix * pix

    # --- per-point reductions with one MXU pooling matmul --------------------
    prid = lax.broadcasted_iota(jnp.int32, (tile_p, rows), 0).astype(f32)
    pcid = jnp.floor(
        (lax.broadcasted_iota(jnp.int32, (tile_p, rows), 1).astype(f32) + 0.5)
        * inv_n)
    pool = jnp.where(prid == pcid, 1.0, 0.0).astype(f32)              # (tile_p, rows)
    gathered = jnp.concatenate([fused, row_sum, row_sq], axis=-1)     # (rows, 34)
    red = jnp.dot(pool, gathered, preferred_element_type=f32)         # (tile_p, 34)

    mean_feat = red[:, 0:EMBED] * inv_n                               # (tile_p, 32)
    s_sum = red[:, EMBED:EMBED + 1]
    s_sq = red[:, EMBED + 1:EMBED + 2]

    # --- mean-feature MLP + sigmoid ------------------------------------------
    wm_t = w_ref[BIAS_ROW:BIAS_ROW + 1, C_WM:C_WM + EMBED]            # (1, 32)
    logit = (jnp.sum(mean_feat * wm_t, axis=-1, keepdims=True)
             + w_ref[BIAS_ROW:BIAS_ROW + 1, C_BM:C_BM + 1])           # (tile_p, 1)
    pred = jax.nn.sigmoid(logit)

    # --- prepare_gt: unbiased variance over the N*3 sigmoid outputs ----------
    # One-pass variance is fine here: values are bounded in (0, 1) and n_pix is
    # small, so f32 cancellation error is far below the validation tolerance.
    n_pix = n_img * PIX_C
    gt = (s_sq - s_sum * s_sum * (1.0 / n_pix)) * (1.0 / (n_pix - 1))  # (tile_p, 1)

    out_ref[:, 0:1] = pred
    out_ref[:, 1:2] = gt


def pack_explorer_params(proj, params, tile_p=None):
    """One-time packing of per-image params / projections and MHA+MLP weights
    into two lane-dense f32 slabs.  Call once per parameter set (hoisted out of
    the per-point hot path); reuse the result for any number of sample points."""
    n = proj.shape[0]
    if tile_p is None:
        tile_p = _tile_points(n)
    f32 = jnp.float32

    img = jnp.concatenate([
        params['w1'][:, 0, :], params['w1'][:, 1, :], params['b1'],
        params['w2'][:, :, 0], params['w2'][:, :, 1], params['w2'][:, :, 2],
        params['b2'],
        jnp.zeros((n, C_PROJ - (C_B2 + PIX_C)), f32),
        proj.reshape(n, 12),
        jnp.zeros((n, IMG_W - (C_PROJ + 12)), f32),
    ], axis=1).astype(f32)                                            # (N, 256)
    # Pre-tile per-image rows to the (tile_p * N, 256) row layout used in-kernel
    # so the kernel does zero in-kernel relayouts of parameter data.
    img_rows = jnp.tile(img, (tile_p, 1))

    e = EMBED
    top = jnp.concatenate([
        params['wq'], params['wk'], params['wv'],
        jnp.zeros((e, C_WO - 3 * e), f32),
        params['wo'],
        jnp.zeros((e, W_COLS - (C_WO + e)), f32),
    ], axis=1)                                                        # (32, 256)
    brow = jnp.concatenate([
        params['bq'].reshape(1, e), params['bk'].reshape(1, e),
        params['bv'].reshape(1, e), params['bo'].reshape(1, e),
        params['wm'].reshape(1, e), params['bm'].reshape(1, 1),
        jnp.zeros((1, W_COLS - (C_BM + 1)), f32),
    ], axis=1)                                                        # (1, 256)
    w = jnp.concatenate(
        [top, brow, jnp.zeros((W_ROWS - e - 1, W_COLS), f32)],
        axis=0).astype(f32)                                           # (40, 256)
    return img_rows, w


@functools.partial(jax.jit, static_argnames=("n_img",))
def explorer_forward_points(points, img_rows, w_slab, *, n_img):
    """Batched forward over P sample points (hot path).  Returns ((P,1), (P,1))."""
    f32 = jnp.float32

    if n_img <= 1:
        # PyTorch early-return branch (trace-time; mirrors the torch module's
        # (1,)-shaped float16 zeros; documented shape/dtype mismatch vs main path).
        z = jnp.zeros((1,), jnp.float16)
        return z, z

    points = points.reshape(-1, 3).astype(f32)
    p_total = points.shape[0]
    rows_per_blk = img_rows.shape[0]
    assert rows_per_blk % n_img == 0
    tile_p = rows_per_blk // n_img

    g = pl.cdiv(p_total, tile_p)
    p_pad = g * tile_p
    if p_pad != p_total:
        pad = jnp.broadcast_to(points[-1:], (p_pad - p_total, 3))
        points = jnp.concatenate([points, pad], axis=0)

    pts_h = jnp.concatenate([points, jnp.ones((p_pad, 1), f32)], axis=1)  # (P_pad, 4)
    pts_rows = jnp.repeat(pts_h, n_img, axis=0)                           # (P_pad*N, 4)

    kernel = functools.partial(_explorer_kernel, n_img=n_img)
    out = pl.pallas_call(
        kernel,
        out_shape=jax.ShapeDtypeStruct((p_pad, 2), f32),
        grid_spec=pltpu.PrefetchScalarGridSpec(
            num_scalar_prefetch=0,
            grid=(g,),
            in_specs=[
                pl.BlockSpec((rows_per_blk, 4), lambda i: (i, 0)),
                pl.BlockSpec((rows_per_blk, IMG_W), lambda i: (0, 0)),  # resident
                pl.BlockSpec((W_ROWS, W_COLS), lambda i: (0, 0)),       # resident
            ],
            out_specs=pl.BlockSpec((tile_p, 2), lambda i: (i, 0)),
        ),
        compiler_params=pltpu.CompilerParams(
            dimension_semantics=("parallel",)),
    )(pts_rows, img_rows, w_slab)

    return out[:p_total, 0:1], out[:p_total, 1:2]


def explorer_forward(sample_point, proj, params):
    """Single-point convenience API mirroring the torch module.  For throughput
    pack once with pack_explorer_params() and call explorer_forward_points()."""
    n_img = proj.shape[0]
    if n_img <= 1:
        z = jnp.zeros((1,), jnp.float16)
        return z, z
    img_rows, w_slab = pack_explorer_params(proj, params)
    return explorer_forward_points(sample_point.reshape(1, 3), img_rows, w_slab,
                                   n_img=n_img)


def explorer_ref(sample_point, proj, params):
    """Pure-JAX reference mirroring the module math (single sample point)."""
    hom = jnp.concatenate([sample_point.reshape(1, 3), jnp.ones((1, 1))], -1)
    pp = jnp.sum(proj * hom[None, :, :], axis=-1)
    pix_pos = pp[:, 0:2] / pp[:, 2:3]
    feat = jnp.maximum(
        jnp.einsum('ni,nio->no', pix_pos, params['w1']) + params['b1'], 0.0)
    pixels = jax.nn.sigmoid(
        jnp.einsum('ni,nio->no', feat, params['w2']) + params['b2'])
    q = feat @ params['wq'] + params['bq']
    k = feat @ params['wk'] + params['bk']
    v = feat @ params['wv'] + params['bv']
    outs = []
    for h in range(NUM_HEADS):
        sl = slice(h * HEAD_DIM, (h + 1) * HEAD_DIM)
        s = (q[:, sl] @ k[:, sl].T) / (HEAD_DIM ** 0.5)
        p = jax.nn.softmax(s, axis=-1)
        outs.append(p @ v[:, sl])
    fused = jnp.concatenate(outs, -1) @ params['wo'] + params['bo']
    mean_feat = jnp.mean(fused, axis=0, keepdims=True)
    pred = jax.nn.sigmoid(mean_feat @ params['wm'] + params['bm'])
    n_elem = pixels.size
    mu = jnp.mean(pixels)
    gt = (jnp.sum((pixels - mu) ** 2) / (n_elem - 1)).reshape(1, 1)
    return pred, gt


if __name__ == "__main__":
    key = jax.random.PRNGKey(0)
    ks = jax.random.split(key, 17)
    N = 8      # number of images
    P = 37     # number of sample points (deliberately not a tile multiple)

    # Inputs (positive so the homogeneous divide is well conditioned)
    points = jax.random.uniform(ks[0], (P, 3), jnp.float32, 0.5, 1.5)
    proj = jax.random.uniform(ks[1], (N, 3, 4), jnp.float32, 0.5, 1.5)

    # Deterministic synthetic parameters
    params = dict(
        w1=jax.random.normal(ks[2], (N, 2, EMBED), jnp.float32) * 0.5,
        b1=jax.random.normal(ks[3], (N, EMBED), jnp.float32) * 0.1,
        w2=jax.random.normal(ks[4], (N, EMBED, PIX_C), jnp.float32) * 0.3,
        b2=jax.random.normal(ks[5], (N, PIX_C), jnp.float32) * 0.1,
        wq=jax.random.normal(ks[6], (EMBED, EMBED), jnp.float32) / jnp.sqrt(EMBED),
        wk=jax.random.normal(ks[7], (EMBED, EMBED), jnp.float32) / jnp.sqrt(EMBED),
        wv=jax.random.normal(ks[8], (EMBED, EMBED), jnp.float32) / jnp.sqrt(EMBED),
        wo=jax.random.normal(ks[9], (EMBED, EMBED), jnp.float32) / jnp.sqrt(EMBED),
        bq=jax.random.normal(ks[10], (1, EMBED), jnp.float32) * 0.05,
        bk=jax.random.normal(ks[11], (1, EMBED), jnp.float32) * 0.05,
        bv=jax.random.normal(ks[12], (1, EMBED), jnp.float32) * 0.05,
        bo=jax.random.normal(ks[13], (1, EMBED), jnp.float32) * 0.05,
        wm=jax.random.normal(ks[14], (EMBED, 1), jnp.float32) / jnp.sqrt(EMBED),
        bm=jax.random.normal(ks[15], (1, 1), jnp.float32) * 0.05,
    )

    # Pack parameters ONCE (off the hot path), then run the batched kernel.
    img_rows, w_slab = pack_explorer_params(proj, params)
    pred, gt = explorer_forward_points(points, img_rows, w_slab, n_img=N)
    jax.block_until_ready((pred, gt))

    # Pure-JAX reference, per point.
    preds_r, gts_r = [], []
    for i in range(P):
        pr, gr = explorer_ref(points[i], proj, params)
        preds_r.append(pr)
        gts_r.append(gr)
    pred_r = jnp.concatenate(preds_r, axis=0)
    gt_r = jnp.concatenate(gts_r, axis=0)

    assert pred.shape == (P, 1) and gt.shape == (P, 1)
    assert jnp.allclose(pred, pred_r, rtol=2e-3, atol=2e-5), (pred, pred_r)
    assert jnp.allclose(gt, gt_r, rtol=2e-3, atol=2e-5), (gt, gt_r)

    # Single-point compatibility path (mirrors the torch module API).
    pred1, gt1 = explorer_forward(points[0], proj, params)
    jax.block_until_ready((pred1, gt1))
    assert pred1.shape == (1, 1) and gt1.shape == (1, 1)
    assert jnp.allclose(pred1, pred_r[0:1], rtol=2e-3, atol=2e-5)
    assert jnp.allclose(gt1, gt_r[0:1], rtol=2e-3, atol=2e-5)

    print("KERNEL_OK")
</pallas_src>

<mosaic_0001>
module attributes {stable_mosaic.version = 11 : i64} {
  func.func @_explorer_kernel(%arg0: i32, %arg1: memref<128x4xf32, #tpu.memory_space<vmem>>, %arg2: memref<128x256xf32, #tpu.memory_space<vmem>>, %arg3: memref<40x256xf32, #tpu.memory_space<vmem>>, %arg4: memref<16x2xf32, #tpu.memory_space<vmem>>) attributes {dimension_semantics = [#tpu.dimension_semantics<parallel>], iteration_bounds = array<i64: 3>, scalar_prefetch = 0 : i64, scratch_operands = 0 : i64, tpu.core_type = #tpu.core_type<tc>, window_params = [{transform_indices = @transform_0, window_bounds = array<i64: 128, 4>}, {pipeline_mode = #tpu.pipeline_mode<synchronous>, transform_indices = @transform_1, window_bounds = array<i64: 128, 256>}, {pipeline_mode = #tpu.pipeline_mode<synchronous>, transform_indices = @transform_2, window_bounds = array<i64: 40, 256>}, {transform_indices = @transform_3, window_bounds = array<i64: 16, 2>}]} {
    %c0 = arith.constant 0 : index
    %c0_0 = arith.constant 0 : index
    %0 = vector.load %arg1[%c0, %c0_0] : memref<128x4xf32, #tpu.memory_space<vmem>>, vector<128x1xf32>
    %c0_1 = arith.constant 0 : index
    %c1 = arith.constant 1 : index
    %1 = vector.load %arg1[%c0_1, %c1] : memref<128x4xf32, #tpu.memory_space<vmem>>, vector<128x1xf32>
    %c0_2 = arith.constant 0 : index
    %c2 = arith.constant 2 : index
    %2 = vector.load %arg1[%c0_2, %c2] : memref<128x4xf32, #tpu.memory_space<vmem>>, vector<128x1xf32>
    %c0_3 = arith.constant 0 : index
    %c208 = arith.constant 208 : index
    %3 = vector.load %arg2[%c0_3, %c208] : memref<128x256xf32, #tpu.memory_space<vmem>>, vector<128x1xf32>
    %4 = arith.mulf %0, %3 : vector<128x1xf32>
    %c0_4 = arith.constant 0 : index
    %c209 = arith.constant 209 : index
    %5 = vector.load %arg2[%c0_4, %c209] : memref<128x256xf32, #tpu.memory_space<vmem>>, vector<128x1xf32>
    %6 = arith.mulf %1, %5 : vector<128x1xf32>
    %7 = arith.addf %4, %6 : vector<128x1xf32>
    %c0_5 = arith.constant 0 : index
    %c210 = arith.constant 210 : index
    %8 = vector.load %arg2[%c0_5, %c210] : memref<128x256xf32, #tpu.memory_space<vmem>>, vector<128x1xf32>
    %9 = arith.mulf %2, %8 : vector<128x1xf32>
    %10 = arith.addf %7, %9 : vector<128x1xf32>
    %c0_6 = arith.constant 0 : index
    %c211 = arith.constant 211 : index
    %11 = vector.load %arg2[%c0_6, %c211] : memref<128x256xf32, #tpu.memory_space<vmem>>, vector<128x1xf32>
    %12 = arith.addf %10, %11 : vector<128x1xf32>
    %c0_7 = arith.constant 0 : index
    %c212 = arith.constant 212 : index
    %13 = vector.load %arg2[%c0_7, %c212] : memref<128x256xf32, #tpu.memory_space<vmem>>, vector<128x1xf32>
    %14 = arith.mulf %0, %13 : vector<128x1xf32>
    %c0_8 = arith.constant 0 : index
    %c213 = arith.constant 213 : index
    %15 = vector.load %arg2[%c0_8, %c213] : memref<128x256xf32, #tpu.memory_space<vmem>>, vector<128x1xf32>
    %16 = arith.mulf %1, %15 : vector<128x1xf32>
    %17 = arith.addf %14, %16 : vector<128x1xf32>
    %c0_9 = arith.constant 0 : index
    %c214 = arith.constant 214 : index
    %18 = vector.load %arg2[%c0_9, %c214] : memref<128x256xf32, #tpu.memory_space<vmem>>, vector<128x1xf32>
    %19 = arith.mulf %2, %18 : vector<128x1xf32>
    %20 = arith.addf %17, %19 : vector<128x1xf32>
    %c0_10 = arith.constant 0 : index
    %c215 = arith.constant 215 : index
    %21 = vector.load %arg2[%c0_10, %c215] : memref<128x256xf32, #tpu.memory_space<vmem>>, vector<128x1xf32>
    %22 = arith.addf %20, %21 : vector<128x1xf32>
    %c0_11 = arith.constant 0 : index
    %c216 = arith.constant 216 : index
    %23 = vector.load %arg2[%c0_11, %c216] : memref<128x256xf32, #tpu.memory_space<vmem>>, vector<128x1xf32>
    %24 = arith.mulf %0, %23 : vector<128x1xf32>
    %c0_12 = arith.constant 0 : index
    %c217 = arith.constant 217 : index
    %25 = vector.load %arg2[%c0_12, %c217] : memref<128x256xf32, #tpu.memory_space<vmem>>, vector<128x1xf32>
    %26 = arith.mulf %1, %25 : vector<128x1xf32>
    %27 = arith.addf %24, %26 : vector<128x1xf32>
    %c0_13 = arith.constant 0 : index
    %c218 = arith.constant 218 : index
    %28 = vector.load %arg2[%c0_13, %c218] : memref<128x256xf32, #tpu.memory_space<vmem>>, vector<128x1xf32>
    %29 = arith.mulf %2, %28 : vector<128x1xf32>
    %30 = arith.addf %27, %29 : vector<128x1xf32>
    %c0_14 = arith.constant 0 : index
    %c219 = arith.constant 219 : index
    %31 = vector.load %arg2[%c0_14, %c219] : memref<128x256xf32, #tpu.memory_space<vmem>>, vector<128x1xf32>
    %32 = arith.addf %30, %31 : vector<128x1xf32>
    %33 = tpu.reciprocal %32 : vector<128x1xf32> -> vector<128x1xf32>
    %34 = arith.mulf %12, %33 : vector<128x1xf32>
    %35 = arith.mulf %22, %33 : vector<128x1xf32>
    %c0_15 = arith.constant 0 : index
    %c0_16 = arith.constant 0 : index
    %36 = vector.load %arg2[%c0_15, %c0_16] : memref<128x256xf32, #tpu.memory_space<vmem>>, vector<128x32xf32>
    %37 = vector.broadcast %34 : vector<128x1xf32> to vector<128x32xf32>
    %38 = arith.mulf %37, %36 : vector<128x32xf32>
    %c0_17 = arith.constant 0 : index
    %c32 = arith.constant 32 : index
    %39 = vector.load %arg2[%c0_17, %c32] : memref<128x256xf32, #tpu.memory_space<vmem>>, vector<128x32xf32>
    %40 = vector.broadcast %35 : vector<128x1xf32> to vector<128x32xf32>
    %41 = arith.mulf %40, %39 : vector<128x32xf32>
    %42 = arith.addf %38, %41 : vector<128x32xf32>
    %c0_18 = arith.constant 0 : index
    %c64 = arith.constant 64 : index
    %43 = vector.load %arg2[%c0_18, %c64] : memref<128x256xf32, #tpu.memory_space<vmem>>, vector<128x32xf32>
    %44 = arith.addf %42, %43 : vector<128x32xf32>
    %cst = arith.constant 0.000000e+00 : f32
    %45 = vector.broadcast %cst : f32 to vector<128x32xf32>
    %46 = arith.maximumf %44, %45 : vector<128x32xf32>
    %c0_19 = arith.constant 0 : index
    %c0_20 = arith.constant 0 : index
    %47 = vector.load %arg3[%c0_19, %c0_20] : memref<40x256xf32, #tpu.memory_space<vmem>>, vector<32x96xf32>
    %cst_21 = arith.constant dense<0.000000e+00> : vector<128x96xf32>
    %48 = tpu.matmul %46, %47, %cst_21 {dimension_numbers = #tpu.dot_dimension_numbers<[1], [0], [0], [1], [0, 0, 1, 1], [], []>} : vector<128x32xf32>, vector<32x96xf32>, vector<128x96xf32> -> vector<128x96xf32>
    %c32_22 = arith.constant 32 : index
    %c0_23 = arith.constant 0 : index
    %49 = vector.load %arg3[%c32_22, %c0_23] : memref<40x256xf32, #tpu.memory_space<vmem>>, vector<1x96xf32>
    %50 = vector.broadcast %49 : vector<1x96xf32> to vector<128x96xf32>
    %51 = arith.addf %48, %50 : vector<128x96xf32>
    %52 = tpu.iota {dimensions = array<i32: 0>} : vector<128x128xi32>
    %53 = arith.sitofp %52 : vector<128x128xi32> to vector<128x128xf32>
    %cst_24 = arith.constant 5.000000e-01 : f32
    %54 = vector.broadcast %cst_24 : f32 to vector<128x128xf32>
    %55 = arith.addf %53, %54 : vector<128x128xf32>
    %cst_25 = arith.constant 1.250000e-01 : f32
    %56 = vector.broadcast %cst_25 : f32 to vector<128x128xf32>
    %57 = arith.mulf %55, %56 : vector<128x128xf32>
    %58 = math.floor %57 : vector<128x128xf32>
    %59 = tpu.iota {dimensions = array<i32: 1>} : vector<128x128xi32>
    %60 = arith.sitofp %59 : vector<128x128xi32> to vector<128x128xf32>
    %cst_26 = arith.constant 5.000000e-01 : f32
    %61 = vector.broadcast %cst_26 : f32 to vector<128x128xf32>
    %62 = arith.addf %60, %61 : vector<128x128xf32>
    %cst_27 = arith.constant 1.250000e-01 : f32
    %63 = vector.broadcast %cst_27 : f32 to vector<128x128xf32>
    %64 = arith.mulf %62, %63 : vector<128x128xf32>
    %65 = math.floor %64 : vector<128x128xf32>
    %66 = arith.cmpf oeq, %58, %65 : vector<128x128xf32>
    %c32_28 = arith.constant 32 : index
    %c96 = arith.constant 96 : index
    %67 = vector.load %arg3[%c32_28, %c96] : memref<40x256xf32, #tpu.memory_space<vmem>>, vector<1x32xf32>
    %68 = vector.extract_strided_slice %51 {offsets = [0, 0], sizes = [128, 16], strides = [1, 1]} : vector<128x96xf32> to vector<128x16xf32>
    %cst_29 = arith.constant 2.500000e-01 : f32
    %69 = vector.broadcast %cst_29 : f32 to vector<128x16xf32>
    %70 = arith.mulf %68, %69 : vector<128x16xf32>
    %71 = vector.extract_strided_slice %51 {offsets = [0, 32], sizes = [128, 16], strides = [1, 1]} : vector<128x96xf32> to vector<128x16xf32>
    %72 = vector.extract_strided_slice %51 {offsets = [0, 64], sizes = [128, 16], strides = [1, 1]} : vector<128x96xf32> to vector<128x16xf32>
    %cst_30 = arith.constant dense<0.000000e+00> : vector<128x128xf32>
    %73 = tpu.matmul %70, %71, %cst_30 {dimension_numbers = #tpu.dot_dimension_numbers<[1], [1], [0], [0], [0, 0, 1, 0], [], []>} : vector<128x16xf32>, vector<128x16xf32>, vector<128x128xf32> -> vector<128x128xf32>
    %cst_31 = arith.constant -1.000000e+30 : f32
    %74 = vector.broadcast %cst_31 : f32 to vector<128x128xf32>
    %75 = arith.select %66, %73, %74 : vector<128x128xi1>, vector<128x128xf32>
    %cst_32 = arith.constant dense<0xFF800000> : vector<128xf32>
    %76 = vector.multi_reduction <maximumf>, %75, %cst_32 [1] : vector<128x128xf32> to vector<128xf32>
    %77 = vector.shape_cast %76 : vector<128xf32> to vector<128x1xf32>
    %78 = vector.broadcast %77 : vector<128x1xf32> to vector<128x128xf32>
    %79 = arith.subf %75, %78 : vector<128x128xf32>
    %80 = math.exp %79 : vector<128x128xf32>
    %cst_33 = arith.constant dense<0.000000e+00> : vector<128xf32>
    %81 = vector.multi_reduction <add>, %80, %cst_33 [1] : vector<128x128xf32> to vector<128xf32>
    %82 = vector.shape_cast %81 : vector<128xf32> to vector<128x1xf32>
    %83 = tpu.reciprocal %82 : vector<128x1xf32> -> vector<128x1xf32>
    %84 = vector.broadcast %83 : vector<128x1xf32> to vector<128x128xf32>
    %85 = arith.mulf %80, %84 : vector<128x128xf32>
    %cst_34 = arith.constant dense<0.000000e+00> : vector<128x16xf32>
    %86 = tpu.matmul %85, %72, %cst_34 {dimension_numbers = #tpu.dot_dimension_numbers<[1], [0], [0], [1], [0, 0, 1, 1], [], []>} : vector<128x128xf32>, vector<128x16xf32>, vector<128x16xf32> -> vector<128x16xf32>
    %c0_35 = arith.constant 0 : index
    %c128 = arith.constant 128 : index
    %87 = vector.load %arg3[%c0_35, %c128] : memref<40x256xf32, #tpu.memory_space<vmem>>, vector<16x32xf32>
    %cst_36 = arith.constant dense<0.000000e+00> : vector<128x32xf32>
    %88 = tpu.matmul %86, %87, %cst_36 {dimension_numbers = #tpu.dot_dimension_numbers<[1], [0], [0], [1], [0, 0, 1, 1], [], []>} : vector<128x16xf32>, vector<16x32xf32>, vector<128x32xf32> -> vector<128x32xf32>
    %89 = vector.broadcast %67 : vector<1x32xf32> to vector<128x32xf32>
    %90 = arith.addf %89, %88 : vector<128x32xf32>
    %91 = vector.extract_strided_slice %51 {offsets = [0, 16], sizes = [128, 16], strides = [1, 1]} : vector<128x96xf32> to vector<128x16xf32>
    %cst_37 = arith.constant 2.500000e-01 : f32
    %92 = vector.broadcast %cst_37 : f32 to vector<128x16xf32>
    %93 = arith.mulf %91, %92 : vector<128x16xf32>
    %94 = vector.extract_strided_slice %51 {offsets = [0, 48], sizes = [128, 16], strides = [1, 1]} : vector<128x96xf32> to vector<128x16xf32>
    %95 = vector.extract_strided_slice %51 {offsets = [0, 80], sizes = [128, 16], strides = [1, 1]} : vector<128x96xf32> to vector<128x16xf32>
    %cst_38 = arith.constant dense<0.000000e+00> : vector<128x128xf32>
    %96 = tpu.matmul %93, %94, %cst_38 {dimension_numbers = #tpu.dot_dimension_numbers<[1], [1], [0], [0], [0, 0, 1, 0], [], []>} : vector<128x16xf32>, vector<128x16xf32>, vector<128x128xf32> -> vector<128x128xf32>
    %cst_39 = arith.constant -1.000000e+30 : f32
    %97 = vector.broadcast %cst_39 : f32 to vector<128x128xf32>
    %98 = arith.select %66, %96, %97 : vector<128x128xi1>, vector<128x128xf32>
    %cst_40 = arith.constant dense<0xFF800000> : vector<128xf32>
    %99 = vector.multi_reduction <maximumf>, %98, %cst_40 [1] : vector<128x128xf32> to vector<128xf32>
    %100 = vector.shape_cast %99 : vector<128xf32> to vector<128x1xf32>
    %101 = vector.broadcast %100 : vector<128x1xf32> to vector<128x128xf32>
    %102 = arith.subf %98, %101 : vector<128x128xf32>
    %103 = math.exp %102 : vector<128x128xf32>
    %cst_41 = arith.constant dense<0.000000e+00> : vector<128xf32>
    %104 = vector.multi_reduction <add>, %103, %cst_41 [1] : vector<128x128xf32> to vector<128xf32>
    %105 = vector.shape_cast %104 : vector<128xf32> to vector<128x1xf32>
    %106 = tpu.reciprocal %105 : vector<128x1xf32> -> vector<128x1xf32>
    %107 = vector.broadcast %106 : vector<128x1xf32> to vector<128x128xf32>
    %108 = arith.mulf %103, %107 : vector<128x128xf32>
    %cst_42 = arith.constant dense<0.000000e+00> : vector<128x16xf32>
    %109 = tpu.matmul %108, %95, %cst_42 {dimension_numbers = #tpu.dot_dimension_numbers<[1], [0], [0], [1], [0, 0, 1, 1], [], []>} : vector<128x128xf32>, vector<128x16xf32>, vector<128x16xf32> -> vector<128x16xf32>
    %c16 = arith.constant 16 : index
    %c128_43 = arith.constant 128 : index
    %110 = vector.load %arg3[%c16, %c128_43] : memref<40x256xf32, #tpu.memory_space<vmem>>, vector<16x32xf32>
    %cst_44 = arith.constant dense<0.000000e+00> : vector<128x32xf32>
    %111 = tpu.matmul %109, %110, %cst_44 {dimension_numbers = #tpu.dot_dimension_numbers<[1], [0], [0], [1], [0, 0, 1, 1], [], []>} : vector<128x16xf32>, vector<16x32xf32>, vector<128x32xf32> -> vector<128x32xf32>
    %112 = arith.addf %90, %111 : vector<128x32xf32>
    %cst_45 = arith.constant 0.000000e+00 : f32
    %113 = vector.broadcast %cst_45 : f32 to vector<128x1xf32>
    %cst_46 = arith.constant 0.000000e+00 : f32
    %114 = vector.broadcast %cst_46 : f32 to vector<128x1xf32>
    %c0_47 = arith.constant 0 : index
    %c96_48 = arith.constant 96 : index
    %115 = vector.load %arg2[%c0_47, %c96_48] : memref<128x256xf32, #tpu.memory_space<vmem>>, vector<128x32xf32>
    %c0_49 = arith.constant 0 : index
    %c192 = arith.constant 192 : index
    %116 = vector.load %arg2[%c0_49, %c192] : memref<128x256xf32, #tpu.memory_space<vmem>>, vector<128x1xf32>
    %117 = arith.mulf %46, %115 : vector<128x32xf32>
    %cst_50 = arith.constant dense<0.000000e+00> : vector<128xf32>
    %118 = vector.multi_reduction <add>, %117, %cst_50 [1] : vector<128x32xf32> to vector<128xf32>
    %119 = vector.shape_cast %118 : vector<128xf32> to vector<128x1xf32>
    %120 = arith.addf %119, %116 : vector<128x1xf32>
    %121 = arith.negf %120 : vector<128x1xf32>
    %122 = math.exp %121 : vector<128x1xf32>
    %cst_51 = arith.constant 1.000000e+00 : f32
    %123 = vector.broadcast %cst_51 : f32 to vector<128x1xf32>
    %124 = arith.addf %123, %122 : vector<128x1xf32>
    %125 = arith.divf %123, %124 : vector<128x1xf32>
    %126 = arith.addf %113, %125 : vector<128x1xf32>
    %127 = arith.mulf %125, %125 : vector<128x1xf32>
    %128 = arith.addf %114, %127 : vector<128x1xf32>
    %c0_52 = arith.constant 0 : index
    %c128_53 = arith.constant 128 : index
    %129 = vector.load %arg2[%c0_52, %c128_53] : memref<128x256xf32, #tpu.memory_space<vmem>>, vector<128x32xf32>
    %c0_54 = arith.constant 0 : index
    %c193 = arith.constant 193 : index
    %130 = vector.load %arg2[%c0_54, %c193] : memref<128x256xf32, #tpu.memory_space<vmem>>, vector<128x1xf32>
    %131 = arith.mulf %46, %129 : vector<128x32xf32>
    %cst_55 = arith.constant dense<0.000000e+00> : vector<128xf32>
    %132 = vector.multi_reduction <add>, %131, %cst_55 [1] : vector<128x32xf32> to vector<128xf32>
    %133 = vector.shape_cast %132 : vector<128xf32> to vector<128x1xf32>
    %134 = arith.addf %133, %130 : vector<128x1xf32>
    %135 = arith.negf %134 : vector<128x1xf32>
    %136 = math.exp %135 : vector<128x1xf32>
    %cst_56 = arith.constant 1.000000e+00 : f32
    %137 = vector.broadcast %cst_56 : f32 to vector<128x1xf32>
    %138 = arith.addf %137, %136 : vector<128x1xf32>
    %139 = arith.divf %137, %138 : vector<128x1xf32>
    %140 = arith.addf %126, %139 : vector<128x1xf32>
    %141 = arith.mulf %139, %139 : vector<128x1xf32>
    %142 = arith.addf %128, %141 : vector<128x1xf32>
    %c0_57 = arith.constant 0 : index
    %c160 = arith.constant 160 : index
    %143 = vector.load %arg2[%c0_57, %c160] : memref<128x256xf32, #tpu.memory_space<vmem>>, vector<128x32xf32>
    %c0_58 = arith.constant 0 : index
    %c194 = arith.constant 194 : index
    %144 = vector.load %arg2[%c0_58, %c194] : memref<128x256xf32, #tpu.memory_space<vmem>>, vector<128x1xf32>
    %145 = arith.mulf %46, %143 : vector<128x32xf32>
    %cst_59 = arith.constant dense<0.000000e+00> : vector<128xf32>
    %146 = vector.multi_reduction <add>, %145, %cst_59 [1] : vector<128x32xf32> to vector<128xf32>
    %147 = vector.shape_cast %146 : vector<128xf32> to vector<128x1xf32>
    %148 = arith.addf %147, %144 : vector<128x1xf32>
    %149 = arith.negf %148 : vector<128x1xf32>
    %150 = math.exp %149 : vector<128x1xf32>
    %cst_60 = arith.constant 1.000000e+00 : f32
    %151 = vector.broadcast %cst_60 : f32 to vector<128x1xf32>
    %152 = arith.addf %151, %150 : vector<128x1xf32>
    %153 = arith.divf %151, %152 : vector<128x1xf32>
    %154 = arith.addf %140, %153 : vector<128x1xf32>
    %155 = arith.mulf %153, %153 : vector<128x1xf32>
    %156 = arith.addf %142, %155 : vector<128x1xf32>
    %157 = tpu.iota {dimensions = array<i32: 0>} : vector<16x128xi32>
    %158 = arith.sitofp %157 : vector<16x128xi32> to vector<16x128xf32>
    %159 = tpu.iota {dimensions = array<i32: 1>} : vector<16x128xi32>
    %160 = arith.sitofp %159 : vector<16x128xi32> to vector<16x128xf32>
    %cst_61 = arith.constant 5.000000e-01 : f32
    %161 = vector.broadcast %cst_61 : f32 to vector<16x128xf32>
    %162 = arith.addf %160, %161 : vector<16x128xf32>
    %cst_62 = arith.constant 1.250000e-01 : f32
    %163 = vector.broadcast %cst_62 : f32 to vector<16x128xf32>
    %164 = arith.mulf %162, %163 : vector<16x128xf32>
    %165 = math.floor %164 : vector<16x128xf32>
    %166 = arith.cmpf oeq, %158, %165 : vector<16x128xf32>
    %cst_63 = arith.constant 1.000000e+00 : f32
    %cst_64 = arith.constant 0.000000e+00 : f32
    %167 = vector.broadcast %cst_63 : f32 to vector<16x128xf32>
    %168 = vector.broadcast %cst_64 : f32 to vector<16x128xf32>
    %169 = arith.select %166, %167, %168 : vector<16x128xi1>, vector<16x128xf32>
    %170 = tpu.concatenate %112, %154, %156 in 1 : vector<128x32xf32>, vector<128x1xf32>, vector<128x1xf32> -> vector<128x34xf32>
    %cst_65 = arith.constant dense<0.000000e+00> : vector<16x34xf32>
    %171 = tpu.matmul %169, %170, %cst_65 {dimension_numbers = #tpu.dot_dimension_numbers<[1], [0], [0], [1], [0, 0, 1, 1], [], []>} : vector<16x128xf32>, vector<128x34xf32>, vector<16x34xf32> -> vector<16x34xf32>
    %172 = vector.extract_strided_slice %171 {offsets = [0, 0], sizes = [16, 32], strides = [1, 1]} : vector<16x34xf32> to vector<16x32xf32>
    %cst_66 = arith.constant 1.250000e-01 : f32
    %173 = vector.broadcast %cst_66 : f32 to vector<16x32xf32>
    %174 = arith.mulf %172, %173 : vector<16x32xf32>
    %175 = vector.extract_strided_slice %171 {offsets = [0, 32], sizes = [16, 1], strides = [1, 1]} : vector<16x34xf32> to vector<16x1xf32>
    %176 = vector.extract_strided_slice %171 {offsets = [0, 33], sizes = [16, 1], strides = [1, 1]} : vector<16x34xf32> to vector<16x1xf32>
    %c32_67 = arith.constant 32 : index
    %c128_68 = arith.constant 128 : index
    %177 = vector.load %arg3[%c32_67, %c128_68] : memref<40x256xf32, #tpu.memory_space<vmem>>, vector<1x32xf32>
    %178 = vector.broadcast %177 : vector<1x32xf32> to vector<16x32xf32>
    %179 = arith.mulf %174, %178 : vector<16x32xf32>
    %cst_69 = arith.constant dense<0.000000e+00> : vector<16xf32>
    %180 = vector.multi_reduction <add>, %179, %cst_69 [1] : vector<16x32xf32> to vector<16xf32>
    %181 = vector.shape_cast %180 : vector<16xf32> to vector<16x1xf32>
    %c32_70 = arith.constant 32 : index
    %c160_71 = arith.constant 160 : index
    %182 = vector.load %arg3[%c32_70, %c160_71] : memref<40x256xf32, #tpu.memory_space<vmem>>, vector<1x1xf32>
    %183 = vector.broadcast %182 : vector<1x1xf32> to vector<16x1xf32>
    %184 = arith.addf %181, %183 : vector<16x1xf32>
    %185 = arith.negf %184 : vector<16x1xf32>
    %186 = math.exp %185 : vector<16x1xf32>
    %cst_72 = arith.constant 1.000000e+00 : f32
    %187 = vector.broadcast %cst_72 : f32 to vector<16x1xf32>
    %188 = arith.addf %187, %186 : vector<16x1xf32>
    %189 = arith.divf %187, %188 : vector<16x1xf32>
    %190 = arith.mulf %175, %175 : vector<16x1xf32>
    %cst_73 = arith.constant 0.0416666679 : f32
    %191 = vector.broadcast %cst_73 : f32 to vector<16x1xf32>
    %192 = arith.mulf %190, %191 : vector<16x1xf32>
    %193 = arith.subf %176, %192 : vector<16x1xf32>
    %cst_74 = arith.constant 0.0434782617 : f32
    %194 = vector.broadcast %cst_74 : f32 to vector<16x1xf32>
    %195 = arith.mulf %193, %194 : vector<16x1xf32>
    %c0_75 = arith.constant 0 : index
    %c0_76 = arith.constant 0 : index
    %196 = vector.load %arg4[%c0_75, %c0_76] : memref<16x2xf32, #tpu.memory_space<vmem>>, vector<16x1xf32>
    tpu.vector_store %arg4[%c0_75, %c0_76], %189 {strides = array<i32>} : memref<16x2xf32, #tpu.memory_space<vmem>>, vector<16x1xf32>,
    %c0_77 = arith.constant 0 : index
    %c1_78 = arith.constant 1 : index
    %197 = vector.load %arg4[%c0_77, %c1_78] : memref<16x2xf32, #tpu.memory_space<vmem>>, vector<16x1xf32>
    tpu.vector_store %arg4[%c0_77, %c1_78], %195 {strides = array<i32>} : memref<16x2xf32, #tpu.memory_space<vmem>>, vector<16x1xf32>,
    return
  }
  func.func @transform_0(%arg0: i32) -> (i32, i32) {
    %c0_i32 = arith.constant 0 : i32
    %c0_i32_0 = arith.constant 0 : i32
    return %arg0, %c0_i32 : i32, i32
  }
  func.func @transform_1(%arg0: i32) -> (i32, i32) {
    %c0_i32 = arith.constant 0 : i32
    %c0_i32_0 = arith.constant 0 : i32
    %c0_i32_1 = arith.constant 0 : i32
    return %c0_i32, %c0_i32_0 : i32, i32
  }
  func.func @transform_2(%arg0: i32) -> (i32, i32) {
    %c0_i32 = arith.constant 0 : i32
    %c0_i32_0 = arith.constant 0 : i32
    %c0_i32_1 = arith.constant 0 : i32
    return %c0_i32, %c0_i32_0 : i32, i32
  }
  func.func @transform_3(%arg0: i32) -> (i32, i32) {
    %c0_i32 = arith.constant 0 : i32
    %c0_i32_0 = arith.constant 0 : i32
    return %arg0, %c0_i32 : i32, i32
  }
}

</mosaic_0001>

<bundles_post_ra>
// kernel: explorer_forward_points.1
= control target key start
LH: loop header
LB: loop body
LE: loop exit
PB: predicated region body
PF: predicated region fallthrough
CT: control target
= control target key end

     0   :  { %s6735_s12 = smov 0   ;;  %s9936_s0 = inlined_call_operand.vmem [shape: f32[384,4], index: 0, kind: input, shape index: {}]   ;;  %s9937_s1 = inlined_call_operand.vmem [shape: f32[128,256], index: 1, kind: input, shape index: {}]   ;;  %s9938_s2 = inlined_call_operand.vmem [shape: f32[40,256], index: 2, kind: input, shape index: {}]   ;;  %s9939_s3 = inlined_call_operand.vmem [shape: f32[48,2], index: 3, kind: output, shape index: {}]  }
   0x1 LB: > { %s5038_s13 = sadd.s32 4294967295, %s6696_s12   ;;  %p5042_p0 = scmp.ge.s32.totalorder %s6696_s12, 1  ;;  %s6696_s12 = sphi %s6735_s12, %s13_s12  }
   0x2   : > { %p138_p1 = scmp.lt.s32.totalorder %s6696_s12, 4 }
   0x4   : > { %p139_p2 = pnand %p5042_p0, %p138_p1 }
   0x6   : > { %142 = sbr.rel (%p139_p2) target bundleno = 3083 (0xc0b), region = 32 }
   0xd   : > { %v6746_v0 = vld [vmem:[%s9937_s1 + $0x8] sm:$0xff]  ;;  %s6698_s18 = smov 40   ;;  %v6760_v2 = vld [vmem:[%s9937_s1 + $0x18] sm:$0xff]  ;;  %s6699_s23 = smov 44   ;;  %vm9983_vm0 = vcmask 261120   ;;  %vm9982_vm1 = vcmask 130048  }
   0xe   : > { %v6751_v1 = vld [vmem:[%s9937_s1 + $0x28] sm:$0xff]  ;;  %766 = vrot.lane.b32.xlu0 %v6746_v0, %s6698_s18  ;;  %v6765_v3 = vld [vmem:[%s9937_s1 + $0x38] sm:$0xff]  ;;  %s6700_s25 = smov 37   ;;  %s6702_s26 = smov 41   ;;  %vm8121_vm2 = vmpackc.low %vm9982_vm1, %vm9982_vm1 }
   0xf   : > { %10029 = vst [vmem:[#allocation2_spill] sm:$0xff] %v6751_v1  ;;  %770 = vrot.lane.b32.xlu1 %v6751_v1, %s6698_s18  ;;  %v6778_v4 = vld [vmem:[%s9937_s1 + $0x48] sm:$0xff]  ;;  %v6783_v5 = vld [vmem:[%s9937_s1 + $0x58] sm:$0xff]  ;;  %s6703_s4 = smov 127   ;;  %s6704_s5 = smov 126  }
  0x10   : > { %10030 = vst [vmem:[#allocation3_spill] sm:$0xff] %v6778_v4  ;;  %10031 = vst [vmem:[#allocation4_spill] sm:$0xff] %v6783_v5  ;;  %v6796_v6 = vld [vmem:[%s9937_s1 + $0x68] sm:$0xff]  ;;  %v6801_v7 = vld [vmem:[%s9937_s1 + $0x78] sm:$0xff]  ;;  %s6706_s6 = smov 45   ;;  %s6707_s20 = smov 96  }
  0x11   : > { %10032 = vst [vmem:[#allocation5_spill] sm:$0xff] %v6796_v6  ;;  %10033 = vst [vmem:[#allocation6_spill] sm:$0xff] %v6801_v7  ;;  %v6814_v8 = vld [vmem:[%s9937_s1 + $0x98] sm:$0xff]  ;;  %v6819_v9 = vld [vmem:[%s9937_s1 + $0x88] sm:$0xff]  ;;  %s6708_s24 = smov 64   ;;  %s6709_s21 = smov 80  }
  0x12   : > { %768 = vrot.lane.b32.xlu0 %v6760_v2, %s6698_s18  ;;  %10034 = vst [vmem:[#allocation7_spill] sm:$0xff] %v6814_v8  ;;  %10035 = vst [vmem:[#allocation8_spill] sm:$0xff] %v6819_v9  ;;  %v6832_v10 = vld [vmem:[%s9937_s1 + $0xb8] sm:$0xff]  ;;  %v6837_v11 = vld [vmem:[%s9937_s1 + $0xa8] sm:$0xff]  ;;  %s6710_s22 = smov 112   ;;  %s6711_s14 = smov 32  }
  0x13   : > { %772 = vrot.lane.b32.xlu1 %v6765_v3, %s6698_s18  ;;  %10036 = vst [vmem:[#allocation9_spill] sm:$0xff] %v6832_v10  ;;  %10037 = vst [vmem:[#allocation10_spill] sm:$0xff] %v6837_v11  ;;  %v6850_v12 = vld [vmem:[%s9937_s1 + $0xd8] sm:$0xff]  ;;  %v6855_v13 = vld [vmem:[%s9937_s1 + $0xc8] sm:$0xff] }
  0x14   : > { %v6868_v14 = vld [vmem:[%s9937_s1 + $0xf8] sm:$0xff]  ;;  %v6873_v15 = vld [vmem:[%s9937_s1 + $0xe8] sm:$0xff] }
  0x16   : > { %494 = vrot.lane.b32.xlu0 %v6746_v0, %s6699_s23 }
  0x17   : > { %496 = vrot.lane.b32.xlu1 %v6760_v2, %s6699_s23 }
  0x1a   : > { %774 = vrot.lane.b32.xlu0 %v6778_v4, %s6698_s18 }
  0x1b   : > { %776 = vrot.lane.b32.xlu1 %v6783_v5, %s6698_s18 }
  0x1e   : > { %498 = vrot.lane.b32.xlu0 %v6751_v1, %s6699_s23 }
  0x1f   : > { %500 = vrot.lane.b32.xlu1 %v6765_v3, %s6699_s23 }
  0x22   : > { %778 = vrot.lane.b32.xlu0 %v6796_v6, %s6698_s18 }
  0x23   : > { %780 = vrot.lane.b32.xlu1 %v6801_v7, %s6698_s18 }
  0x26   : > { %502 = vrot.lane.b32.xlu0 %v6778_v4, %s6699_s23 }
  0x27   : > { %504 = vrot.lane.b32.xlu1 %v6783_v5, %s6699_s23 }
  0x2a   : > { %782 = vrot.lane.b32.xlu0 %v6819_v9, %s6698_s18 }
  0x2b   : > { %784 = vrot.lane.b32.xlu1 %v6814_v8, %s6698_s18 }
  0x2e   : > { %506 = vrot.lane.b32.xlu0 %v6796_v6, %s6699_s23 }
  0x2f   : > { %508 = vrot.lane.b32.xlu1 %v6801_v7, %s6699_s23 }
  0x32   : > { %786 = vrot.lane.b32.xlu0 %v6837_v11, %s6698_s18 }
  0x33   : > { %788 = vrot.lane.b32.xlu1 %v6832_v10, %s6698_s18 }
  0x36   : > { %510 = vrot.lane.b32.xlu0 %v6819_v9, %s6699_s23 }
  0x37   : > { %512 = vrot.lane.b32.xlu1 %v6814_v8, %s6699_s23 }
  0x3a   : > { %790 = vrot.lane.b32.xlu0 %v6855_v13, %s6698_s18 }
  0x3b   : > { %792 = vrot.lane.b32.xlu1 %v6850_v12, %s6698_s18 }
  0x3e   : > { %514 = vrot.lane.b32.xlu0 %v6837_v11, %s6699_s23 }
  0x3f   : > { %516 = vrot.lane.b32.xlu1 %v6832_v10, %s6699_s23 }
  0x42   : > { %794 = vrot.lane.b32.xlu0 %v6873_v15, %s6698_s18 }
  0x43   : > { %796 = vrot.lane.b32.xlu1 %v6868_v14, %s6698_s18  ;;  %s6701_s18 = smov 48  }
  0x46   : > { %518 = vrot.lane.b32.xlu0 %v6855_v13, %s6699_s23 }
  0x47   : > { %520 = vrot.lane.b32.xlu1 %v6850_v12, %s6699_s23 }
  0x4a   : > { %974 = vrot.lane.b32.xlu0 %v6746_v0, %s6700_s25 }
  0x4b   : > { %976 = vrot.lane.b32.xlu1 %v6760_v2, %s6700_s25 }
  0x4e   : > { %522 = vrot.lane.b32.xlu0 %v6873_v15, %s6699_s23 }
  0x4f   : > { %524 = vrot.lane.b32.xlu1 %v6868_v14, %s6699_s23  ;;  %s5043_s23 = sshll.u32 %s5038_s13, 4 }
  0x50   : > { %p163_p3 = scmp.lt.s32.totalorder %s5043_s23, 47 }
  0x52   : > { %978 = vrot.lane.b32.xlu0 %v6751_v1, %s6700_s25  ;;  %s10346_s23 = smov (!%p163_p3, %s5043_s23), 47 }
  0x53   : > { %222 = vrot.lane.b32.xlu1 %v6746_v0, %s6701_s18  ;;  %s5044_s27 = sshll.u32 %s10346_s23, 3 }
  0x54   : > { %s6912_s30 = scalar_lea.vmem %s9936_s0, %s5044_s27 }
  0x55   : > { %v6915_v16 = vld [vmem:[%s6912_s30] sm:$0xff]  ;;  %v6921_v20 = vld [vmem:[%s6912_s30 + $0x8] sm:$0xff]  ;;  %v6926_v22 = vld [vmem:[%s6912_s30 + $0x10] sm:$0xff] }
  0x56   : > { %980 = vrot.lane.b32.xlu0 %v6765_v3, %s6700_s25  ;;  %v6939_v26 = vld [vmem:[%s6912_s30 + $0x18] sm:$0xff]  ;;  %v6963_v35 = vld [vmem:[%s6912_s30 + $0x20] sm:$0xff]  ;;  %v6973_v38 = vld [vmem:[%s6912_s30 + $0x28] sm:$0xff] }
  0x57   : > { %224 = vrot.lane.b32.xlu1 %v6760_v2, %s6701_s18  ;;  %10038 = vst [vmem:[#allocation11_spill] sm:$0xff] %v6963_v35  ;;  %10039 = vst [vmem:[#allocation12_spill] sm:$0xff] %v6973_v38  ;;  %v7011_v51 = vld [vmem:[%s6912_s30 + $0x30] sm:$0xff]  ;;  %v7023_v55 = vld [vmem:[%s6912_s30 + $0x38] sm:$0xff] }
  0x58   : > { %10041 = vst [vmem:[#allocation14_spill] sm:$0xff] %v7011_v51  ;;  %10043 = vst [vmem:[#allocation16_spill] sm:$0xff] %v7023_v55 }
  0x5a   : > { %702 = vrot.lane.b32.xlu0 %v6746_v0, %s6702_s26 }
  0x5b   : > { %704 = vrot.lane.b32.xlu1 %v6760_v2, %s6702_s26 }
  0x5f   : > { %226 = vrot.lane.b32.xlu1 %v6751_v1, %s6701_s18 }
  0x63   : > { %228 = vrot.lane.b32.xlu1 %v6765_v3, %s6701_s18 }
  0x80   : > { %v767_v17 = vpop.permute.xlu0 %766 }
  0x81   : > { %v771_v18 = vpop.permute.xlu1 %770  ;;  %v6918_v19 = vmul.f32 %v767_v17, %v6915_v16 }
  0x82   : > { %v6936_v25 = vmul.f32 %v771_v18, %v6926_v22 }
  0x83   : > { %846 = vrot.lane.b32.xlu0 %v6918_v19, %s6703_s4 }
  0x84   : > { %v769_v21 = vpop.permute.xlu0 %768 }
  0x85   : > { %v773_v23 = vpop.permute.xlu1 %772  ;;  %v6929_v24 = vmul.f32 %v769_v21, %v6921_v20 }
  0x86   : > { %v6946_v29 = vmul.f32 %v773_v23, %v6939_v26  ;;  %v7073_v23 = vld [vmem:[%s6912_s30 + $0x40] sm:$0xff] }
  0x87   : > { %848 = vrot.lane.b32.xlu1 %v6929_v24, %s6703_s4  ;;  %910 = vrot.lane.b32.xlu0 %v6918_v19, %s6704_s5  ;;  %10047 = vst [vmem:[#allocation20_spill] sm:$0xff] %v7073_v23 }
  0x88   : > { %v495_v27 = vpop.permute.xlu0 %494 }
  0x89   : > { %v497_v28 = vpop.permute.xlu1 %496  ;;  %v6949_v30 = vmul.f32 %v495_v27, %v6915_v16 }
  0x8a   : > { %v6956_v32 = vmul.f32 %v497_v28, %v6921_v20 }
  0x8b   : > { %912 = vrot.lane.b32.xlu1 %v6929_v24, %s6704_s5  ;;  %850 = vrot.lane.b32.xlu0 %v6936_v25, %s6703_s4 }
  0x8c   : > { %v775_v34 = vpop.permute.xlu0 %774 }
  0x8d   : > { %v777_v31 = vpop.permute.xlu1 %776  ;;  %v6970_v37 = vmul.f32 %v775_v34, %v6963_v35 }
  0x8e   : > { %v6980_v41 = vmul.f32 %v777_v31, %v6973_v38 }
  0x8f   : > { %852 = vrot.lane.b32.xlu0 %v6946_v29, %s6703_s4  ;;  %574 = vrot.lane.b32.xlu1 %v6949_v30, %s6703_s4 }
  0x90   : > { %v499_v39 = vpop.permute.xlu0 %498  ;;  %10040 = vst [vmem:[#allocation13_spill] sm:$0xff] %v6980_v41 }
  0x91   : > { %v501_v33 = vpop.permute.xlu1 %500  ;;  %v6983_v42 = vmul.f32 %v499_v39, %v6926_v22 }
  0x92   : > { %v6990_v44 = vmul.f32 %v501_v33, %v6939_v26  ;;  %v7087_v33 = vld [vmem:[%s6912_s30 + $0x48] sm:$0xff] }
  0x93   : > { %914 = vrot.lane.b32.xlu0 %v6936_v25, %s6704_s5  ;;  %576 = vrot.lane.b32.xlu1 %v6956_v32, %s6703_s4  ;;  %10049 = vst [vmem:[#allocation22_spill] sm:$0xff] %v7087_v33 }
  0x94   : > { %v779_v43 = vpop.permute.xlu0 %778 }
  0x95   : > { %v781_v36 = vpop.permute.xlu1 %780  ;;  %v7020_v53 = vmul.f32 %v779_v43, %v7011_v51 }
  0x96   : > { %v7035_v58 = vmul.f32 %v781_v36, %v7023_v55 }
  0x97   : > { %916 = vrot.lane.b32.xlu0 %v6946_v29, %s6704_s5  ;;  %638 = vrot.lane.b32.xlu1 %v6949_v30, %s6704_s5  ;;  %10042 = vst [vmem:[#allocation15_spill] sm:$0xff] %v7020_v53 }
  0x98   : > { %v503_v46 = vpop.permute.xlu0 %502  ;;  %10045 = vst [vmem:[#allocation18_spill] sm:$0xff] %v7035_v58 }
  0x99   : > { %v505_v40 = vpop.permute.xlu1 %504  ;;  %v7030_v56 = vmul.f32 %v503_v46, %v6963_v35  ;;  %v6705_v46 = vmov 0  }
  0x9a   : > { %v7042_v60 = vmul.f32 %v505_v40, %v6973_v38  ;;  %5995 = vset.pattern.permute.xlu1 %v6705_v46  ;;  %5996 = vset.pattern.permute.xlu0 %v6705_v46 }
  0x9b   : > { %854 = vrot.lane.b32.xlu0 %v6970_v37, %s6703_s4  ;;  %640 = vrot.lane.b32.xlu1 %v6956_v32, %s6704_s5  ;;  %10044 = vst [vmem:[#allocation17_spill] sm:$0xff] %v7030_v56 }
  0x9c   : > { %v783_v48 = vpop.permute.xlu0 %782  ;;  %10046 = vst [vmem:[#allocation19_spill] sm:$0xff] %v7042_v60 }
  0x9d   : > { %v785_v45 = vpop.permute.xlu1 %784  ;;  %v7082_v28 = vmul.f32 %v783_v48, %v7073_v23 }
  0x9e   : > { %v7094_v34 = vmul.f32 %v785_v45, %v7087_v33 }
  0x9f   : > { %856 = vrot.lane.b32.xlu0 %v6980_v41, %s6703_s4  ;;  %578 = vrot.lane.b32.xlu1 %v6983_v42, %s6703_s4  ;;  %10048 = vst [vmem:[#allocation21_spill] sm:$0xff] %v7082_v28 }
  0xa0   : > { %v507_v50 = vpop.permute.xlu0 %506  ;;  %10050 = vst [vmem:[#allocation23_spill] sm:$0xff] %v7094_v34 }
  0xa1   : > { %v509_v47 = vpop.permute.xlu1 %508  ;;  %v7097_v36 = vmul.f32 %v507_v50, %v7011_v51 }
  0xa2   : > { %v7108_v43 = vmul.f32 %v509_v47, %v7023_v55  ;;  %v7151_v55 = vld [vmem:[%s6912_s30 + $0x58] sm:$0xff] }
  0xa3   : > { %918 = vrot.lane.b32.xlu0 %v6970_v37, %s6704_s5  ;;  %580 = vrot.lane.b32.xlu1 %v6990_v44, %s6703_s4  ;;  %10051 = vst [vmem:[#allocation24_spill] sm:$0xff] %v7097_v36  ;;  %10055 = vst [vmem:[#allocation28_spill] sm:$0xff] %v7151_v55 }
  0xa4   : > { %v787_v54 = vpop.permute.xlu0 %786  ;;  %10052 = vst [vmem:[#allocation25_spill] sm:$0xff] %v7108_v43 }
  0xa5   : > { %v7004_v49 = vpop.permute.xlu1 %788 }
  0xa7   : > { %920 = vrot.lane.b32.xlu0 %v6980_v41, %s6704_s5  ;;  %642 = vrot.lane.b32.xlu1 %v6983_v42, %s6704_s5 }
  0xa8   : > { %v511_v59 = vpop.permute.xlu0 %510 }
  0xa9   : > { %v7013_v52 = vpop.permute.xlu1 %512  ;;  %v7164_v51 = vmul.f32 %v511_v59, %v7073_v23 }
  0xab   : > { %982 = vrot.lane.b32.xlu0 %v6778_v4, %s6700_s25  ;;  %644 = vrot.lane.b32.xlu1 %v6990_v44, %s6704_s5  ;;  %10057 = vst [vmem:[#allocation30_spill] sm:$0xff] %v7164_v51 }
  0xac   : > { %v7050_v62 = vpop.permute.xlu0 %790 }
  0xad   : > { %v7032_v57 = vpop.permute.xlu1 %792 }
  0xaf   : > { %984 = vrot.lane.b32.xlu0 %v6783_v5, %s6700_s25  ;;  %708 = vrot.lane.b32.xlu1 %v6765_v3, %s6702_s26 }
  0xb0   : > { %v7058_v17 = vpop.permute.xlu0 %514 }
  0xb1   : > { %v7044_v61 = vpop.permute.xlu1 %516 }
  0xb2   : > { %v7250_v35 = vmul.f32 %v7044_v61, %v7151_v55 }
  0xb3   : > { %706 = vrot.lane.b32.xlu0 %v6751_v1, %s6702_s26  ;;  %230 = vrot.lane.b32.xlu1 %v6778_v4, %s6701_s18 }
  0xb4   : > { %v7070_v21 = vpop.permute.xlu0 %794  ;;  %10064 = vst [vmem:[#allocation37_spill] sm:$0xff] %v7250_v35 }
  0xb5   : > { %v7056_v63 = vpop.permute.xlu1 %796 }
  0xb7   : > { %858 = vrot.lane.b32.xlu0 %v7020_v53, %s6703_s4  ;;  %232 = vrot.lane.b32.xlu1 %v6783_v5, %s6701_s18 }
  0xb8   : > { %v7084_v31 = vpop.permute.xlu0 %518 }
  0xb9   : > { %v7064_v18 = vpop.permute.xlu1 %520 }
  0xbb   : > { %860 = vrot.lane.b32.xlu0 %v7035_v58, %s6703_s4  ;;  %582 = vrot.lane.b32.xlu1 %v7030_v56, %s6703_s4 }
  0xbc   : > { %v7105_v40 = vpop.permute.xlu0 %974 }
  0xbd   : > { %v7079_v27 = vpop.permute.xlu1 %976 }
  0xbf   : > { %922 = vrot.lane.b32.xlu0 %v7020_v53, %s6704_s5  ;;  %584 = vrot.lane.b32.xlu1 %v7042_v60, %s6703_s4 }
  0xc0   : > { %v7116_v48 = vpop.permute.xlu0 %522 }
  0xc1   : > { %v7099_v39 = vpop.permute.xlu1 %524 }
  0xc3   : > { %924 = vrot.lane.b32.xlu0 %v7035_v58, %s6704_s5  ;;  %646 = vrot.lane.b32.xlu1 %v7030_v56, %s6704_s5 }
  0xc4   : > { %v7128_v50 = vpop.permute.xlu0 %978 }
  0xc5   : > { %v7114_v45 = vpop.permute.xlu1 %222 }
  0xc7   : > { %986 = vrot.lane.b32.xlu0 %v6796_v6, %s6700_s25  ;;  %648 = vrot.lane.b32.xlu1 %v7042_v60, %s6704_s5 }
  0xc9   : > { %v7122_v47 = vpop.permute.xlu1 %224 }
  0xcb   : > { %988 = vrot.lane.b32.xlu0 %v6801_v7, %s6700_s25  ;;  %712 = vrot.lane.b32.xlu1 %v6783_v5, %s6702_s26  ;;  %v7211_v5 = vld [vmem:[%s6912_s30 + $0x60] sm:$0xff] }
  0xcc   : > { %10059 = vst [vmem:[#allocation32_spill] sm:$0xff] %v7211_v5 }
  0xcd   : > { %v7134_v46 = vpop.permute.xlu1 %704 }
  0xcf   : > { %710 = vrot.lane.b32.xlu0 %v6778_v4, %s6702_s26  ;;  %234 = vrot.lane.b32.xlu1 %v6796_v6, %s6701_s18  ;;  %v7174_v4 = vmul.f32 %v7013_v52, %v7087_v33 }
  0xd1   : > { %10058 = vst [vmem:[#allocation31_spill] sm:$0xff] %v7174_v4 }
  0xd3   : > { %862 = vrot.lane.b32.xlu0 %v7082_v28, %s6703_s4  ;;  %236 = vrot.lane.b32.xlu1 %v6801_v7, %s6701_s18 }
  0xd7   : > { %864 = vrot.lane.b32.xlu0 %v7094_v34, %s6703_s4  ;;  %586 = vrot.lane.b32.xlu1 %v7097_v36, %s6703_s4 }
  0xdb   : > { %926 = vrot.lane.b32.xlu0 %v7082_v28, %s6704_s5  ;;  %588 = vrot.lane.b32.xlu1 %v7108_v43, %s6703_s4  ;;  %v7139_v28 = vld [vmem:[%s6912_s30 + $0x50] sm:$0xff] }
  0xdc   : > { %10053 = vst [vmem:[#allocation26_spill] sm:$0xff] %v7139_v28 }
  0xdf   : > { %928 = vrot.lane.b32.xlu0 %v7094_v34, %s6704_s5  ;;  %650 = vrot.lane.b32.xlu1 %v7097_v36, %s6704_s5  ;;  %v7136_v34 = vpop.permute.xlu0 %980  ;;  %v7148_v36 = vpop.permute.xlu1 %226 }
  0xe3   : > { %990 = vrot.lane.b32.xlu0 %v6819_v9, %s6700_s25  ;;  %652 = vrot.lane.b32.xlu1 %v7108_v43, %s6704_s5  ;;  %v7146_v43 = vmul.f32 %v787_v54, %v7139_v28  ;;  %v7170_v54 = vpop.permute.xlu1 %228 }
  0xe5   : > { %10054 = vst [vmem:[#allocation27_spill] sm:$0xff] %v7146_v43 }
  0xe7   : > { %992 = vrot.lane.b32.xlu0 %v6814_v8, %s6700_s25  ;;  %716 = vrot.lane.b32.xlu1 %v6801_v7, %s6702_s26  ;;  %v7157_v7 = vpop.permute.xlu0 %702 }
  0xeb   : > { %714 = vrot.lane.b32.xlu0 %v6796_v6, %s6702_s26  ;;  %238 = vrot.lane.b32.xlu1 %v6819_v9, %s6701_s18  ;;  %v7161_v6 = vmul.f32 %v7004_v49, %v7151_v55 }
  0xed   : > { %10056 = vst [vmem:[#allocation29_spill] sm:$0xff] %v7161_v6 }
  0xef   : > { %866 = vrot.lane.b32.xlu0 %v7146_v43, %s6703_s4  ;;  %240 = vrot.lane.b32.xlu1 %v6814_v8, %s6701_s18 }
  0xf3   : > { %868 = vrot.lane.b32.xlu0 %v7161_v6, %s6703_s4  ;;  %590 = vrot.lane.b32.xlu1 %v7164_v51, %s6703_s4 }
  0xf5   : > { %v7176_v58 = vpop.permute.xlu0 %846 }
  0xf7   : > { %930 = vrot.lane.b32.xlu0 %v7146_v43, %s6704_s5  ;;  %592 = vrot.lane.b32.xlu1 %v7174_v4, %s6703_s4 }
  0xf9   : > { %v7182_v49 = vpop.permute.xlu1 %848  ;;  %v7184_v59 = vpop.permute.xlu0 %910 }
  0xfb   : > { %932 = vrot.lane.b32.xlu0 %v7161_v6, %s6704_s5  ;;  %654 = vrot.lane.b32.xlu1 %v7164_v51, %s6704_s5 }
  0xfd   : > { %v7190_v52 = vpop.permute.xlu1 %912  ;;  %v7192_v33 = vpop.permute.xlu0 %850 }
  0xff   : > { %994 = vrot.lane.b32.xlu0 %v6837_v11, %s6700_s25  ;;  %656 = vrot.lane.b32.xlu1 %v7174_v4, %s6704_s5  ;;  %v7219_v4 = vmul.f32 %v7050_v62, %v7211_v5  ;;  %v7238_v62 = vmul.f32 %v7058_v17, %v7139_v28 }
 0x101   : > { %v7198_v43 = vpop.permute.xlu0 %852  ;;  %v7200_v23 = vpop.permute.xlu1 %574  ;;  %10060 = vst [vmem:[#allocation33_spill] sm:$0xff] %v7219_v4  ;;  %10063 = vst [vmem:[#allocation36_spill] sm:$0xff] %v7238_v62 }
 0x103   : > { %996 = vrot.lane.b32.xlu0 %v6832_v10, %s6700_s25  ;;  %720 = vrot.lane.b32.xlu1 %v6814_v8, %s6702_s26  ;;  %v7226_v8 = vld [vmem:[%s6912_s30 + $0x68] sm:$0xff] }
 0x104   : > { %10061 = vst [vmem:[#allocation34_spill] sm:$0xff] %v7226_v8 }
 0x105   : > { %v7206_v6 = vpop.permute.xlu0 %914  ;;  %v7208_v51 = vpop.permute.xlu1 %576 }
 0x107   : > { %718 = vrot.lane.b32.xlu0 %v6819_v9, %s6702_s26  ;;  %242 = vrot.lane.b32.xlu1 %v6837_v11, %s6701_s18  ;;  %v7234_v9 = vmul.f32 %v7032_v57, %v7226_v8 }
 0x109   : > { %v7221_v53 = vpop.permute.xlu0 %916  ;;  %v7223_v60 = vpop.permute.xlu1 %638  ;;  %10062 = vst [vmem:[#allocation35_spill] sm:$0xff] %v7234_v9 }
 0x10b   : > { %870 = vrot.lane.b32.xlu0 %v7219_v4, %s6703_s4  ;;  %244 = vrot.lane.b32.xlu1 %v6832_v10, %s6701_s18 }
 0x10d   : > { %v7240_v56 = vpop.permute.xlu0 %854  ;;  %v7242_v38 = vpop.permute.xlu1 %640 }
 0x10f   : > { %872 = vrot.lane.b32.xlu0 %v7234_v9, %s6703_s4  ;;  %594 = vrot.lane.b32.xlu1 %v7238_v62, %s6703_s4 }
 0x111   : > { %v7252_v57 = vpop.permute.xlu0 %856  ;;  %v7254_v1 = vpop.permute.xlu1 %578 }
 0x112   : > { %10065 = vst [vmem:[#allocation38_spill] sm:$0xff] %v7252_v57 }
 0x113   : > { %934 = vrot.lane.b32.xlu0 %v7219_v4, %s6704_s5  ;;  %596 = vrot.lane.b32.xlu1 %v7250_v35, %s6703_s4 }
 0x115   : > { %v7260_v17 = vpop.permute.xlu0 %918  ;;  %v7262_v28 = vpop.permute.xlu1 %580 }
 0x116   : > { %10066 = vst [vmem:[#allocation39_spill] sm:$0xff] %v7260_v17 }
 0x117   : > { %936 = vrot.lane.b32.xlu0 %v7234_v9, %s6704_s5  ;;  %658 = vrot.lane.b32.xlu1 %v7238_v62, %s6704_s5 }
 0x119   : > { %v7268_v61 = vpop.permute.xlu0 %920  ;;  %v7270_v55 = vpop.permute.xlu1 %642 }
 0x11a   : > { %10067 = vst [vmem:[#allocation40_spill] sm:$0xff] %v7268_v61  ;;  %v7289_v61 = vld [vmem:[%s6912_s30 + $0x70] sm:$0xff] }
 0x11b   : > { %998 = vrot.lane.b32.xlu0 %v6855_v13, %s6700_s25  ;;  %660 = vrot.lane.b32.xlu1 %v7250_v35, %s6704_s5  ;;  %10071 = vst [vmem:[#allocation44_spill] sm:$0xff] %v7289_v61  ;;  %v7297_v35 = vmul.f32 %v7070_v21, %v7289_v61  ;;  %v7316_v21 = vmul.f32 %v7084_v31, %v7211_v5 }
 0x11d   : > { %v7276_v4 = vpop.permute.xlu0 %982  ;;  %v7278_v57 = vpop.permute.xlu1 %644  ;;  %10072 = vst [vmem:[#allocation45_spill] sm:$0xff] %v7297_v35  ;;  %10076 = vst [vmem:[#allocation49_spill] sm:$0xff] %v7316_v21 }
 0x11e   : > { %10068 = vst [vmem:[#allocation41_spill] sm:$0xff] %v7276_v4 }
 0x11f   : > { %1000 = vrot.lane.b32.xlu0 %v6850_v12, %s6700_s25  ;;  %724 = vrot.lane.b32.xlu1 %v6832_v10, %s6702_s26  ;;  %v7304_v10 = vld [vmem:[%s6912_s30 + $0x78] sm:$0xff] }
 0x120   : > { %10074 = vst [vmem:[#allocation47_spill] sm:$0xff] %v7304_v10 }
 0x121   : > { %v7284_v9 = vpop.permute.xlu0 %984  ;;  %v7286_v62 = vpop.permute.xlu1 %708 }
 0x122   : > { %10069 = vst [vmem:[#allocation42_spill] sm:$0xff] %v7284_v9  ;;  %10070 = vst [vmem:[#allocation43_spill] sm:$0xff] %v7286_v62 }
 0x123   : > { %722 = vrot.lane.b32.xlu0 %v6837_v11, %s6702_s26  ;;  %246 = vrot.lane.b32.xlu1 %v6855_v13, %s6701_s18  ;;  %v7312_v11 = vmul.f32 %v7056_v63, %v7304_v10 }
 0x125   : > { %v7299_v4 = vpop.permute.xlu0 %706  ;;  %v7301_v41 = vpop.permute.xlu1 %230  ;;  %10075 = vst [vmem:[#allocation48_spill] sm:$0xff] %v7312_v11 }
 0x126   : > { %10073 = vst [vmem:[#allocation46_spill] sm:$0xff] %v7301_v41  ;;  %v7328_v41 = vmul.f32 %v7064_v18, %v7226_v8 }
 0x127   : > { %874 = vrot.lane.b32.xlu0 %v7297_v35, %s6703_s4  ;;  %248 = vrot.lane.b32.xlu1 %v6850_v12, %s6701_s18 }
 0x128   : > { %10077 = vst [vmem:[#allocation50_spill] sm:$0xff] %v7328_v41 }
 0x129   : > { %v7318_v9 = vpop.permute.xlu0 %858  ;;  %v7320_v62 = vpop.permute.xlu1 %232 }
 0x12b   : > { %876 = vrot.lane.b32.xlu0 %v7312_v11, %s6703_s4  ;;  %598 = vrot.lane.b32.xlu1 %v7316_v21, %s6703_s4 }
 0x12d   : > { %v7330_v63 = vpop.permute.xlu0 %860  ;;  %v7332_v17 = vpop.permute.xlu1 %582 }
 0x12e   : > { %10078 = vst [vmem:[#allocation51_spill] sm:$0xff] %v7330_v63 }
 0x12f   : > { %938 = vrot.lane.b32.xlu0 %v7297_v35, %s6704_s5  ;;  %600 = vrot.lane.b32.xlu1 %v7328_v41, %s6703_s4 }
 0x131   : > { %v7338_v31 = vpop.permute.xlu0 %922  ;;  %v7340_v5 = vpop.permute.xlu1 %584 }
 0x133   : > { %940 = vrot.lane.b32.xlu0 %v7312_v11, %s6704_s5  ;;  %662 = vrot.lane.b32.xlu1 %v7316_v21, %s6704_s5 }
 0x135   : > { %v7346_v18 = vpop.permute.xlu0 %924  ;;  %v7348_v8 = vpop.permute.xlu1 %646 }
 0x136   : > { %10079 = vst [vmem:[#allocation52_spill] sm:$0xff] %v7346_v18 }
 0x137   : > { %1002 = vrot.lane.b32.xlu0 %v6873_v15, %s6700_s25  ;;  %664 = vrot.lane.b32.xlu1 %v7328_v41, %s6704_s5  ;;  %v7372_v41 = vmul.f32 %v7099_v39, %v7304_v10 }
 0x139   : > { %v7354_v35 = vpop.permute.xlu0 %986  ;;  %v7356_v63 = vpop.permute.xlu1 %648 }
 0x13a   : > { %10080 = vst [vmem:[#allocation53_spill] sm:$0xff] %v7354_v35 }
 0x13b   : > { %1004 = vrot.lane.b32.xlu0 %v6868_v14, %s6700_s25  ;;  %728 = vrot.lane.b32.xlu1 %v6850_v12, %s6702_s26  ;;  %v894_v12 = vadd.f32 %v7176_v58, %v6918_v19  ;;  %v7401_v19 = vmul.f32 %v7114_v45, %v6915_v16  ;;  %s5045_s25 = sshll.u32 %s5038_s13, 1 }
 0x13c   : > { %p169_p4 = scmp.lt.s32.totalorder %s5045_s25, 5 }
 0x13d   : > { %v7362_v11 = vpop.permute.xlu0 %988  ;;  %v7364_v21 = vpop.permute.xlu1 %712  ;;  %v958_v10 = vadd.f32 %v7184_v59, %v894_v12 }
 0x13e   : > { %10081 = vst [vmem:[#allocation54_spill] sm:$0xff] %v7362_v11  ;;  %s10348_s25 = smov (!%p169_p4, %s5045_s25), 5 }
 0x13f   : > { %726 = vrot.lane.b32.xlu0 %v6855_v13, %s6702_s26  ;;  %252 = vrot.lane.b32.xlu1 %v6868_v14, %s6701_s18  ;;  %v7386_v13 = vmul.f32 %v7116_v48, %v7289_v61  ;;  %v1022_v61 = vadd.f32 %v7105_v40, %v958_v10  ;;  %v622_v10 = vadd.f32 %v7200_v23, %v6949_v30 }
 0x141   : > { %v7374_v18 = vpop.permute.xlu0 %710  ;;  %v7376_v35 = vpop.permute.xlu1 %234  ;;  %6277 = vrcp.f32 %v1022_v61 }
 0x142   : > { %10082 = vst [vmem:[#allocation55_spill] sm:$0xff] %v7376_v35  ;;  %v895_v35 = vadd.f32 %v7182_v49, %v6929_v24  ;;  %v7415_v24 = vmul.f32 %v7122_v47, %v6921_v20  ;;  %v623_v47 = vadd.f32 %v7208_v51, %v6956_v32 }
 0x143   : > { %250 = vrot.lane.b32.xlu0 %v6873_v15, %s6701_s18  ;;  %604 = vrot.lane.b32.xlu1 %v7372_v41, %s6703_s4 }
 0x144   : > { %v959_v59 = vadd.f32 %v7190_v52, %v895_v35  ;;  %v686_v35 = vadd.f32 %v7223_v60, %v622_v10  ;;  %v687_v60 = vadd.f32 %v7242_v38, %v623_v47 }
 0x145   : > { %v7388_v11 = vpop.permute.xlu0 %862  ;;  %v7390_v39 = vpop.permute.xlu1 %236 }
 0x146   : > { %v1023_v49 = vadd.f32 %v7079_v27, %v959_v59  ;;  %v750_v30 = vadd.f32 %v7157_v7, %v686_v35  ;;  %v897_v7 = vadd.f32 %v7198_v43, %v6946_v29  ;;  %v751_v32 = vadd.f32 %v7134_v46, %v687_v60 }
 0x147   : > { %602 = vrot.lane.b32.xlu0 %v7386_v13, %s6703_s4  ;;  %666 = vrot.lane.b32.xlu1 %v7386_v13, %s6704_s5  ;;  %v7470_v29 = vmul.f32 %v7148_v36, %v6926_v22  ;;  %v624_v22 = vadd.f32 %v7254_v1, %v6983_v42  ;;  %v898_v42 = vadd.f32 %v7240_v56, %v6970_v37  ;;  %v10085_v37 = vld [vmem:[#allocation13_spill] sm:$0xff]  ;;  %v10086_v56 = vld [vmem:[#allocation38_spill] sm:$0xff] }
 0x148   : > { %6279 = vrcp.f32 %v1023_v49 }
 0x149   : > { %v7403_v58 = vpop.permute.xlu0 %864  ;;  %v7405_v48 = vpop.permute.xlu1 %586  ;;  %v688_v12 = vadd.f32 %v7270_v55, %v624_v22  ;;  %v10092_v22 = vld [vmem:[#allocation42_spill] sm:$0xff] }
 0x14b   : > { %668 = vrot.lane.b32.xlu1 %v7372_v41, %s6704_s5  ;;  %302 = vrot.lane.b32.xlu0 %v7401_v19, %s6703_s4 }
 0x14d   : > { %v7417_v16 = vpop.permute.xlu0 %926  ;;  %v7419_v45 = vpop.permute.xlu1 %588 }
 0x14f   : > { %730 = vrot.lane.b32.xlu1 %v6873_v15, %s6702_s26  ;;  %304 = vrot.lane.b32.xlu0 %v7415_v24, %s6703_s4  ;;  %v896_v15 = vadd.f32 %v7192_v33, %v6936_v25 }
 0x151   : > { %v7429_v20 = vpop.permute.xlu0 %928  ;;  %v7431_v40 = vpop.permute.xlu1 %650  ;;  %v960_v52 = vadd.f32 %v7206_v6, %v896_v15  ;;  %v10087_v15 = vld [vmem:[#allocation41_spill] sm:$0xff] }
 0x153   : > { %732 = vrot.lane.b32.xlu1 %v6868_v14, %s6702_s26  ;;  %366 = vrot.lane.b32.xlu0 %v7401_v19, %s6704_s5  ;;  %v7452_v14 = vpop.eup %6277  ;;  %v1024_v6 = vadd.f32 %v7128_v50, %v960_v52  ;;  %v10089_v52 = vld [vmem:[#allocation40_spill] sm:$0xff]  ;;  %s5046_s26 = sshll.u32 %s10348_s25, 3 }
 0x154   : > { %v1070_v25 = vmul.f32 %v7452_v14, %v750_v30  ;;  %v7466_v33 = vpop.eup %6279  ;;  %v10088_v30 = vld [vmem:[#allocation2_spill] sm:$0xff]  ;;  %s172_s28 = scalar_lea.vmem %s9939_s3, %s5046_s26 }
 0x155   : > { %v7443_v23 = vpop.permute.xlu0 %990  ;;  %v7445_v27 = vpop.permute.xlu1 %652  ;;  %v1071_v43 = vmul.f32 %v7466_v33, %v751_v32  ;;  %6281 = vrcp.f32 %v1024_v6  ;;  %v10090_v32 = vld [vmem:[#allocation11_spill] sm:$0xff]  ;;  %v10091_v6 = vld [vmem:[#allocation46_spill] sm:$0xff] }
 0x157   : > { %432 = vrot.lane.b32.xlu1 %v6760_v2, %s6706_s6  ;;  %368 = vrot.lane.b32.xlu0 %v7415_v24, %s6704_s5  ;;  %v961_v2 = vadd.f32 %v7221_v53, %v897_v7 }
 0x159   : > { %v7458_v38 = vpop.permute.xlu0 %992  ;;  %v7460_v51 = vpop.permute.xlu1 %716  ;;  %v1025_v50 = vadd.f32 %v7136_v34, %v961_v2  ;;  %v752_v34 = vadd.f32 %v7299_v4, %v688_v12  ;;  %v10084_v4 = vld [vmem:[#allocation43_spill] sm:$0xff]  ;;  %v7529_v2 = vmul.f32 %v10091_v6, %v10090_v32  ;;  %v10100_v32 = vld [vmem:[#allocation53_spill] sm:$0xff] }
 0x15b   : > { %1200 = vperm.xlu1 %5995, %v1070_v25   ;;  %430 = vrot.lane.b32.xlu0 %v6746_v0, %s6706_s6  ;;  %v7482_v0 = vmul.f32 %v7170_v54, %v6939_v26  ;;  %6283 = vrcp.f32 %v1025_v50  ;;  %v625_v26 = vadd.f32 %v7262_v28, %v6990_v44  ;;  %v10083_v44 = vld [vmem:[#allocation39_spill] sm:$0xff] }
 0x15c   : > { %v962_v28 = vadd.f32 %v10083_v44, %v898_v42  ;;  %v10094_v42 = vld [vmem:[#allocation17_spill] sm:$0xff] }
 0x15d   : > { %v7473_v46 = vpop.permute.xlu0 %714  ;;  %v7475_v61 = vpop.permute.xlu1 %238  ;;  %v689_v55 = vadd.f32 %v7278_v57, %v625_v26  ;;  %v899_v57 = vadd.f32 %v10086_v56, %v10085_v37  ;;  %v10093_v26 = vld [vmem:[#allocation12_spill] sm:$0xff]  ;;  %v10096_v56 = vld [vmem:[#allocation15_spill] sm:$0xff] }
 0x15f   : > { %1205 = vperm.xlu1 %5995, %v1071_v43   ;;  %306 = vrot.lane.b32.xlu0 %v7470_v29, %s6703_s4  ;;  %v7509_v59 = vpop.eup %6281  ;;  %v753_v49 = vadd.f32 %v10084_v4, %v689_v55  ;;  %v963_v7 = vadd.f32 %v10089_v52, %v899_v57  ;;  %v626_v55 = vadd.f32 %v7332_v17, %v10094_v42  ;;  %v10103_v42 = vld [vmem:[#allocation14_spill] sm:$0xff] }
 0x160   : > { %v1072_v10 = vmul.f32 %v7509_v59, %v752_v34  ;;  %v7540_v34 = vmul.f32 %v7320_v62, %v10093_v26  ;;  %v900_v57 = vadd.f32 %v7318_v9, %v10096_v56  ;;  %v10098_v9 = vld [vmem:[#allocation18_spill] sm:$0xff]  ;;  %v10102_v26 = vld [vmem:[#allocation52_spill] sm:$0xff] }
 0x161   : > { %v7486_v53 = vpop.permute.xlu0 %866  ;;  %v7488_v36 = vpop.permute.xlu1 %240  ;;  %v1027_v12 = vadd.f32 %v10092_v22, %v963_v7  ;;  %v690_v4 = vadd.f32 %v7348_v8, %v626_v55  ;;  %v10101_v22 = vld [vmem:[#allocation3_spill] sm:$0xff] }
 0x162   : > { %v10104_v55 = vld [vmem:[#allocation55_spill] sm:$0xff] }
 0x163   : > { %372 = vrot.lane.b32.xlu1 %v7482_v0, %s6704_s5  ;;  %308 = vrot.lane.b32.xlu0 %v7482_v0, %s6703_s4 }
 0x165   : > { %v7498_v54 = vpop.permute.xlu0 %868  ;;  %v7500_v1 = vpop.permute.xlu1 %590 }
 0x166   : > { %v7523_v60 = vpop.eup %6283 }
 0x167   : > { %436 = vrot.lane.b32.xlu1 %v6765_v3, %s6706_s6  ;;  %370 = vrot.lane.b32.xlu0 %v7470_v29, %s6704_s5  ;;  %v1026_v3 = vadd.f32 %v10087_v15, %v962_v28  ;;  %v1073_v25 = vmul.f32 %v7523_v60, %v753_v49  ;;  %v10095_v49 = vld [vmem:[#allocation19_spill] sm:$0xff]  ;;  %v10097_v15 = vld [vmem:[#allocation4_spill] sm:$0xff] }
 0x168   : > { %v627_v62 = vadd.f32 %v7340_v5, %v10095_v49  ;;  %v964_v5 = vadd.f32 %v7338_v31, %v900_v57  ;;  %v10106_v57 = vld [vmem:[#allocation16_spill] sm:$0xff] }
 0x169   : > { %v7514_v35 = vpop.permute.xlu0 %930  ;;  %v7516_v47 = vpop.permute.xlu1 %592  ;;  %6285 = vrcp.f32 %v1026_v3 }
 0x16a   : > { %6287 = vrcp.f32 %v1027_v12  ;;  %v691_v8 = vadd.f32 %v7356_v63, %v627_v62  ;;  %v1028_v6 = vadd.f32 %v10100_v32, %v964_v5 }
 0x16b   : > { %1210 = vperm.xlu1 %5995, %v1072_v10   ;;  %434 = vrot.lane.b32.xlu0 %v10088_v30, %s6706_s6  ;;  %v754_v10 = vadd.f32 %v7374_v18, %v690_v4  ;;  %v7585_v4 = vmul.f32 %v10104_v55, %v10103_v42 }
 0x16c   : > { %v755_v18 = vadd.f32 %v7364_v21, %v691_v8  ;;  %6289 = vrcp.f32 %v1028_v6  ;;  %v7596_v8 = vmul.f32 %v7390_v39, %v10106_v57  ;;  %v10109_v6 = vld [vmem:[#allocation21_spill] sm:$0xff] }
 0x16d   : > { %v7531_v43 = vpop.permute.xlu0 %932  ;;  %v7533_v50 = vpop.permute.xlu1 %654 }
 0x16f   : > { %1215 = vperm.xlu1 %5995, %v1073_v25   ;;  %310 = vrot.lane.b32.xlu0 %v7529_v2, %s6703_s4  ;;  %v10099_v25 = vld [vmem:[#allocation51_spill] sm:$0xff] }
 0x170   : > { %v901_v63 = vadd.f32 %v10099_v25, %v10098_v9  ;;  %v10108_v25 = vld [vmem:[#allocation25_spill] sm:$0xff] }
 0x171   : > { %v7544_v44 = vpop.permute.xlu0 %994  ;;  %v7546_v28 = vpop.permute.xlu1 %656  ;;  %v629_v39 = vadd.f32 %v7419_v45, %v10108_v25 }
 0x172   : > { %v965_v31 = vadd.f32 %v10102_v26, %v901_v63  ;;  %v10110_v26 = vld [vmem:[#allocation6_spill] sm:$0xff] }
 0x173   : > { %376 = vrot.lane.b32.xlu1 %v7540_v34, %s6704_s5  ;;  %312 = vrot.lane.b32.xlu0 %v7540_v34, %s6703_s4  ;;  %v7567_v3 = vpop.eup %6285 }
 0x174   : > { %v1074_v30 = vmul.f32 %v7567_v3, %v754_v10  ;;  %v7579_v12 = vpop.eup %6287  ;;  %v10105_v10 = vld [vmem:[#allocation54_spill] sm:$0xff] }
 0x175   : > { %v7556_v37 = vpop.permute.xlu0 %996  ;;  %v7558_v17 = vpop.permute.xlu1 %720  ;;  %v1075_v21 = vmul.f32 %v7579_v12, %v755_v18  ;;  %v1029_v56 = vadd.f32 %v10105_v10, %v965_v31 }
 0x176   : > { %v7623_v31 = vpop.eup %6289 }
 0x177   : > { %440 = vrot.lane.b32.xlu1 %v10097_v15, %s6706_s6  ;;  %374 = vrot.lane.b32.xlu0 %v7529_v2, %s6704_s5  ;;  %v10107_v15 = vld [vmem:[#allocation24_spill] sm:$0xff]  ;;  %6291 = vrcp.f32 %v1029_v56  ;;  %v10112_v56 = vld [vmem:[#allocation5_spill] sm:$0xff] }
 0x178   : > { %v628_v5 = vadd.f32 %v7405_v48, %v10107_v15  ;;  %v10113_v15 = vld [vmem:[#allocation20_spill] sm:$0xff] }
 0x179   : > { %v719_v52 = vpop.permute.xlu0 %718  ;;  %v7572_v7 = vpop.permute.xlu1 %242 }
 0x17a   : > { %v692_v9 = vadd.f32 %v7431_v40, %v628_v5  ;;  %v693_v40 = vadd.f32 %v7445_v27, %v629_v39  ;;  %v7641_v5 = vmul.f32 %v7475_v61, %v10113_v15 }
 0x17b   : > { %1220 = vperm.xlu1 %5995, %v1074_v30   ;;  %438 = vrot.lane.b32.xlu0 %v10101_v22, %s6706_s6  ;;  %v902_v22 = vadd.f32 %v7388_v11, %v10109_v6  ;;  %v10111_v11 = vld [vmem:[#allocation23_spill] sm:$0xff] }
 0x17c   : > { %v756_v63 = vadd.f32 %v7473_v46, %v692_v9  ;;  %v757_v46 = vadd.f32 %v7460_v51, %v693_v40  ;;  %v903_v27 = vadd.f32 %v7403_v58, %v10111_v11  ;;  %v10118_v11 = vld [vmem:[#allocation7_spill] sm:$0xff] }
 0x17d   : > { %v7587_v49 = vpop.permute.xlu0 %870  ;;  %v7589_v62 = vpop.permute.xlu1 %244  ;;  %v966_v45 = vadd.f32 %v7417_v16, %v902_v22 }
 0x17e   : > { %v967_v16 = vadd.f32 %v7429_v20, %v903_v27  ;;  %v10115_v20 = vld [vmem:[#allocation30_spill] sm:$0xff] }
 0x17f   : > { %1225 = vperm.xlu1 %5995, %v1075_v21   ;;  %314 = vrot.lane.b32.xlu0 %v7585_v4, %s6703_s4  ;;  %v1076_v21 = vmul.f32 %v7623_v31, %v756_v63  ;;  %v1030_v10 = vadd.f32 %v7443_v23, %v966_v45  ;;  %v10114_v23 = vld [vmem:[#allocation22_spill] sm:$0xff]  ;;  %v630_v63 = vadd.f32 %v7500_v1, %v10115_v20 }
 0x180   : > { %v1031_v58 = vadd.f32 %v7458_v38, %v967_v16  ;;  %v7650_v39 = vmul.f32 %v7488_v36, %v10114_v23  ;;  %v10116_v38 = vld [vmem:[#allocation31_spill] sm:$0xff] }
 0x181   : > { %v7600_v18 = vpop.permute.xlu0 %872  ;;  %v7602_v30 = vpop.permute.xlu1 %594  ;;  %6293 = vrcp.f32 %v1030_v10  ;;  %v694_v22 = vadd.f32 %v7533_v50, %v630_v63  ;;  %v631_v40 = vadd.f32 %v7516_v47, %v10116_v38 }
 0x182   : > { %v7635_v57 = vpop.eup %6291  ;;  %6295 = vrcp.f32 %v1031_v58  ;;  %v10121_v58 = vld [vmem:[#allocation26_spill] sm:$0xff] }
 0x183   : > { %380 = vrot.lane.b32.xlu1 %v7596_v8, %s6704_s5  ;;  %316 = vrot.lane.b32.xlu0 %v7596_v8, %s6703_s4  ;;  %v1077_v51 = vmul.f32 %v7635_v57, %v757_v46  ;;  %v758_v36 = vadd.f32 %v719_v52, %v694_v22  ;;  %v10117_v46 = vld [vmem:[#allocation27_spill] sm:$0xff]  ;;  %v7688_v23 = vmul.f32 %v7572_v7, %v10121_v58 }
 0x184   : > { %v904_v1 = vadd.f32 %v7486_v53, %v10117_v46  ;;  %v10119_v53 = vld [vmem:[#allocation29_spill] sm:$0xff] }
 0x185   : > { %v7612_v32 = vpop.permute.xlu0 %934  ;;  %v7614_v48 = vpop.permute.xlu1 %596 }
 0x186   : > { %v968_v27 = vadd.f32 %v7514_v35, %v904_v1 }
 0x187   : > { %444 = vrot.lane.b32.xlu1 %v10110_v26, %s6706_s6  ;;  %378 = vrot.lane.b32.xlu0 %v7585_v4, %s6704_s5 }
 0x188   : > { %v1032_v16 = vadd.f32 %v7544_v44, %v968_v27  ;;  %v10122_v44 = vld [vmem:[#allocation28_spill] sm:$0xff] }
 0x189   : > { %v7628_v42 = vpop.permute.xlu0 %936  ;;  %v659_v55 = vpop.permute.xlu1 %658  ;;  %v7695_v22 = vmul.f32 %v7589_v62, %v10122_v44 }
 0x18a   : > { %6297 = vrcp.f32 %v1032_v16  ;;  %v10127_v16 = vld [vmem:[#allocation35_spill] sm:$0xff] }
 0x18b   : > { %1230 = vperm.xlu1 %5995, %v1076_v21   ;;  %442 = vrot.lane.b32.xlu0 %v10112_v56, %s6706_s6  ;;  %v695_v21 = vadd.f32 %v7546_v28, %v631_v40  ;;  %v7670_v50 = vpop.eup %6293  ;;  %v905_v28 = vadd.f32 %v7498_v54, %v10119_v53 }
 0x18c   : > { %v1078_v52 = vmul.f32 %v7670_v50, %v758_v36  ;;  %v7682_v15 = vpop.eup %6295 }
 0x18d   : > { %v7643_v9 = vpop.permute.xlu0 %998  ;;  %v661_v25 = vpop.permute.xlu1 %660  ;;  %v759_v47 = vadd.f32 %v7558_v17, %v695_v21  ;;  %v969_v35 = vadd.f32 %v7531_v43, %v905_v28  ;;  %v10123_v43 = vld [vmem:[#allocation36_spill] sm:$0xff] }
 0x18e   : > { %v632_v38 = vadd.f32 %v7602_v30, %v10123_v43 }
 0x18f   : > { %1235 = vperm.xlu1 %5995, %v1077_v51   ;;  %318 = vrot.lane.b32.xlu0 %v7641_v5, %s6703_s4  ;;  %v10120_v51 = vld [vmem:[#allocation8_spill] sm:$0xff]  ;;  %v1079_v17 = vmul.f32 %v7682_v15, %v759_v47  ;;  %v1033_v54 = vadd.f32 %v7556_v37, %v969_v35  ;;  %v10124_v37 = vld [vmem:[#allocation37_spill] sm:$0xff] }
 0x190   : > { %v696_v36 = vadd.f32 %v659_v55, %v632_v38  ;;  %v633_v46 = vadd.f32 %v7614_v48, %v10124_v37  ;;  %v10126_v47 = vld [vmem:[#allocation9_spill] sm:$0xff] }
 0x191   : > { %v7654_v6 = vpop.permute.xlu0 %1000  ;;  %v725_v61 = vpop.permute.xlu1 %724  ;;  %6299 = vrcp.f32 %v1033_v54  ;;  %v10131_v38 = vld [vmem:[#allocation49_spill] sm:$0xff] }
 0x192   : > { %v697_v27 = vadd.f32 %v661_v25, %v633_v46  ;;  %v10128_v25 = vld [vmem:[#allocation10_spill] sm:$0xff] }
 0x193   : > { %384 = vrot.lane.b32.xlu1 %v7650_v39, %s6704_s5  ;;  %320 = vrot.lane.b32.xlu0 %v7650_v39, %s6703_s4 }
 0x194   : > { %v7713_v55 = vpop.eup %6297  ;;  %v761_v53 = vadd.f32 %v725_v61, %v697_v27  ;;  %v10129_v61 = vld [vmem:[#allocation32_spill] sm:$0xff] }
 0x195   : > { %v723_v26 = vpop.permute.xlu0 %722  ;;  %v247_v45 = vpop.permute.xlu1 %246 }
 0x196   : > { %v760_v1 = vadd.f32 %v723_v26, %v696_v36  ;;  %v7727_v58 = vmul.f32 %v247_v45, %v10129_v61 }
 0x197   : > { %448 = vrot.lane.b32.xlu1 %v10118_v11, %s6706_s6  ;;  %382 = vrot.lane.b32.xlu0 %v7641_v5, %s6704_s5  ;;  %v10125_v11 = vld [vmem:[#allocation33_spill] sm:$0xff] }
 0x198   : > { %v906_v30 = vadd.f32 %v7587_v49, %v10125_v11  ;;  %v1080_v48 = vmul.f32 %v7713_v55, %v760_v1  ;;  %v10133_v1 = vld [vmem:[#allocation50_spill] sm:$0xff] }
 0x199   : > { %v7675_v10 = vpop.permute.xlu0 %874  ;;  %v249_v56 = vpop.permute.xlu1 %248 }
 0x19b   : > { %1240 = vperm.xlu1 %5995, %v1078_v52   ;;  %446 = vrot.lane.b32.xlu0 %v10120_v51, %s6706_s6  ;;  %v970_v52 = vadd.f32 %v7612_v32, %v906_v30  ;;  %v907_v51 = vadd.f32 %v7600_v18, %v10127_v16  ;;  %v7722_v35 = vpop.eup %6299 }
 0x19c   : > { %v1081_v32 = vmul.f32 %v7722_v35, %v761_v53 }
 0x19d   : > { %v877_v20 = vpop.permute.xlu0 %876  ;;  %v599_v63 = vpop.permute.xlu1 %598  ;;  %v1034_v49 = vadd.f32 %v7643_v9, %v970_v52  ;;  %v10130_v9 = vld [vmem:[#allocation34_spill] sm:$0xff] }
 0x19e   : > { %v7733_v43 = vmul.f32 %v249_v56, %v10130_v9  ;;  %v634_v36 = vadd.f32 %v599_v63, %v10131_v38  ;;  %v6637_v63 = vld [vmem:[%s9937_s1 + $0xd8] sm:$0xff] }
 0x19f   : > { %1245 = vperm.xlu1 %5995, %v1079_v17   ;;  %322 = vrot.lane.b32.xlu0 %v7688_v23, %s6703_s4  ;;  %v971_v17 = vadd.f32 %v7628_v42, %v907_v51  ;;  %6301 = vrcp.f32 %v1034_v49  ;;  %v10134_v51 = vld [vmem:[#allocation45_spill] sm:$0xff] }
 0x1a1   : > { %v7699_v40 = vpop.permute.xlu0 %938  ;;  %v601_v7 = vpop.permute.xlu1 %600  ;;  %v1035_v18 = vadd.f32 %v7654_v6, %v971_v17  ;;  %v10132_v6 = vld [vmem:[#allocation48_spill] sm:$0xff] }
 0x1a2   : > { %v909_v45 = vadd.f32 %v877_v20, %v10132_v6  ;;  %v635_v11 = vadd.f32 %v601_v7, %v10133_v1 }
 0x1a3   : > { %388 = vrot.lane.b32.xlu1 %v7695_v22, %s6704_s5  ;;  %324 = vrot.lane.b32.xlu0 %v7695_v22, %s6703_s4  ;;  %6303 = vrcp.f32 %v1035_v18  ;;  %v10136_v18 = vld [vmem:[#allocation47_spill] sm:$0xff] }
 0x1a5   : > { %v941_v62 = vpop.permute.xlu0 %940  ;;  %v663_v21 = vpop.permute.xlu1 %662 }
 0x1a6   : > { %v698_v46 = vadd.f32 %v663_v21, %v634_v36 }
 0x1a7   : > { %452 = vrot.lane.b32.xlu1 %v10126_v47, %s6706_s6  ;;  %386 = vrot.lane.b32.xlu0 %v7688_v23, %s6704_s5  ;;  %v973_v47 = vadd.f32 %v941_v62, %v909_v45  ;;  %v908_v62 = vadd.f32 %v7675_v10, %v10134_v51 }
 0x1a9   : > { %v1003_v26 = vpop.permute.xlu0 %1002  ;;  %v665_v28 = vpop.permute.xlu1 %664 }
 0x1aa   : > { %v699_v52 = vadd.f32 %v665_v28, %v635_v11  ;;  %v7748_v21 = vpop.eup %6301  ;;  %v10135_v28 = vld [vmem:[#allocation44_spill] sm:$0xff]  ;;  %v6639_v11 = vld [vmem:[%s9937_s1 + $0xf8] sm:$0xff] }
 0x1ab   : > { %1250 = vperm.xlu1 %5995, %v1080_v48   ;;  %450 = vrot.lane.b32.xlu0 %v10128_v25, %s6706_s6  ;;  %v6638_v25 = vld [vmem:[%s9937_s1 + $0xc8] sm:$0xff] }
 0x1ad   : > { %v1005_v54 = vpop.permute.xlu0 %1004  ;;  %v729_v44 = vpop.permute.xlu1 %728 }
 0x1ae   : > { %v1037_v53 = vadd.f32 %v1005_v54, %v973_v47  ;;  %v763_v20 = vadd.f32 %v729_v44, %v699_v52  ;;  %v7760_v17 = vpop.eup %6303  ;;  %v6640_v52 = vld [vmem:[%s9937_s1 + $0xe8] sm:$0xff] }
 0x1af   : > { %1255 = vperm.xlu1 %5995, %v1081_v32   ;;  %326 = vrot.lane.b32.xlu0 %v7727_v58, %s6703_s4  ;;  %v972_v32 = vadd.f32 %v7699_v40, %v908_v62 }
 0x1b0   : > { %6305 = vrcp.f32 %v1037_v53  ;;  %v1083_v61 = vmul.f32 %v7760_v17, %v763_v20 }
 0x1b1   : > { %v727_v42 = vpop.permute.xlu0 %726  ;;  %v253_v37 = vpop.permute.xlu1 %252  ;;  %v1036_v10 = vadd.f32 %v1003_v26, %v972_v32 }
 0x1b2   : > { %v762_v30 = vadd.f32 %v727_v42, %v698_v46  ;;  %v7767_v9 = vmul.f32 %v253_v37, %v10136_v18 }
 0x1b3   : > { %392 = vrot.lane.b32.xlu1 %v7733_v43, %s6704_s5  ;;  %328 = vrot.lane.b32.xlu0 %v7733_v43, %s6703_s4  ;;  %6307 = vrcp.f32 %v1036_v10 }
 0x1b4   : > { %v1082_v7 = vmul.f32 %v7748_v21, %v762_v30 }
 0x1b5   : > { %v251_v27 = vpop.permute.xlu0 %250  ;;  %v605_v56 = vpop.permute.xlu1 %604 }
 0x1b6   : > { %v7754_v49 = vmul.f32 %v251_v27, %v10135_v28  ;;  %v637_v42 = vadd.f32 %v605_v56, %v7372_v41 }
 0x1b7   : > { %456 = vrot.lane.b32.xlu1 %v6637_v63, %s6706_s6  ;;  %390 = vrot.lane.b32.xlu0 %v7727_v58, %s6704_s5 }
 0x1b9   : > { %v603_v48 = vpop.permute.xlu0 %602  ;;  %v667_v16 = vpop.permute.xlu1 %666 }
 0x1ba   : > { %v636_v40 = vadd.f32 %v603_v48, %v7386_v13  ;;  %v7775_v1 = vpop.eup %6305 }
 0x1bb   : > { %1260 = vperm.xlu1 %5995, %v1082_v7   ;;  %454 = vrot.lane.b32.xlu0 %v6638_v25, %s6706_s6 }
 0x1bc   : > { %v700_v37 = vadd.f32 %v667_v16, %v636_v40 }
 0x1bd   : > { %v669_v54 = vpop.permute.xlu1 %668  ;;  %v303_v44 = vpop.permute.xlu0 %302 }
 0x1be   : > { %v701_v26 = vadd.f32 %v669_v54, %v637_v42  ;;  %v350_v56 = vadd.f32 %v303_v44, %v7401_v19  ;;  %v7790_v63 = vpop.eup %6307 }
 0x1bf   : > { %1265 = vperm.xlu1 %5995, %v1083_v61   ;;  %330 = vrot.lane.b32.xlu0 %v7754_v49, %s6703_s4 }
 0x1c1   : > { %v731_v38 = vpop.permute.xlu1 %730  ;;  %v305_v36 = vpop.permute.xlu0 %304 }
 0x1c2   : > { %v351_v41 = vadd.f32 %v305_v36, %v7415_v24  ;;  %v764_v30 = vadd.f32 %v731_v38, %v700_v37  ;;  %v7809_v37 = vld [vmem:[%s9937_s1 + $0x10] sm:$0xff] }
 0x1c3   : > { %396 = vrot.lane.b32.xlu1 %v7767_v9, %s6704_s5  ;;  %332 = vrot.lane.b32.xlu0 %v7767_v9, %s6703_s4 }
 0x1c4   : > { %v1084_v24 = vmul.f32 %v7790_v63, %v764_v30 }
 0x1c5   : > { %v733_v46 = vpop.permute.xlu1 %732  ;;  %v367_v6 = vpop.permute.xlu0 %366 }
 0x1c6   : > { %v765_v45 = vadd.f32 %v733_v46, %v701_v26  ;;  %v414_v53 = vadd.f32 %v367_v6, %v350_v56 }
 0x1c7   : > { %460 = vrot.lane.b32.xlu1 %v6639_v11, %s6706_s6  ;;  %394 = vrot.lane.b32.xlu0 %v7754_v49, %s6704_s5 }
 0x1c8   : > { %v1085_v13 = vmul.f32 %v7775_v1, %v765_v45 }
 0x1c9   : > { %v369_v27 = vpop.permute.xlu0 %368  ;;  %v433_v20 = vpop.permute.xlu1 %432 }
 0x1ca   : > { %v415_v47 = vadd.f32 %v369_v27, %v351_v41 }
 0x1cb   : > { %1275 = vperm.xlu1 %5995, %v1085_v13   ;;  %458 = vrot.lane.b32.xlu0 %v6640_v52, %s6706_s6  ;;  %v1470_v13 = vld [vmem:[%s9938_s2] sm:$0xff] }
 0x1cc   : > { %v479_v7 = vadd.f32 %v433_v20, %v415_v47  ;;  %v1473_v20 = vld [vmem:[%s9938_s2 + $0x30] sm:$0xff] }
 0x1cd   : > { %v431_v48 = vpop.permute.xlu0 %430 }
 0x1ce   : > { %v478_v16 = vadd.f32 %v431_v48, %v414_v53  ;;  %v1055_v51 = vmul.f32 %v7466_v33, %v479_v7  ;;  %v1472_v53 = vld [vmem:[%s9938_s2 + $0x20] sm:$0xff] }
 0x1cf   : > { %1270 = vperm.xlu0 %5996, %v1084_v24   ;;  %v7832_v24 = vld [vmem:[%s9937_s1 + $0x20] sm:$0xff]  ;;  %v5766_v48 = vpack.c.bf16 %v1473_v20, %v1472_v53 }
 0x1d0   : > { %v1054_v19 = vmul.f32 %v7452_v14, %v478_v16  ;;  %v7800_v14 = vld [vmem:[%s9937_s1] sm:$0xff] }
 0x1d1   : > { %v307_v62 = vpop.permute.xlu0 %306 }
 0x1d2   : > { %1104 = vperm.xlu1 %5995, %v1054_v19   ;;  %v352_v32 = vadd.f32 %v307_v62, %v7470_v29 }
 0x1d3   : > { %1109 = vperm.xlu0 %5996, %v1055_v51  }
 0x1d5   : > { %v309_v28 = vpop.permute.xlu0 %308 }
 0x1d6   : > { %v353_v42 = vadd.f32 %v309_v28, %v7482_v0 }
 0x1d9   : > { %v371_v25 = vpop.permute.xlu0 %370 }
 0x1da   : > { %v1201_v61 = vpop.permute.xlu1 %1200  ;;  %v416_v54 = vadd.f32 %v371_v25, %v352_v32 }
 0x1db   : > { %v1278_v40 = vmul.f32 %v1201_v61, %v7800_v14 }
 0x1dd   : > { %v435_v44 = vpop.permute.xlu0 %434 }
 0x1de   : > { %v480_v10 = vadd.f32 %v435_v44, %v416_v54  ;;  %v1206_v18 = vpop.permute.xlu1 %1205 }
 0x1df   : > { %v1279_v30 = vmul.f32 %v1206_v18, %v7809_v37 }
 0x1e0   : > { %v1056_v38 = vmul.f32 %v7509_v59, %v480_v10 }
 0x1e1   : > { %v311_v33 = vpop.permute.xlu0 %310 }
 0x1e2   : > { %v373_v36 = vpop.permute.xlu1 %372  ;;  %1114 = vperm.xlu1 %5995, %v1056_v38   ;;  %v354_v11 = vadd.f32 %v311_v33, %v7529_v2 }
 0x1e3   : > { %v417_v29 = vadd.f32 %v373_v36, %v353_v42  ;;  %v7854_v42 = vld [vmem:[%s9937_s1 + $0x40] sm:$0xff] }
 0x1e5   : > { %v313_v26 = vpop.permute.xlu0 %312 }
 0x1e6   : > { %v437_v46 = vpop.permute.xlu1 %436  ;;  %1310 = vrot.lane.b32.xlu1 %v1278_v40, %s6707_s20 }
 0x1e7   : > { %v481_v6 = vadd.f32 %v437_v46, %v417_v29 }
 0x1e9   : > { %v1057_v59 = vmul.f32 %v7523_v60, %v481_v6  ;;  %v375_v45 = vpop.permute.xlu0 %374  ;;  %v1471_v60 = vld [vmem:[%s9938_s2 + $0x10] sm:$0xff] }
 0x1ea   : > { %v1211_v0 = vpop.permute.xlu1 %1210  ;;  %1390 = vrot.lane.b32.xlu1 %v7800_v14, %s6708_s24  ;;  %v418_v41 = vadd.f32 %v375_v45, %v354_v11  ;;  %v5762_v56 = vpack.c.bf16 %v1471_v60, %v1470_v13 }
 0x1eb   : > { %1119 = vperm.xlu0 %5996, %v1057_v59   ;;  %v1280_v19 = vmul.f32 %v1211_v0, %v7832_v24  ;;  %v7865_v0 = vld [vmem:[%s9937_s1 + $0x50] sm:$0xff] }
 0x1ec   : > { %5763 = vmatprep.subr.bf16.mxu0 %v5762_v56 }
 0x1ed   : > { %v439_v27 = vpop.permute.xlu0 %438  ;;  %5765 = vmatpush3.bf16.msra.mxu0 %v5762_v56 }
 0x1ee   : > { %v482_v2 = vadd.f32 %v439_v27, %v418_v41  ;;  %v1216_v47 = vpop.permute.xlu1 %1215  ;;  %5767 = vmatprep.subr.bf16.mxu0 %v5766_v48 }
 0x1ef   : > { %1312 = vrot.lane.b32.xlu0 %v1279_v30, %s6707_s20 }
 0x1f0   : > { %v1058_v52 = vmul.f32 %v7567_v3, %v482_v2  ;;  %v355_v3 = vadd.f32 %v313_v26, %v7540_v34  ;;  %v7843_v34 = vld [vmem:[%s9937_s1 + $0x30] sm:$0xff]  ;;  %v7876_v2 = vld [vmem:[%s9937_s1 + $0x60] sm:$0xff] }
 0x1f1   : > { %v315_v7 = vpop.permute.xlu0 %314  ;;  %5769 = vmatpush3.bf16.msra.mxu0 %v5766_v48  ;;  %v1281_v18 = vmul.f32 %v1216_v47, %v7843_v34 }
 0x1f2   : > { %v377_v16 = vpop.permute.xlu1 %376  ;;  %1124 = vperm.xlu1 %5995, %v1058_v52   ;;  %v356_v54 = vadd.f32 %v315_v7, %v7585_v4 }
 0x1f3   : > { %1392 = vrot.lane.b32.xlu0 %v7809_v37, %s6708_s24  ;;  %v419_v51 = vadd.f32 %v377_v16, %v355_v3 }
 0x1f5   : > { %v317_v62 = vpop.permute.xlu0 %316 }
 0x1f6   : > { %v441_v28 = vpop.permute.xlu1 %440  ;;  %1314 = vrot.lane.b32.xlu1 %v1280_v19, %s6707_s20  ;;  %v357_v29 = vadd.f32 %v317_v62, %v7596_v8  ;;  %v7887_v19 = vld [vmem:[%s9937_s1 + $0x70] sm:$0xff] }
 0x1f7   : > { %v483_v25 = vadd.f32 %v441_v28, %v419_v51 }
 0x1f9   : > { %v1059_v32 = vmul.f32 %v7579_v12, %v483_v25  ;;  %v379_v61 = vpop.permute.xlu0 %378 }
 0x1fa   : > { %v1221_v44 = vpop.permute.xlu1 %1220  ;;  %1394 = vrot.lane.b32.xlu1 %v7832_v24, %s6708_s24  ;;  %v420_v10 = vadd.f32 %v379_v61, %v356_v54  ;;  %v7898_v54 = vld [vmem:[%s9937_s1 + $0x80] sm:$0xff] }
 0x1fb   : > { %1129 = vperm.xlu0 %5996, %v1059_v32   ;;  %v1282_v26 = vmul.f32 %v1221_v44, %v7854_v42 }
 0x1fd   : > { %v443_v38 = vpop.permute.xlu0 %442 }
 0x1fe   : > { %v484_v33 = vadd.f32 %v443_v38, %v420_v10  ;;  %v1226_v36 = vpop.permute.xlu1 %1225 }
 0x1ff   : > { %1316 = vrot.lane.b32.xlu0 %v1281_v18, %s6707_s20  ;;  %v1283_v60 = vmul.f32 %v1226_v36, %v7865_v0 }
 0x200   : > { %v1060_v12 = vmul.f32 %v7623_v31, %v484_v33 }
 0x201   : > { %v319_v4 = vpop.permute.xlu0 %318 }
 0x202   : > { %v381_v40 = vpop.permute.xlu1 %380  ;;  %1134 = vperm.xlu1 %5995, %v1060_v12   ;;  %v358_v8 = vadd.f32 %v319_v4, %v7641_v5 }
 0x203   : > { %1396 = vrot.lane.b32.xlu0 %v7843_v34, %s6708_s24  ;;  %v421_v46 = vadd.f32 %v381_v40, %v357_v29  ;;  %v7909_v40 = vld [vmem:[%s9937_s1 + $0x90] sm:$0xff] }
 0x205   : > { %v321_v6 = vpop.permute.xlu0 %320 }
 0x206   : > { %v445_v59 = vpop.permute.xlu1 %444  ;;  %1318 = vrot.lane.b32.xlu1 %v1282_v26, %s6707_s20  ;;  %v359_v52 = vadd.f32 %v321_v6, %v7650_v39 }
 0x207   : > { %v485_v31 = vadd.f32 %v445_v59, %v421_v46 }
 0x209   : > { %v1061_v45 = vmul.f32 %v7635_v57, %v485_v31  ;;  %v383_v11 = vpop.permute.xlu0 %382 }
 0x20a   : > { %v1231_v41 = vpop.permute.xlu1 %1230  ;;  %1398 = vrot.lane.b32.xlu1 %v7854_v42, %s6708_s24  ;;  %v422_v13 = vadd.f32 %v383_v11, %v358_v8 }
 0x20b   : > { %1139 = vperm.xlu0 %5996, %v1061_v45   ;;  %v1284_v53 = vmul.f32 %v1231_v41, %v7876_v2  ;;  %v7920_v45 = vld [vmem:[%s9937_s1 + $0xa0] sm:$0xff] }
 0x20d   : > { %v447_v30 = vpop.permute.xlu0 %446 }
 0x20e   : > { %v486_v27 = vadd.f32 %v447_v30, %v422_v13  ;;  %v1236_v56 = vpop.permute.xlu1 %1235 }
 0x20f   : > { %1320 = vrot.lane.b32.xlu0 %v1283_v60, %s6707_s20  ;;  %v1285_v28 = vmul.f32 %v1236_v56, %v7887_v19 }
 0x210   : > { %v1062_v57 = vmul.f32 %v7670_v50, %v486_v27 }
 0x211   : > { %v323_v5 = vpop.permute.xlu0 %322 }
 0x212   : > { %v385_v47 = vpop.permute.xlu1 %384  ;;  %1144 = vperm.xlu1 %5995, %v1062_v57   ;;  %v360_v39 = vadd.f32 %v323_v5, %v7688_v23  ;;  %v7931_v57 = vld [vmem:[%s9937_s1 + $0xb0] sm:$0xff] }
 0x213   : > { %1400 = vrot.lane.b32.xlu0 %v7865_v0, %s6708_s24  ;;  %v423_v20 = vadd.f32 %v385_v47, %v359_v52 }
 0x215   : > { %v325_v7 = vpop.permute.xlu0 %324 }
 0x216   : > { %v449_v48 = vpop.permute.xlu1 %448  ;;  %1322 = vrot.lane.b32.xlu1 %v1284_v53, %s6707_s20  ;;  %v361_v10 = vadd.f32 %v325_v7, %v7695_v22 }
 0x217   : > { %v487_v50 = vadd.f32 %v449_v48, %v423_v20  ;;  %v7942_v48 = vld [vmem:[%s9937_s1 + $0xc0] sm:$0xff] }
 0x219   : > { %v1063_v16 = vmul.f32 %v7682_v15, %v487_v50  ;;  %v387_v3 = vpop.permute.xlu0 %386 }
 0x21a   : > { %v1241_v51 = vpop.permute.xlu1 %1240  ;;  %1402 = vrot.lane.b32.xlu1 %v7876_v2, %s6708_s24  ;;  %v424_v62 = vadd.f32 %v387_v3, %v360_v39 }
 0x21b   : > { %1149 = vperm.xlu0 %5996, %v1063_v16   ;;  %v1286_v18 = vmul.f32 %v1241_v51, %v7898_v54 }
 0x21d   : > { %v451_v25 = vpop.permute.xlu0 %450 }
 0x21e   : > { %v488_v32 = vadd.f32 %v451_v25, %v424_v62  ;;  %v1246_v61 = vpop.permute.xlu1 %1245  ;;  %v7953_v62 = vld [vmem:[%s9937_s1 + $0xd0] sm:$0xff] }
 0x21f   : > { %1324 = vrot.lane.b32.xlu0 %v1285_v28, %s6707_s20  ;;  %v1287_v46 = vmul.f32 %v1246_v61, %v7909_v40 }
 0x220   : > { %v1064_v15 = vmul.f32 %v7713_v55, %v488_v32 }
 0x221   : > { %v327_v23 = vpop.permute.xlu0 %326 }
 0x222   : > { %v389_v44 = vpop.permute.xlu1 %388  ;;  %1154 = vperm.xlu1 %5995, %v1064_v15   ;;  %v362_v22 = vadd.f32 %v327_v23, %v7727_v58 }
 0x223   : > { %1404 = vrot.lane.b32.xlu0 %v7887_v19, %s6708_s24  ;;  %v425_v38 = vadd.f32 %v389_v44, %v361_v10 }
 0x225   : > { %v329_v33 = vpop.permute.xlu0 %328 }
 0x226   : > { %v453_v36 = vpop.permute.xlu1 %452  ;;  %1326 = vrot.lane.b32.xlu1 %v1286_v18, %s6707_s20  ;;  %v363_v8 = vadd.f32 %v329_v33, %v7733_v43 }
 0x227   : > { %v489_v55 = vadd.f32 %v453_v36, %v425_v38 }
 0x229   : > { %v1065_v12 = vmul.f32 %v7722_v35, %v489_v55  ;;  %v391_v4 = vpop.permute.xlu0 %390 }
 0x22a   : > { %v1251_v29 = vpop.permute.xlu1 %1250  ;;  %1406 = vrot.lane.b32.xlu1 %v7898_v54, %s6708_s24  ;;  %v426_v26 = vadd.f32 %v391_v4, %v362_v22 }
 0x22b   : > { %1159 = vperm.xlu0 %5996, %v1065_v12   ;;  %v1288_v41 = vmul.f32 %v1251_v29, %v7920_v45 }
 0x22d   : > { %v455_v6 = vpop.permute.xlu0 %454 }
 0x22e   : > { %v490_v59 = vadd.f32 %v455_v6, %v426_v26  ;;  %v1256_v31 = vpop.permute.xlu1 %1255 }
 0x22f   : > { %1328 = vrot.lane.b32.xlu0 %v1287_v46, %s6707_s20  ;;  %v1289_v52 = vmul.f32 %v1256_v31, %v7931_v57 }
 0x230   : > { %v1066_v35 = vmul.f32 %v7748_v21, %v490_v59 }
 0x231   : > { %v331_v58 = vpop.permute.xlu0 %330 }
 0x232   : > { %v393_v11 = vpop.permute.xlu1 %392  ;;  %1164 = vperm.xlu1 %5995, %v1066_v35   ;;  %v364_v43 = vadd.f32 %v331_v58, %v7754_v49 }
 0x233   : > { %1408 = vrot.lane.b32.xlu0 %v7909_v40, %s6708_s24  ;;  %v427_v13 = vadd.f32 %v393_v11, %v363_v8 }
 0x235   : > { %v333_v60 = vpop.permute.xlu0 %332 }
 0x236   : > { %v457_v30 = vpop.permute.xlu1 %456  ;;  %1330 = vrot.lane.b32.xlu1 %v1288_v41, %s6707_s20  ;;  %v365_v50 = vadd.f32 %v333_v60, %v7767_v9  ;;  %v7960_v9 = vld [vmem:[%s9937_s1 + $0xe0] sm:$0xff] }
 0x237   : > { %v491_v21 = vadd.f32 %v457_v30, %v427_v13 }
 0x239   : > { %v1067_v27 = vmul.f32 %v7760_v17, %v491_v21  ;;  %v395_v56 = vpop.permute.xlu0 %394 }
 0x23a   : > { %v1261_v5 = vpop.permute.xlu1 %1260  ;;  %1410 = vrot.lane.b32.xlu1 %v7920_v45, %s6708_s24  ;;  %v428_v47 = vadd.f32 %v395_v56, %v364_v43 }
 0x23b   : > { %1169 = vperm.xlu0 %5996, %v1067_v27   ;;  %v1290_v16 = vmul.f32 %v1261_v5, %v7942_v48 }
 0x23d   : > { %v459_v53 = vpop.permute.xlu0 %458 }
 0x23e   : > { %v492_v20 = vadd.f32 %v459_v53, %v428_v47  ;;  %v1266_v7 = vpop.permute.xlu1 %1265 }
 0x23f   : > { %1332 = vrot.lane.b32.xlu0 %v1289_v52, %s6707_s20  ;;  %v1291_v28 = vmul.f32 %v1266_v7, %v7953_v62 }
 0x240   : > { %v1068_v17 = vmul.f32 %v7790_v63, %v492_v20 }
 0x242   : > { %v397_v49 = vpop.permute.xlu1 %396  ;;  %1174 = vperm.xlu1 %5995, %v1068_v17  }
 0x243   : > { %1412 = vrot.lane.b32.xlu0 %v7931_v57, %s6708_s24  ;;  %v429_v3 = vadd.f32 %v397_v49, %v365_v50 }
 0x246   : > { %v461_v39 = vpop.permute.xlu1 %460  ;;  %1334 = vrot.lane.b32.xlu1 %v1290_v16, %s6707_s20 }
 0x247   : > { %v493_v51 = vadd.f32 %v461_v39, %v429_v3 }
 0x249   : > { %v1069_v63 = vmul.f32 %v7775_v1, %v493_v51  ;;  %v7969_v1 = vld [vmem:[%s9937_s1 + $0xf0] sm:$0xff] }
 0x24a   : > { %1414 = vrot.lane.b32.xlu1 %v7942_v48, %s6708_s24  ;;  %v1276_v61 = vpop.permute.xlu1 %1275 }
 0x24b   : > { %1179 = vperm.xlu0 %5996, %v1069_v63   ;;  %v1293_v15 = vmul.f32 %v1276_v61, %v7969_v1 }
 0x24e   : > { %v1271_v25 = vpop.permute.xlu0 %1270 }
 0x24f   : > { %v1292_v32 = vmul.f32 %v1271_v25, %v7960_v9  ;;  %1336 = vrot.lane.b32.xlu0 %v1291_v28, %s6707_s20 }
 0x251   : > { %1338 = vrot.lane.b32.xlu1 %v1292_v32, %s6707_s20  ;;  %v1105_v23 = vpop.permute.xlu1 %1104 }
 0x252   : > { %v1182_v18 = vmul.f32 %v1105_v23, %v7800_v14  ;;  %v1110_v38 = vpop.permute.xlu0 %1109 }
 0x253   : > { %1416 = vrot.lane.b32.xlu0 %v7953_v62, %s6708_s24  ;;  %v1183_v29 = vmul.f32 %v1110_v38, %v7809_v37 }
 0x255   : > { %1418 = vrot.lane.b32.xlu1 %v7960_v9, %s6708_s24 }
 0x257   : > { %1340 = vrot.lane.b32.xlu0 %v1293_v15, %s6707_s20 }
 0x25b   : > { %1420 = vrot.lane.b32.xlu0 %v7969_v1, %s6708_s24 }
 0x261   : > { %v1115_v44 = vpop.permute.xlu1 %1114 }
 0x262   : > { %v1184_v35 = vmul.f32 %v1115_v44, %v7832_v24 }
 0x265   : > { %v1311_v10 = vpop.permute.xlu1 %1310 }
 0x266   : > { %v1358_v33 = vadd.f32 %v1311_v10, %v1182_v18 }
 0x269   : > { %v1391_v36 = vpop.permute.xlu1 %1390 }
 0x26a   : > { %v1438_v55 = vadd.f32 %v1391_v36, %v1358_v33  ;;  %v1120_v12 = vpop.permute.xlu0 %1119 }
 0x26b   : > { %v1185_v60 = vmul.f32 %v1120_v12, %v7843_v34 }
 0x26c   : > { %v7980_v4 = vmax.f32 %v1438_v55, 0.0 }
 0x26e   : > { %5423 = vmatprep.mubr.msk.f32.mxu0 %vm9983_vm0, %v7980_v4  ;;  %v1313_v22 = vpop.permute.xlu0 %1312 }
 0x26f   : > { %v1359_v26 = vadd.f32 %v1313_v22, %v1183_v29 }
 0x271   : > { %v1125_v46 = vpop.permute.xlu1 %1124 }
 0x272   : > { %v1393_v6 = vpop.permute.xlu0 %1392  ;;  %v1186_v5 = vmul.f32 %v1125_v46, %v7854_v42 }
 0x273   : > { %v1439_v59 = vadd.f32 %v1393_v6, %v1359_v26 }
 0x275   : > { %v7985_v31 = vmax.f32 %v1439_v59, 0.0  ;;  %v1315_v14 = vpop.permute.xlu1 %1314 }
 0x276   : > { %v1360_v58 = vadd.f32 %v1315_v14, %v1184_v35 }
 0x277   : > { %5424 = vmatmul.mubr.msk.f32.vlgmr.msra.gmra.mrb[0].mxu0 %vm9983_vm0, %v7985_v31 }
 0x279   : > { %v1395_v11 = vpop.permute.xlu1 %1394 }
 0x27a   : > { %v1440_v8 = vadd.f32 %v1395_v11, %v1360_v58  ;;  %v1130_v41 = vpop.permute.xlu0 %1129 }
 0x27b   : > { %v1187_v17 = vmul.f32 %v1130_v41, %v7865_v0 }
 0x27c   : > { %v7990_v13 = vmax.f32 %v1440_v8, 0.0 }
 0x27e   : > { %5426 = vmatprep.mubr.msk.f32.mxu0 %vm9983_vm0, %v7990_v13  ;;  %v1317_v37 = vpop.permute.xlu0 %1316 }
 0x27f   : > { %v1361_v30 = vadd.f32 %v1317_v37, %v1185_v60 }
 0x281   : > { %v1135_v21 = vpop.permute.xlu1 %1134 }
 0x282   : > { %v1397_v27 = vpop.permute.xlu0 %1396  ;;  %v1188_v51 = vmul.f32 %v1135_v21, %v7876_v2 }
 0x283   : > { %v1441_v56 = vadd.f32 %v1397_v27, %v1361_v30 }
 0x285   : > { %v7995_v24 = vmax.f32 %v1441_v56, 0.0  ;;  %v1319_v43 = vpop.permute.xlu1 %1318 }
 0x286   : > { %v1362_v47 = vadd.f32 %v1319_v43, %v1186_v5 }
 0x287   : > { %5427 = vmatmul.mubr.msk.f32.gmra.mrb[2].mxu0 %vm9983_vm0, %v7995_v24 }
 0x289   : > { %v1399_v52 = vpop.permute.xlu1 %1398 }
 0x28a   : > { %v1442_v53 = vadd.f32 %v1399_v52, %v1362_v47  ;;  %v1140_v20 = vpop.permute.xlu0 %1139 }
 0x28b   : > { %v1189_v15 = vmul.f32 %v1140_v20, %v7887_v19 }
 0x28c   : > { %v8000_v7 = vmax.f32 %v1442_v53, 0.0 }
 0x28e   : > { %5429 = vmatprep.mubr.msk.f32.mxu0 %vm9983_vm0, %v8000_v7  ;;  %v1321_v34 = vpop.permute.xlu0 %1320 }
 0x28f   : > { %v1363_v49 = vadd.f32 %v1321_v34, %v1187_v17 }
 0x291   : > { %v1145_v50 = vpop.permute.xlu1 %1144 }
 0x292   : > { %v1401_v16 = vpop.permute.xlu0 %1400  ;;  %v1190_v33 = vmul.f32 %v1145_v50, %v7898_v54 }
 0x293   : > { %v1443_v3 = vadd.f32 %v1401_v16, %v1363_v49 }
 0x295   : > { %v8005_v42 = vmax.f32 %v1443_v3, 0.0  ;;  %v1323_v39 = vpop.permute.xlu1 %1322 }
 0x296   : > { %v1364_v63 = vadd.f32 %v1323_v39, %v1188_v51 }
 0x297   : > { %5430 = vmatmul.mubr.msk.f32.gmra.mrb[4].mxu0 %vm9983_vm0, %v8005_v42 }
 0x299   : > { %v1403_v28 = vpop.permute.xlu1 %1402 }
 0x29a   : > { %v1444_v25 = vadd.f32 %v1403_v28, %v1364_v63  ;;  %v1150_v32 = vpop.permute.xlu0 %1149 }
 0x29b   : > { %v1191_v26 = vmul.f32 %v1150_v32, %v7909_v40 }
 0x29c   : > { %v8010_v61 = vmax.f32 %v1444_v25, 0.0 }
 0x29e   : > { %10137 = vst [vmem:[#allocation39_spill] sm:$0xff] %v8010_v61  ;;  %5432 = vmatprep.mubr.msk.f32.mxu0 %vm9983_vm0, %v8010_v61  ;;  %v1325_v0 = vpop.permute.xlu0 %1324 }
 0x29f   : > { %v1365_v23 = vadd.f32 %v1325_v0, %v1189_v15 }
 0x2a1   : > { %v1155_v44 = vpop.permute.xlu1 %1154 }
 0x2a2   : > { %v1405_v10 = vpop.permute.xlu0 %1404  ;;  %v1192_v58 = vmul.f32 %v1155_v44, %v7920_v45 }
 0x2a3   : > { %v1445_v18 = vadd.f32 %v1405_v10, %v1365_v23  ;;  %v1474_v10 = vld [vmem:[%s9938_s2 + $0x40] ss:$0 sm:$0xff] }
 0x2a5   : > { %v8015_v2 = vmax.f32 %v1445_v18, 0.0  ;;  %v1327_v38 = vpop.permute.xlu1 %1326 }
 0x2a6   : > { %v1366_v36 = vadd.f32 %v1327_v38, %v1190_v33 }
 0x2a7   : > { %10138 = vst [vmem:[#allocation43_spill] sm:$0xff] %v8015_v2  ;;  %5433 = vmatmul.mubr.msk.f32.gmra.mrb[6].mxu0 %vm9983_vm0, %v8015_v2 }
 0x2a9   : > { %v1407_v55 = vpop.permute.xlu1 %1406 }
 0x2aa   : > { %v1446_v12 = vadd.f32 %v1407_v55, %v1366_v36  ;;  %v1160_v22 = vpop.permute.xlu0 %1159 }
 0x2ab   : > { %v1193_v30 = vmul.f32 %v1160_v22, %v7931_v57 }
 0x2ac   : > { %v8020_v29 = vmax.f32 %v1446_v12, 0.0 }
 0x2ae   : > { %10139 = vst [vmem:[#allocation13_spill] sm:$0xff] %v8020_v29  ;;  %5435 = vmatprep.mubr.msk.f32.mxu0 %vm9983_vm0, %v8020_v29  ;;  %v1329_v19 = vpop.permute.xlu0 %1328 }
 0x2af   : > { %v1367_v46 = vadd.f32 %v1329_v19, %v1191_v26 }
 0x2b1   : > { %v1165_v6 = vpop.permute.xlu1 %1164 }
 0x2b2   : > { %v1409_v59 = vpop.permute.xlu0 %1408  ;;  %v1194_v47 = vmul.f32 %v1165_v6, %v7942_v48 }
 0x2b3   : > { %v1447_v14 = vadd.f32 %v1409_v59, %v1367_v46 }
 0x2b5   : > { %v8025_v54 = vmax.f32 %v1447_v14, 0.0  ;;  %v1331_v35 = vpop.permute.xlu1 %1330 }
 0x2b6   : > { %v1368_v11 = vadd.f32 %v1331_v35, %v1192_v58 }
 0x2b7   : > { %10140 = vst [vmem:[#allocation38_spill] sm:$0xff] %v8025_v54  ;;  %5436 = vmatmul.mubr.msk.f32.gmra.mrb[8].mxu0 %vm9983_vm0, %v8025_v54 }
 0x2b9   : > { %v1411_v8 = vpop.permute.xlu1 %1410 }
 0x2ba   : > { %v1448_v41 = vadd.f32 %v1411_v8, %v1368_v11  ;;  %v1170_v37 = vpop.permute.xlu0 %1169 }
 0x2bb   : > { %v1195_v16 = vmul.f32 %v1170_v37, %v7953_v62 }
 0x2bc   : > { %v8030_v60 = vmax.f32 %v1448_v41, 0.0 }
 0x2be   : > { %10141 = vst [vmem:[#allocation41_spill] sm:$0xff] %v8030_v60  ;;  %5438 = vmatprep.mubr.msk.f32.mxu0 %vm9983_vm0, %v8030_v60  ;;  %v1333_v40 = vpop.permute.xlu0 %1332 }
 0x2bf   : > { %v1369_v21 = vadd.f32 %v1333_v40, %v1193_v30 }
 0x2c1   : > { %v1175_v27 = vpop.permute.xlu1 %1174 }
 0x2c2   : > { %v1413_v56 = vpop.permute.xlu0 %1412  ;;  %v1196_v57 = vmul.f32 %v1175_v27, %v7960_v9 }
 0x2c3   : > { %v1449_v43 = vadd.f32 %v1413_v56, %v1369_v21 }
 0x2c5   : > { %v8035_v45 = vmax.f32 %v1449_v43, 0.0  ;;  %v1335_v5 = vpop.permute.xlu1 %1334 }
 0x2c6   : > { %v1370_v52 = vadd.f32 %v1335_v5, %v1194_v47 }
 0x2c7   : > { %10142 = vst [vmem:[#allocation2_spill] sm:$0xff] %v8035_v45  ;;  %5439 = vmatmul.mubr.msk.f32.gmra.mrb[10].mxu0 %vm9983_vm0, %v8035_v45 }
 0x2c9   : > { %v1415_v53 = vpop.permute.xlu1 %1414 }
 0x2ca   : > { %v1450_v20 = vadd.f32 %v1415_v53, %v1370_v52  ;;  %v1180_v34 = vpop.permute.xlu0 %1179 }
 0x2cb   : > { %v1197_v15 = vmul.f32 %v1180_v34, %v7969_v1 }
 0x2cc   : > { %v8040_v17 = vmax.f32 %v1450_v20, 0.0 }
 0x2cd   : > { %v1339_v49 = vpop.permute.xlu1 %1338 }
 0x2ce   : > { %10143 = vst [vmem:[#allocation40_spill] sm:$0xff] %v8040_v17  ;;  %5441 = vmatprep.mubr.msk.f32.mxu0 %vm9983_vm0, %v8040_v17  ;;  %v1337_v50 = vpop.permute.xlu0 %1336  ;;  %v1372_v3 = vadd.f32 %v1339_v49, %v1196_v57 }
 0x2cf   : > { %v1371_v48 = vadd.f32 %v1337_v50, %v1195_v16 }
 0x2d1   : > { %v1419_v39 = vpop.permute.xlu1 %1418 }
 0x2d2   : > { %v1452_v51 = vadd.f32 %v1419_v39, %v1372_v3  ;;  %v1417_v63 = vpop.permute.xlu0 %1416 }
 0x2d3   : > { %v1451_v28 = vadd.f32 %v1417_v63, %v1371_v48 }
 0x2d4   : > { %v8048_v32 = vmax.f32 %v1452_v51, 0.0 }
 0x2d5   : > { %v8046_v25 = vmax.f32 %v1451_v28, 0.0 }
 0x2d6   : > { %10145 = vst [vmem:[#allocation46_spill] sm:$0xff] %v8048_v32  ;;  %v1341_v0 = vpop.permute.xlu0 %1340 }
 0x2d7   : > { %10144 = vst [vmem:[#allocation11_spill] sm:$0xff] %v8046_v25  ;;  %5442 = vmatmul.mubr.msk.f32.gmra.mrb[12].mxu0 %vm9983_vm0, %v8046_v25  ;;  %v1373_v62 = vadd.f32 %v1341_v0, %v1197_v15 }
 0x2d8   : > { %5444 = vmatprep.mubr.msk.f32.mxu0 %vm9983_vm0, %v8048_v32 }
 0x2da   : > { %v1421_v9 = vpop.permute.xlu0 %1420 }
 0x2db   : > { %v1453_v23 = vadd.f32 %v1421_v9, %v1373_v62 }
 0x2dd   : > { %v8055_v44 = vmax.f32 %v1453_v23, 0.0 }
 0x2df   : > { %10146 = vst [vmem:[#allocation42_spill] sm:$0xff] %v8055_v44  ;;  %5445 = vmatmul.mubr.msk.f32.gmra.mrb[14].mxu0 %vm9983_vm0, %v8055_v44 }
 0x34a   : > { %v5425_v18 = vpop.f32.mrb[0].mxu0 }
 0x34b   : > { %v8062_v1 = vadd.f32 %v5425_v18, %v1474_v10  ;;  %v1590_v38 = vpop.f32.mrb[1].mxu0 }
 0x34c   : > { %v1591_v33 = vadd.f32 %v1590_v38, %v1474_v10 }
 0x34e   : > { %v8065_v36 = vpack.i.bf16 %v8062_v1, %v1591_v33  ;;  %v1772_v55 = vmul.f32 0.25, %v1591_v33 }
 0x350   : > { %5998 = vrot.lane.b32.xlu1 %v8065_v36, %s6707_s20  ;;  %5479 = vmatprep.mubr.msk.f32.mxu1 %vm9982_vm1, %v1772_v55 }
 0x35a   : > { %v5428_v12 = vpop.f32.mrb[2].mxu0 }
 0x35b   : > { %v1606_v22 = vadd.f32 %v5428_v12, %v1474_v10  ;;  %v1600_v19 = vpop.f32.mrb[3].mxu0 }
 0x35c   : > { %v1601_v26 = vadd.f32 %v1600_v19, %v1474_v10 }
 0x35d   : > { %v8140_v38 = vmul.f32 0.25, %v1606_v22 }
 0x35e   : > { %v8070_v46 = vpack.i.bf16 %v1606_v22, %v1601_v26  ;;  %v8125_v23 = vmul.f32 0.25, %v1601_v26 }
 0x360   : > { %6003 = vrot.lane.b32.xlu0 %v8070_v46, %s6707_s20 }
 0x36a   : > { %v5431_v6 = vpop.f32.mrb[4].mxu0 }
 0x36b   : > { %v1616_v59 = vadd.f32 %v5431_v6, %v1474_v10  ;;  %v1610_v14 = vpop.f32.mrb[5].mxu0 }
 0x36c   : > { %v1611_v35 = vadd.f32 %v1610_v14, %v1474_v10 }
 0x36d   : > { %v8148_v33 = vmul.f32 0.25, %v1616_v59 }
 0x36e   : > { %v8074_v58 = vpack.i.bf16 %v1616_v59, %v1611_v35  ;;  %v8138_v18 = vmul.f32 0.25, %v1611_v35 }
 0x370   : > { %6008 = vrot.lane.b32.xlu1 %v8074_v58, %s6707_s20 }
 0x37a   : > { %v5434_v11 = vpop.f32.mrb[6].mxu0 }
 0x37b   : > { %v1626_v8 = vadd.f32 %v5434_v11, %v1474_v10  ;;  %v1620_v41 = vpop.f32.mrb[7].mxu0 }
 0x37c   : > { %v1621_v37 = vadd.f32 %v1620_v41, %v1474_v10 }
 0x37d   : > { %v8156_v26 = vmul.f32 0.25, %v1626_v8 }
 0x37e   : > { %v8078_v40 = vpack.i.bf16 %v1626_v8, %v1621_v37 }
 0x380   : > { %6013 = vrot.lane.b32.xlu0 %v8078_v40, %s6707_s20 }
 0x38a   : > { %v5437_v30 = vpop.f32.mrb[8].mxu0 }
 0x38b   : > { %v1636_v21 = vadd.f32 %v5437_v30, %v1474_v10  ;;  %v1630_v27 = vpop.f32.mrb[9].mxu0 }
 0x38c   : > { %v1631_v56 = vadd.f32 %v1630_v27, %v1474_v10 }
 0x38d   : > { %v8166_v14 = vmul.f32 0.25, %v1636_v21 }
 0x38e   : > { %v8082_v43 = vpack.i.bf16 %v1636_v21, %v1631_v56  ;;  %v8154_v12 = vmul.f32 0.25, %v1631_v56 }
 0x390   : > { %6018 = vrot.lane.b32.xlu1 %v8082_v43, %s6707_s20 }
 0x39a   : > { %v5440_v5 = vpop.f32.mrb[10].mxu0 }
 0x39b   : > { %v1646_v47 = vadd.f32 %v5440_v5, %v1474_v10  ;;  %v1640_v52 = vpop.f32.mrb[11].mxu0 }
 0x39c   : > { %v1641_v53 = vadd.f32 %v1640_v52, %v1474_v10 }
 0x39d   : > { %v8176_v11 = vmul.f32 0.25, %v1646_v47 }
 0x39e   : > { %v8086_v20 = vpack.i.bf16 %v1646_v47, %v1641_v53  ;;  %v8162_v59 = vmul.f32 0.25, %v1641_v53 }
 0x3a0   : > { %6023 = vrot.lane.b32.xlu0 %v8086_v20, %s6707_s20 }
 0x3aa   : > { %v5443_v34 = vpop.f32.mrb[12].mxu0 }
 0x3ab   : > { %v1656_v49 = vadd.f32 %v5443_v34, %v1474_v10  ;;  %v1650_v57 = vpop.f32.mrb[13].mxu0 }
 0x3ac   : > { %v1651_v50 = vadd.f32 %v1650_v57, %v1474_v10 }
 0x3ad   : > { %v8182_v8 = vmul.f32 0.25, %v1656_v49 }
 0x3ae   : > { %v8090_v16 = vpack.i.bf16 %v1656_v49, %v1651_v50  ;;  %v8174_v35 = vmul.f32 0.25, %v1651_v50 }
 0x3b0   : > { %6028 = vrot.lane.b32.xlu1 %v8090_v16, %s6707_s20 }
 0x3b2   : > { %v5446_v3 = vpop.f32.mrb[14].mxu0 }
 0x3b3   : > { %v8094_v48 = vadd.f32 %v5446_v3, %v1474_v10  ;;  %v1660_v39 = vpop.f32.mrb[15].mxu0 }
 0x3b4   : > { %v8096_v51 = vadd.f32 %v1660_v39, %v1474_v10  ;;  %6038 = vrot.lane.b32.xlu1 %v8065_v36, %s6709_s21  ;;  %v8130_v10 = vmul.f32 0.25, %v8062_v1  ;;  %v8146_v1 = vmul.f32 0.25, %v1621_v37 }
 0x3b5   : > { %v8209_v56 = vmul.f32 0.25, %v8094_v48 }
 0x3b6   : > { %v8102_v63 = vpack.i.bf16 %v8094_v48, %v8096_v51 }
 0x3b8   : > { %6048 = vrot.lane.b32.xlu1 %v8074_v58, %s6709_s21  ;;  %6033 = vrot.lane.b32.xlu0 %v8102_v63, %s6707_s20 }
 0x3bc   : > { %6058 = vrot.lane.b32.xlu1 %v8082_v43, %s6709_s21  ;;  %6043 = vrot.lane.b32.xlu0 %v8070_v46, %s6709_s21 }
 0x3c0   : > { %6068 = vrot.lane.b32.xlu1 %v8090_v16, %s6709_s21  ;;  %6053 = vrot.lane.b32.xlu0 %v8078_v40, %s6709_s21 }
 0x3c2   : > { %v5999_v28 = vpop.permute.xlu1 %5998 }
 0x3c3   : > { %v6001_v0 = vunpack.i.h.bf16 %v5999_v28  ;;  %v6000_v15 = vunpack.i.l.bf16 %v5999_v28 }
 0x3c4   : > { %2690 = vrot.lane.b32.xlu1 %v1772_v55, %s6710_s22  ;;  %6063 = vrot.lane.b32.xlu0 %v8086_v20, %s6709_s21 }
 0x3c5   : > { %v5770_v9 = vpack.c.bf16 %v6001_v0, %v6000_v15 }
 0x3c7   : > { %5772 = vmatprep.subr.msk.bf16.mxu1 %vm8121_vm2, %v5770_v9 }
 0x3c8   : > { %5775 = vmatpush3.bf16.xpose.msk.msra.mxu1 %vm8121_vm2, %v5770_v9  ;;  %2694 = vrot.lane.b32.xlu1 %v8125_v23, %s6710_s22 }
 0x3c9   : > { %2692 = vrot.lane.b32.xlu0 %v8130_v10, %s6710_s22 }
 0x3cc   : > { %2698 = vrot.lane.b32.xlu1 %v8138_v18, %s6710_s22 }
 0x3cd   : > { %2696 = vrot.lane.b32.xlu0 %v8140_v38, %s6710_s22 }
 0x3d0   : > { %2702 = vrot.lane.b32.xlu1 %v8146_v1, %s6710_s22 }
 0x3d1   : > { %2700 = vrot.lane.b32.xlu0 %v8148_v33, %s6710_s22 }
 0x3d2   : > { %v6004_v55 = vpop.permute.xlu0 %6003 }
 0x3d3   : > { %v6006_v22 = vunpack.i.h.bf16 %v6004_v55  ;;  %v6005_v19 = vunpack.i.l.bf16 %v6004_v55 }
 0x3d4   : > { %2706 = vrot.lane.b32.xlu1 %v8154_v12, %s6710_s22 }
 0x3d5   : > { %v5776_v6 = vpack.c.bf16 %v6006_v22, %v6005_v19  ;;  %2704 = vrot.lane.b32.xlu0 %v8156_v26, %s6710_s22 }
 0x3d7   : > { %5778 = vmatprep.subr.msk.bf16.mxu1 %vm8121_vm2, %v5776_v6 }
 0x3d8   : > { %2710 = vrot.lane.b32.xlu1 %v8162_v59, %s6710_s22  ;;  %5781 = vmatpush3.bf16.xpose.msk.msra.mxu1 %vm8121_vm2, %v5776_v6 }
 0x3d9   : > { %2708 = vrot.lane.b32.xlu0 %v8166_v14, %s6710_s22 }
 0x3dc   : > { %2714 = vrot.lane.b32.xlu1 %v8174_v35, %s6710_s22 }
 0x3dd   : > { %2712 = vrot.lane.b32.xlu0 %v8176_v11, %s6710_s22 }
 0x3e0   : > { %6078 = vrot.lane.b32.xlu1 %v8070_v46, %s6708_s24 }
 0x3e1   : > { %2716 = vrot.lane.b32.xlu0 %v8182_v8, %s6710_s22 }
 0x3e2   : > { %v6009_v41 = vpop.permute.xlu1 %6008 }
 0x3e3   : > { %v6011_v37 = vunpack.i.h.bf16 %v6009_v41  ;;  %v6010_v30 = vunpack.i.l.bf16 %v6009_v41 }
 0x3e4   : > { %6088 = vrot.lane.b32.xlu1 %v8078_v40, %s6708_s24 }
 0x3e5   : > { %v5782_v21 = vpack.c.bf16 %v6011_v37, %v6010_v30  ;;  %6073 = vrot.lane.b32.xlu0 %v8065_v36, %s6708_s24 }
 0x3e7   : > { %5784 = vmatprep.subr.msk.bf16.mxu1 %vm8121_vm2, %v5782_v21 }
 0x3e8   : > { %6098 = vrot.lane.b32.xlu1 %v8086_v20, %s6708_s24  ;;  %5787 = vmatpush3.bf16.xpose.msk.msra.mxu1 %vm8121_vm2, %v5782_v21 }
 0x3e9   : > { %6083 = vrot.lane.b32.xlu0 %v8074_v58, %s6708_s24 }
 0x3ec   : > { %6108 = vrot.lane.b32.xlu1 %v8065_v36, %s6701_s18  ;;  %v8224_v36 = vmul.f32 0.25, %v8096_v51 }
 0x3ed   : > { %6093 = vrot.lane.b32.xlu0 %v8082_v43, %s6708_s24 }
 0x3f0   : > { %6118 = vrot.lane.b32.xlu1 %v8074_v58, %s6701_s18 }
 0x3f1   : > { %6103 = vrot.lane.b32.xlu0 %v8090_v16, %s6708_s24 }
 0x3f2   : > { %v6014_v27 = vpop.permute.xlu0 %6013 }
 0x3f3   : > { %v6016_v5 = vunpack.i.h.bf16 %v6014_v27  ;;  %v6015_v47 = vunpack.i.l.bf16 %v6014_v27 }
 0x3f4   : > { %2720 = vrot.lane.b32.xlu1 %v8209_v56, %s6710_s22 }
 0x3f5   : > { %v5788_v52 = vpack.c.bf16 %v6016_v5, %v6015_v47  ;;  %6113 = vrot.lane.b32.xlu0 %v8070_v46, %s6701_s18 }
 0x3f7   : > { %5790 = vmatprep.subr.msk.bf16.mxu1 %vm8121_vm2, %v5788_v52 }
 0x3f8   : > { %5793 = vmatpush3.bf16.xpose.msk.msra.mxu1 %vm8121_vm2, %v5788_v52 }
 0x3f9   : > { %6123 = vrot.lane.b32.xlu0 %v8102_v63, %s6709_s21 }
 0x3fd   : > { %6128 = vrot.lane.b32.xlu0 %v8102_v63, %s6708_s24  ;;  %s6714_s24 = smov 1  }
 0x401   : > { %2718 = vrot.lane.b32.xlu0 %v8224_v36, %s6710_s22 }
 0x402   : > { %v6019_v58 = vpop.permute.xlu1 %6018 }
 0x403   : > { %v6021_v46 = vunpack.i.h.bf16 %v6019_v58  ;;  %v6020_v53 = vunpack.i.l.bf16 %v6019_v58 }
 0x405   : > { %v5794_v34 = vpack.c.bf16 %v6021_v46, %v6020_v53 }
 0x407   : > { %5796 = vmatprep.subr.msk.bf16.mxu1 %vm8121_vm2, %v5794_v34 }
 0x408   : > { %5799 = vmatpush3.bf16.xpose.msk.msra.mxu1 %vm8121_vm2, %v5794_v34 }
 0x412   : > { %v6024_v49 = vpop.permute.xlu0 %6023 }
 0x413   : > { %v6026_v57 = vunpack.i.h.bf16 %v6024_v49  ;;  %v6025_v50 = vunpack.i.l.bf16 %v6024_v49 }
 0x415   : > { %v5800_v3 = vpack.c.bf16 %v6026_v57, %v6025_v50 }
 0x417   : > { %5802 = vmatprep.subr.msk.bf16.mxu1 %vm8121_vm2, %v5800_v3 }
 0x418   : > { %5805 = vmatpush3.bf16.xpose.msk.msra.mxu1 %vm8121_vm2, %v5800_v3 }
 0x422   : > { %v6029_v48 = vpop.permute.xlu1 %6028 }
 0x423   : > { %v6031_v39 = vunpack.i.h.bf16 %v6029_v48  ;;  %v6030_v51 = vunpack.i.l.bf16 %v6029_v48 }
 0x425   : > { %v5806_v28 = vpack.c.bf16 %v6031_v39, %v6030_v51 }
 0x426   : > { %v6039_v0 = vpop.permute.xlu1 %6038 }
 0x427   : > { %5808 = vmatprep.subr.msk.bf16.mxu1 %vm8121_vm2, %v5806_v28  ;;  %v6041_v55 = vunpack.i.h.bf16 %v6039_v0  ;;  %v6040_v22 = vunpack.i.l.bf16 %v6039_v0 }
 0x428   : > { %5811 = vmatpush3.bf16.xpose.msk.msra.mxu1 %vm8121_vm2, %v5806_v28 }
 0x429   : > { %v5854_v21 = vpack.c.bf16 %v6041_v55, %v6040_v22 }
 0x42a   : > { %v6049_v15 = vpop.permute.xlu1 %6048  ;;  %v6034_v9 = vpop.permute.xlu0 %6033 }
 0x42b   : > { %v6036_v19 = vunpack.i.h.bf16 %v6034_v9  ;;  %v6035_v6 = vunpack.i.l.bf16 %v6034_v9  ;;  %v6051_v49 = vunpack.i.h.bf16 %v6049_v15  ;;  %v6050_v57 = vunpack.i.l.bf16 %v6049_v15 }
 0x42d   : > { %v5812_v41 = vpack.c.bf16 %v6036_v19, %v6035_v6 }
 0x42e   : > { %v6059_v37 = vpop.permute.xlu1 %6058  ;;  %v6044_v30 = vpop.permute.xlu0 %6043 }
 0x42f   : > { %5814 = vmatprep.subr.msk.bf16.mxu1 %vm8121_vm2, %v5812_v41  ;;  %v6046_v47 = vunpack.i.h.bf16 %v6044_v30  ;;  %v6045_v52 = vunpack.i.l.bf16 %v6044_v30  ;;  %v6060_v28 = vunpack.i.l.bf16 %v6059_v37 }
 0x430   : > { %5817 = vmatpush3.bf16.xpose.msk.msra.mxu1 %vm8121_vm2, %v5812_v41 }
 0x431   : > { %5856 = vmatprep.subr.msk.bf16.mxu1 %vm8121_vm2, %v5854_v21  ;;  %v5860_v53 = vpack.c.bf16 %v6046_v47, %v6045_v52 }
 0x432   : > { %v8246_v27 = vpop.permute.xlu1 %6068  ;;  %v6054_v5 = vpop.permute.xlu0 %6053 }
 0x433   : > { %v6055_v48 = vunpack.i.l.bf16 %v6054_v5  ;;  %v6071_v30 = vunpack.i.h.bf16 %v8246_v27 }
 0x436   : > { %v2691_v58 = vpop.permute.xlu1 %2690  ;;  %v6064_v46 = vpop.permute.xlu0 %6063 }
 0x437   : > { %5480 = vmatmul.mubr.msk.f32.vlgmr.msra.gmra.mrb[0].mxu1 %vm9982_vm1, %v8130_v10  ;;  %v6065_v9 = vunpack.i.l.bf16 %v6064_v46 }
 0x438   : > { %5482 = vmatprep.mubr.msk.f32.mxu1 %vm9982_vm1, %v8125_v23  ;;  %5859 = vmatpush3.bf16.xpose.msk.msra.mxu1 %vm8121_vm2, %v5854_v21  ;;  %v5866_v23 = vpack.c.bf16 %v6051_v49, %v6050_v57 }
 0x439   : > { %5862 = vmatprep.subr.msk.bf16.mxu1 %vm8121_vm2, %v5860_v53 }
 0x43a   : > { %v8256_v34 = vpop.permute.xlu1 %2694 }
 0x43b   : > { %v8258_v50 = vpop.permute.xlu0 %2692  ;;  %5483 = vmatmul.mubr.msk.f32.gmra.mrb[2].mxu1 %vm9982_vm1, %v8140_v38 }
 0x43c   : > { %5485 = vmatprep.mubr.msk.f32.mxu1 %vm9982_vm1, %v8138_v18  ;;  %v6056_v18 = vunpack.i.h.bf16 %v6054_v5 }
 0x43e   : > { %v8264_v10 = vpop.permute.xlu1 %2698 }
 0x43f   : > { %v8266_v3 = vpop.permute.xlu0 %2696  ;;  %5486 = vmatmul.mubr.msk.f32.gmra.mrb[4].mxu1 %vm9982_vm1, %v8148_v33 }
 0x440   : > { %5488 = vmatprep.mubr.msk.f32.mxu1 %vm9982_vm1, %v8146_v1  ;;  %5865 = vmatpush3.bf16.xpose.msk.msra.mxu1 %vm8121_vm2, %v5860_v53  ;;  %v5872_v1 = vpack.c.bf16 %v6056_v18, %v6055_v48 }
 0x441   : > { %5868 = vmatprep.subr.msk.bf16.mxu1 %vm8121_vm2, %v5866_v23 }
 0x442   : > { %v8276_v38 = vpop.permute.xlu1 %2702 }
 0x443   : > { %v8278_v39 = vpop.permute.xlu0 %2700  ;;  %5489 = vmatmul.mubr.msk.f32.gmra.mrb[6].mxu1 %vm9982_vm1, %v8156_v26 }
 0x444   : > { %5491 = vmatprep.mubr.msk.f32.mxu1 %vm9982_vm1, %v8154_v12  ;;  %v6061_v12 = vunpack.i.h.bf16 %v6059_v37 }
 0x446   : > { %v8284_v33 = vpop.permute.xlu1 %2706 }
 0x447   : > { %v8286_v51 = vpop.permute.xlu0 %2704  ;;  %5492 = vmatmul.mubr.msk.f32.gmra.mrb[8].mxu1 %vm9982_vm1, %v8166_v14  ;;  %v5878_v14 = vpack.c.bf16 %v6061_v12, %v6060_v28 }
 0x448   : > { %5494 = vmatprep.mubr.msk.f32.mxu1 %vm9982_vm1, %v8162_v59  ;;  %5871 = vmatpush3.bf16.xpose.msk.msra.mxu1 %vm8121_vm2, %v5866_v23 }
 0x449   : > { %5874 = vmatprep.subr.msk.bf16.mxu1 %vm8121_vm2, %v5872_v1 }
 0x44a   : > { %v8296_v26 = vpop.permute.xlu1 %2710 }
 0x44b   : > { %v8298_v0 = vpop.permute.xlu0 %2708  ;;  %5495 = vmatmul.mubr.msk.f32.gmra.mrb[10].mxu1 %vm9982_vm1, %v8176_v11  ;;  %v6066_v11 = vunpack.i.h.bf16 %v6064_v46 }
 0x44c   : > { %5497 = vmatprep.mubr.msk.f32.mxu1 %vm9982_vm1, %v8174_v35 }
 0x44e   : > { %v8304_v59 = vpop.permute.xlu1 %2714 }
 0x44f   : > { %v8306_v15 = vpop.permute.xlu0 %2712  ;;  %5498 = vmatmul.mubr.msk.f32.gmra.mrb[12].mxu1 %vm9982_vm1, %v8182_v8  ;;  %v5884_v8 = vpack.c.bf16 %v6066_v11, %v6065_v9 }
 0x450   : > { %5500 = vmatprep.mubr.msk.f32.mxu1 %vm9982_vm1, %v8224_v36  ;;  %5877 = vmatpush3.bf16.xpose.msk.msra.mxu1 %vm8121_vm2, %v5872_v1 }
 0x451   : > { %5880 = vmatprep.subr.msk.bf16.mxu1 %vm8121_vm2, %v5878_v14 }
 0x452   : > { %v6079_v55 = vpop.permute.xlu1 %6078 }
 0x453   : > { %v8316_v35 = vpop.permute.xlu0 %2716  ;;  %5501 = vmatmul.mubr.msk.f32.gmra.mrb[14].mxu1 %vm9982_vm1, %v8209_v56  ;;  %v6081_v19 = vunpack.i.h.bf16 %v6079_v55  ;;  %v6080_v36 = vunpack.i.l.bf16 %v6079_v55  ;;  %v6070_v56 = vunpack.i.l.bf16 %v8246_v27 }
 0x454   : > { %5619 = vmatprep.mubr.msk.f32.mxu1 %vm9982_vm1, %v2691_v58 }
 0x455   : > { %v5822_v52 = vpack.c.bf16 %v6081_v19, %v6080_v36  ;;  %v5890_v46 = vpack.c.bf16 %v6071_v30, %v6070_v56 }
 0x456   : > { %v6089_v58 = vpop.permute.xlu1 %6088 }
 0x457   : > { %v6074_v22 = vpop.permute.xlu0 %6073  ;;  %v6091_v49 = vunpack.i.h.bf16 %v6089_v58  ;;  %v6090_v57 = vunpack.i.l.bf16 %v6089_v58 }
 0x458   : > { %v6076_v6 = vunpack.i.h.bf16 %v6074_v22  ;;  %v6075_v41 = vunpack.i.l.bf16 %v6074_v22  ;;  %5883 = vmatpush3.bf16.xpose.msk.msra.mxu1 %vm8121_vm2, %v5878_v14 }
 0x459   : > { %5886 = vmatprep.subr.msk.bf16.mxu1 %vm8121_vm2, %v5884_v8  ;;  %v5830_v12 = vpack.c.bf16 %v6091_v49, %v6090_v57 }
 0x45a   : > { %v5818_v37 = vpack.c.bf16 %v6076_v6, %v6075_v41  ;;  %v6099_v18 = vpop.permute.xlu1 %6098 }
 0x45b   : > { %v6084_v21 = vpop.permute.xlu0 %6083  ;;  %v6101_v28 = vunpack.i.h.bf16 %v6099_v18  ;;  %v6100_v14 = vunpack.i.l.bf16 %v6099_v18 }
 0x45c   : > { %v6086_v5 = vunpack.i.h.bf16 %v6084_v21  ;;  %v6085_v47 = vunpack.i.l.bf16 %v6084_v21  ;;  %5819 = vmatprep.subr.bf16.mxu0 %v5818_v37 }
 0x45d   : > { %5821 = vmatpush3.bf16.msra.mxu0 %v5818_v37 }
 0x45e   : > { %5823 = vmatprep.subr.bf16.mxu0 %v5822_v52  ;;  %v5826_v23 = vpack.c.bf16 %v6086_v5, %v6085_v47  ;;  %v8355_v62 = vpop.permute.xlu1 %6108 }
 0x45f   : > { %v6094_v53 = vpop.permute.xlu0 %6093 }
 0x460   : > { %5889 = vmatpush3.bf16.xpose.msk.msra.mxu1 %vm8121_vm2, %v5884_v8  ;;  %v6096_v48 = vunpack.i.h.bf16 %v6094_v53  ;;  %v6095_v1 = vunpack.i.l.bf16 %v6094_v53  ;;  %v5838_v8 = vpack.c.bf16 %v6101_v28, %v6100_v14 }
 0x461   : > { %5825 = vmatpush3.bf16.msra.mxu0 %v5822_v52  ;;  %5892 = vmatprep.subr.msk.bf16.mxu1 %vm8121_vm2, %v5890_v46 }
 0x462   : > { %5827 = vmatprep.subr.bf16.mxu0 %v5826_v23  ;;  %v5834_v9 = vpack.c.bf16 %v6096_v48, %v6095_v1 }
 0x463   : > { %v6104_v27 = vpop.permute.xlu0 %6103 }
 0x464   : > { %v6106_v22 = vunpack.i.h.bf16 %v6104_v27  ;;  %v6105_v19 = vunpack.i.l.bf16 %v6104_v27 }
 0x465   : > { %5829 = vmatpush3.bf16.msra.mxu0 %v5826_v23 }
 0x466   : > { %5831 = vmatprep.subr.bf16.mxu0 %v5830_v12  ;;  %v5842_v21 = vpack.c.bf16 %v6106_v22, %v6105_v19 }
 0x467   : > { %v8331_v11 = vpop.permute.xlu0 %6113 }
 0x468   : > { %10149 = vst [vmem:[#allocation12_spill] sm:$0xff] %v8331_v11  ;;  %5895 = vmatpush3.bf16.xpose.msk.msra.mxu1 %vm8121_vm2, %v5890_v46 }
 0x469   : > { %5833 = vmatpush3.bf16.msra.mxu0 %v5830_v12 }
 0x46a   : > { %5835 = vmatprep.subr.bf16.mxu0 %v5834_v9 }
 0x46b   : > { %v6124_v55 = vpop.permute.xlu0 %6123 }
 0x46c   : > { %v6126_v36 = vunpack.i.h.bf16 %v6124_v55  ;;  %v6125_v6 = vunpack.i.l.bf16 %v6124_v55 }
 0x46d   : > { %5837 = vmatpush3.bf16.msra.mxu0 %v5834_v9 }
 0x46e   : > { %v5896_v41 = vpack.c.bf16 %v6126_v36, %v6125_v6  ;;  %5839 = vmatprep.subr.bf16.mxu0 %v5838_v8 }
 0x46f   : > { %v6129_v37 = vpop.permute.xlu0 %6128 }
 0x470   : > { %v6131_v30 = vunpack.i.h.bf16 %v6129_v37  ;;  %v6130_v56 = vunpack.i.l.bf16 %v6129_v37  ;;  %5898 = vmatprep.subr.msk.bf16.mxu1 %vm8121_vm2, %v5896_v41 }
 0x471   : > { %5841 = vmatpush3.bf16.msra.mxu0 %v5838_v8  ;;  %5901 = vmatpush3.bf16.xpose.msk.msra.mxu1 %vm8121_vm2, %v5896_v41 }
 0x472   : > { %5843 = vmatprep.subr.bf16.mxu0 %v5842_v21  ;;  %v5846_v5 = vpack.c.bf16 %v6131_v30, %v6130_v56 }
 0x475   : > { %5845 = vmatpush3.bf16.msra.mxu0 %v5842_v21 }
 0x476   : > { %5847 = vmatprep.subr.bf16.mxu0 %v5846_v5 }
 0x478   : > { %5620 = vmatmul.mubr.msk.f32.vlgmr.msra.gmra.mrb[16].mxu1 %vm9982_vm1, %v8258_v50  ;;  %v2719_v50 = vpop.permute.xlu0 %2718 }
 0x479   : > { %5849 = vmatpush3.bf16.msra.mxu0 %v5846_v5  ;;  %5622 = vmatprep.mubr.msk.f32.mxu1 %vm9982_vm1, %v8256_v34  ;;  %v8363_v34 = vpop.permute.xlu1 %6118 }
 0x47a   : > { %10150 = vst [vmem:[#allocation17_spill] sm:$0xff] %v8363_v34 }
 0x47c   : > { %5623 = vmatmul.mubr.msk.f32.gmra.mrb[18].mxu1 %vm9982_vm1, %v8266_v3  ;;  %v1669_v3 = vlaneseq }
 0x47d   : > { %5625 = vmatprep.mubr.msk.f32.mxu1 %vm9982_vm1, %v8264_v10  ;;  %v2721_v10 = vpop.permute.xlu1 %2720 }
 0x480   : > { %5626 = vmatmul.mubr.msk.f32.gmra.mrb[20].mxu1 %vm9982_vm1, %v8278_v39 }
 0x481   : > { %5628 = vmatprep.mubr.msk.f32.mxu1 %vm9982_vm1, %v8276_v38  ;;  %v8371_v38 = vshrl.u32 %v1669_v3, 7 }
 0x483   : > { %10151 = vst [vmem:[#allocation19_spill] sm:$0xff] %v8371_v38  ;;  %v8374_v39 = vadd.s32 8, %v8371_v38  ;;  %v1674_v47 = vadd.s32 32, %v8371_v38  ;;  %v1677_v27 = vadd.s32 56, %v8371_v38  ;;  %v1676_v18 = vadd.s32 48, %v8371_v38 }
 0x484   : > { %5629 = vmatmul.mubr.msk.f32.gmra.mrb[22].mxu1 %vm9982_vm1, %v8286_v51  ;;  %v1679_v19 = vadd.s32 72, %v8371_v38  ;;  %v1678_v56 = vadd.s32 64, %v8371_v38 }
 0x485   : > { %5631 = vmatprep.mubr.msk.f32.mxu1 %vm9982_vm1, %v8284_v33  ;;  %10152 = vst [vmem:[#allocation15_spill] sm:$0xff] %v8374_v39  ;;  %v1751_v33 = vand.u32 127, %v1669_v3  ;;  %v9984_v51 = vcvt.s32.f32 %v8374_v39  ;;  %v1690_v23 = vcvt.s32.f32 %v1674_v47  ;;  %v1693_v8 = vcvt.s32.f32 %v1677_v27 }
 0x486   : > { %v1692_v22 = vcvt.s32.f32 %v1676_v18  ;;  %v1695_v3 = vcvt.s32.f32 %v1679_v19  ;;  %v1694_v47 = vcvt.s32.f32 %v1678_v56 }
 0x487   : > { %v1703_v52 = vadd.f32 0.5, %v9984_v51  ;;  %v1706_v55 = vadd.f32 0.5, %v1690_v23 }
 0x488   : > { %5632 = vmatmul.mubr.msk.f32.gmra.mrb[24].mxu1 %vm9982_vm1, %v8298_v0  ;;  %v1673_v0 = vadd.s32 24, %v8371_v38  ;;  %v1711_v18 = vadd.f32 0.5, %v1695_v3  ;;  %v1685_v3 = vadd.s32 120, %v8371_v38 }
 0x489   : > { %5634 = vmatprep.mubr.msk.f32.mxu1 %vm9982_vm1, %v8296_v26  ;;  %v1752_v26 = vcvt.s32.f32 %v1751_v33  ;;  %v1719_v48 = vmul.f32 0.125, %v1703_v52  ;;  %v1722_v5 = vmul.f32 0.125, %v1706_v55  ;;  %v1680_v52 = vadd.s32 80, %v8371_v38 }
 0x48a   : > { %v1689_v46 = vcvt.s32.f32 %v1673_v0  ;;  %v1681_v0 = vadd.s32 88, %v8371_v38 }
 0x48b   : > { %v1753_v58 = vadd.f32 0.5, %v1752_v26  ;;  %v1735_v36 = vfloor.f32 %v1719_v48  ;;  %v1696_v55 = vcvt.s32.f32 %v1680_v52 }
 0x48c   : > { %5635 = vmatmul.mubr.msk.f32.gmra.mrb[26].mxu1 %vm9982_vm1, %v8306_v15  ;;  %v1672_v15 = vadd.s32 16, %v8371_v38  ;;  %v1705_v12 = vadd.f32 0.5, %v1689_v46 }
 0x48d   : > { %5637 = vmatprep.mubr.msk.f32.mxu1 %vm9982_vm1, %v8304_v59  ;;  %v9985_v59 = vcvt.s32.f32 %v8371_v38  ;;  %v1754_v1 = vmul.f32 0.125, %v1753_v58 }
 0x48e   : > { %v1688_v49 = vcvt.s32.f32 %v1672_v15  ;;  %v1721_v41 = vmul.f32 0.125, %v1705_v12  ;;  %v1697_v12 = vcvt.s32.f32 %v1681_v0  ;;  %v1712_v0 = vadd.f32 0.5, %v1696_v55 }
 0x48f   : > { %v1702_v53 = vadd.f32 0.5, %v9985_v59  ;;  %v8389_v6 = vfloor.f32 %v1754_v1 }
 0x490   : > { %5638 = vmatmul.mubr.msk.f32.gmra.mrb[28].mxu1 %vm9982_vm1, %v8316_v35  ;;  %v1675_v35 = vadd.s32 40, %v8371_v38  ;;  %v1704_v14 = vadd.f32 0.5, %v1688_v49  ;;  %v1737_v26 = vfloor.f32 %v1721_v41  ;;  %v1728_v55 = vmul.f32 0.125, %v1712_v0 }
 0x491   : > { %5640 = vmatprep.mubr.msk.f32.mxu1 %vm9982_vm1, %v2719_v50  ;;  %v1718_v28 = vmul.f32 0.125, %v1702_v53  ;;  %10153 = vst [vmem:[#allocation4_spill] sm:$0xff] %v8389_v6  ;;  %v1709_v50 = vadd.f32 0.5, %v1693_v8  ;;  %vm8393_vm3 = vcmp.eq.f32.partialorder %v1735_v36, %v8389_v6  ;;  %v1738_v53 = vfloor.f32 %v1722_v5 }
 0x492   : > { %v1691_v57 = vcvt.s32.f32 %v1675_v35  ;;  %v1720_v30 = vmul.f32 0.125, %v1704_v14  ;;  %vm8414_vm5 = vcmp.eq.f32.partialorder %v1737_v26, %v8389_v6  ;;  %v1682_v8 = vadd.s32 96, %v8371_v38 }
 0x493   : > { %v1734_v37 = vfloor.f32 %v1718_v28  ;;  %v1725_v23 = vmul.f32 0.125, %v1709_v50  ;;  %v1683_v28 = vadd.s32 104, %v8371_v38  ;;  %vm8432_vm8 = vcmp.eq.f32.partialorder %v1738_v53, %v8389_v6 }
 0x494   : > { %5641 = vmatmul.mubr.msk.f32.gmra.mrb[30].mxu1 %vm9982_vm1, %v2721_v10  ;;  %v1707_v9 = vadd.f32 0.5, %v1691_v57  ;;  %v1708_v10 = vadd.f32 0.5, %v1692_v22  ;;  %v1736_v35 = vfloor.f32 %v1720_v30  ;;  %v1713_v50 = vadd.f32 0.5, %v1697_v12 }
 0x495   : > { %vm8399_vm4 = vcmp.eq.f32.partialorder %v1734_v37, %v8389_v6  ;;  %v1741_v30 = vfloor.f32 %v1725_v23 }
 0x496   : > { %v1723_v21 = vmul.f32 0.125, %v1707_v9  ;;  %v1724_v27 = vmul.f32 0.125, %v1708_v10  ;;  %vm8421_vm6 = vcmp.eq.f32.partialorder %v1736_v35, %v8389_v6  ;;  %v1710_v9 = vadd.f32 0.5, %v1694_v47 }
 0x497   : > { %v1699_v10 = vcvt.s32.f32 %v1683_v28  ;;  %v1698_v35 = vcvt.s32.f32 %v1682_v8  ;;  %v1684_v47 = vadd.s32 112, %v8371_v38  ;;  %vm8453_vm9 = vcmp.eq.f32.partialorder %v1741_v30, %v8389_v6 }
 0x498   : > { %v1739_v46 = vfloor.f32 %v1723_v21  ;;  %v1740_v56 = vfloor.f32 %v1724_v27  ;;  %v1727_v21 = vmul.f32 0.125, %v1711_v18  ;;  %v1726_v26 = vmul.f32 0.125, %v1710_v9 }
 0x499   : > { %v1729_v18 = vmul.f32 0.125, %v1713_v50  ;;  %v1715_v12 = vadd.f32 0.5, %v1699_v10  ;;  %v1701_v28 = vcvt.s32.f32 %v1685_v3  ;;  %v1714_v8 = vadd.f32 0.5, %v1698_v35 }
 0x49a   : > { %vm8427_vm7 = vcmp.eq.f32.partialorder %v1739_v46, %v8389_v6  ;;  %vm8458_vm10 = vcmp.eq.f32.partialorder %v1740_v56, %v8389_v6  ;;  %v1743_v23 = vfloor.f32 %v1727_v21  ;;  %v1742_v9 = vfloor.f32 %v1726_v26 }
 0x49b   : > { %v1745_v10 = vfloor.f32 %v1729_v18  ;;  %v1731_v3 = vmul.f32 0.125, %v1715_v12  ;;  %v1717_v26 = vadd.f32 0.5, %v1701_v28  ;;  %v1744_v35 = vfloor.f32 %v1728_v55 }
 0x49c   : > { %vm8473_vm11 = vcmp.eq.f32.partialorder %v1743_v23, %v8389_v6  ;;  %vm8484_vm12 = vcmp.eq.f32.partialorder %v1742_v9, %v8389_v6 }
 0x49d   : > { %vm8497_vm13 = vcmp.eq.f32.partialorder %v1745_v10, %v8389_v6  ;;  %v1747_v9 = vfloor.f32 %v1731_v3  ;;  %vm8504_vm14 = vcmp.eq.f32.partialorder %v1744_v35, %v8389_v6 }
 0x49f   : > { %vm8517_vm15 = vcmp.eq.f32.partialorder %v1747_v9, %v8389_v6 }
 0x50a   : > { %v5481_v58 = vpop.f32.mrb[0].mxu1 }
 0x50b   : > { %v8406_v49 = vsel %vm8393_vm3, %v5481_v58, -1e+30  ;;  %v1983_v57 = vpop.f32.mrb[1].mxu1 }
 0x50c   : > { %v8410_v48 = vsel %vm8399_vm4, %v1983_v57, -1e+30  ;;  %2080 = vmax.xlane.f32.xlu0 %v8406_v49 }
 0x50d   : > { %2078 = vmax.xlane.f32.xlu1 %v8410_v48 }
 0x50e   : > { %v5484_v22 = vpop.f32.mrb[2].mxu1 }
 0x50f   : > { %v8438_v41 = vsel %vm8414_vm5, %v5484_v22, -1e+30  ;;  %v1993_v37 = vpop.f32.mrb[3].mxu1  ;;  %v1700_v22 = vcvt.s32.f32 %v1684_v47  ;;  %v1730_v47 = vmul.f32 0.125, %v1714_v8 }
 0x510   : > { %v8442_v5 = vsel %vm8421_vm6, %v1993_v37, -1e+30  ;;  %2084 = vmax.xlane.f32.xlu0 %v8438_v41 }
 0x511   : > { %2082 = vmax.xlane.f32.xlu1 %v8442_v5  ;;  %v1746_v8 = vfloor.f32 %v1730_v47 }
 0x512   : > { %v5487_v52 = vpop.f32.mrb[4].mxu1 }
 0x513   : > { %v8450_v58 = vsel %vm8427_vm7, %v5487_v52, -1e+30  ;;  %v2003_v46 = vpop.f32.mrb[5].mxu1  ;;  %v1716_v52 = vadd.f32 0.5, %v1700_v22  ;;  %vm8524_vm2 = vcmp.eq.f32.partialorder %v1746_v8, %v8389_v6 }
 0x514   : > { %v8464_v27 = vsel %vm8432_vm8, %v2003_v46, -1e+30 }
 0x515   : > { %2088 = vmax.xlane.f32.xlu1 %v8450_v58  ;;  %2086 = vmax.xlane.f32.xlu0 %v8464_v27  ;;  %v1732_v22 = vmul.f32 0.125, %v1716_v52 }
 0x516   : > { %v5490_v37 = vpop.f32.mrb[6].mxu1 }
 0x517   : > { %v8470_v30 = vsel %vm8453_vm9, %v5490_v37, -1e+30  ;;  %v2013_v56 = vpop.f32.mrb[7].mxu1  ;;  %v1733_v37 = vmul.f32 0.125, %v1717_v26  ;;  %v1748_v52 = vfloor.f32 %v1732_v22 }
 0x518   : > { %v8479_v50 = vsel %vm8458_vm10, %v2013_v56, -1e+30 }
 0x519   : > { %2092 = vmax.xlane.f32.xlu1 %v8470_v30  ;;  %2090 = vmax.xlane.f32.xlu0 %v8479_v50  ;;  %v1749_v35 = vfloor.f32 %v1733_v37  ;;  %vm8544_vm0 = vcmp.eq.f32.partialorder %v1748_v52, %v8389_v6 }
 0x51a   : > { %v5493_v46 = vpop.f32.mrb[8].mxu1 }
 0x51b   : > { %v8490_v23 = vsel %vm8473_vm11, %v5493_v46, -1e+30  ;;  %v2023_v18 = vpop.f32.mrb[9].mxu1  ;;  %vm8537_vm1 = vcmp.eq.f32.partialorder %v1749_v35, %v8389_v6 }
 0x51c   : > { %v8494_v12 = vsel %vm8484_vm12, %v2023_v18, -1e+30 }
 0x51d   : > { %2096 = vmax.xlane.f32.xlu1 %v8490_v23  ;;  %2094 = vmax.xlane.f32.xlu0 %v8494_v12 }
 0x51e   : > { %v5496_v56 = vpop.f32.mrb[10].mxu1 }
 0x51f   : > { %v8510_v10 = vsel %vm8497_vm13, %v5496_v56, -1e+30  ;;  %v2033_v46 = vpop.f32.mrb[11].mxu1 }
 0x520   : > { %v8514_v3 = vsel %vm8504_vm14, %v2033_v46, -1e+30 }
 0x521   : > { %2100 = vmax.xlane.f32.xlu1 %v8510_v10  ;;  %2098 = vmax.xlane.f32.xlu0 %v8514_v3 }
 0x522   : > { %v5499_v18 = vpop.f32.mrb[12].mxu1 }
 0x523   : > { %v8530_v56 = vsel %vm8517_vm15, %v5499_v18, -1e+30  ;;  %v2043_v9 = vpop.f32.mrb[13].mxu1 }
 0x524   : > { %v8534_v46 = vsel %vm8524_vm2, %v2043_v9, -1e+30 }
 0x525   : > { %2104 = vmax.xlane.f32.xlu1 %v8530_v56  ;;  %2102 = vmax.xlane.f32.xlu0 %v8534_v46 }
 0x526   : > { %v5502_v22 = vpop.f32.mrb[14].mxu1 }
 0x527   : > { %v8550_v18 = vsel %vm8537_vm1, %v5502_v22, -1e+30  ;;  %v2053_v9 = vpop.f32.mrb[15].mxu1 }
 0x528   : > { %v8554_v35 = vsel %vm8544_vm0, %v2053_v9, -1e+30 }
 0x529   : > { %2108 = vmax.xlane.f32.xlu1 %v8550_v18  ;;  %2106 = vmax.xlane.f32.xlu0 %v8554_v35 }
 0x53a   : > { %6138 = vrot.lane.b32.xlu1 %v8082_v43, %s6701_s18 }
 0x53f   : > { %6133 = vrot.lane.b32.xlu0 %v8078_v40, %s6701_s18 }
 0x54b   : > { %v5621_v52 = vpop.f32.mrb[16].mxu1 }
 0x54c   : > { %v2884_v51 = vpop.f32.mrb[17].mxu1  ;;  %v8564_v17 = vsel %vm8393_vm3, %v5621_v52, -1e+30 }
 0x54d   : > { %v8574_v60 = vsel %vm8399_vm4, %v2884_v51, -1e+30 }
 0x54f   : > { %v5624_v59 = vpop.f32.mrb[18].mxu1 }
 0x550   : > { %v2894_v22 = vpop.f32.mrb[19].mxu1  ;;  %v8584_v19 = vsel %vm8414_vm5, %v5624_v59, -1e+30 }
 0x551   : > { %v8594_v15 = vsel %vm8421_vm6, %v2894_v22, -1e+30 }
 0x553   : > { %v5627_v39 = vpop.f32.mrb[20].mxu1 }
 0x554   : > { %v2904_v38 = vpop.f32.mrb[21].mxu1  ;;  %v8568_v43 = vsel %vm8427_vm7, %v5627_v39, -1e+30 }
 0x555   : > { %v8604_v59 = vsel %vm8432_vm8, %v2904_v38, -1e+30 }
 0x557   : > { %v5630_v6 = vpop.f32.mrb[22].mxu1 }
 0x558   : > { %v2914_v32 = vpop.f32.mrb[23].mxu1  ;;  %v8578_v45 = vsel %vm8453_vm9, %v5630_v6, -1e+30 }
 0x559   : > { %v8614_v14 = vsel %vm8458_vm10, %v2914_v32, -1e+30 }
 0x55b   : > { %v5633_v9 = vpop.f32.mrb[24].mxu1 }
 0x55c   : > { %v2924_v44 = vpop.f32.mrb[25].mxu1  ;;  %v8588_v52 = vsel %vm8473_vm11, %v5633_v9, -1e+30 }
 0x55d   : > { %v8624_v38 = vsel %vm8484_vm12, %v2924_v44, -1e+30 }
 0x55e   : > { %2981 = vmax.xlane.f32.xlu1 %v8564_v17  ;;  %2989 = vmax.xlane.f32.xlu0 %v8568_v43  ;;  %10187 = vst [vmem:[#allocation51_spill] sm:$0xff] %v8624_v38 }
 0x55f   : > { %v5636_v40 = vpop.f32.mrb[26].mxu1 }
 0x560   : > { %v2934_v25 = vpop.f32.mrb[27].mxu1  ;;  %v8598_v53 = vsel %vm8497_vm13, %v5636_v40, -1e+30 }
 0x561   : > { %v8629_v36 = vsel %vm8504_vm14, %v2934_v25, -1e+30 }
 0x562   : > { %2979 = vmax.xlane.f32.xlu1 %v8574_v60  ;;  %2993 = vmax.xlane.f32.xlu0 %v8578_v45  ;;  %10188 = vst [vmem:[#allocation53_spill] sm:$0xff] %v8629_v36 }
 0x563   : > { %v5639_v39 = vpop.f32.mrb[28].mxu1 }
 0x564   : > { %v2944_v33 = vpop.f32.mrb[29].mxu1  ;;  %v8608_v1 = vsel %vm8517_vm15, %v5639_v39, -1e+30 }
 0x565   : > { %v8634_v32 = vsel %vm8524_vm2, %v2944_v33, -1e+30  ;;  %vm10238_vm2 = vcmask 130048  }
 0x566   : > { %2985 = vmax.xlane.f32.xlu1 %v8584_v19  ;;  %2997 = vmax.xlane.f32.xlu0 %v8588_v52  ;;  %10189 = vst [vmem:[#allocation3_spill] sm:$0xff] %v8634_v32 }
 0x567   : > { %v5642_v51 = vpop.f32.mrb[30].mxu1 }
 0x568   : > { %v2954_v6 = vpop.f32.mrb[31].mxu1  ;;  %v8618_v21 = vsel %vm8537_vm1, %v5642_v51, -1e+30 }
 0x569   : > { %10186 = vst [vmem:[#allocation18_spill] sm:$0xff] %v8618_v21  ;;  %v8639_v57 = vsel %vm8544_vm0, %v2954_v6, -1e+30  ;;  %vm10203_vm0 = vcmask 261120  }
 0x56a   : > { %2983 = vmax.xlane.f32.xlu1 %v8594_v15  ;;  %3001 = vmax.xlane.f32.xlu0 %v8598_v53  ;;  %10190 = vst [vmem:[#allocation52_spill] sm:$0xff] %v8639_v57  ;;  %vm10204_vm1 = vmmov %vm10203_vm0 }
 0x56b   : > { %vm10209_vm3 = vmmov %vm10203_vm0 }
 0x56c   : > { %vm10210_vm4 = vmmov %vm10203_vm0 }
 0x56d   : > { %vm10211_vm5 = vmmov %vm10203_vm0 }
 0x56e   : > { %2987 = vmax.xlane.f32.xlu1 %v8604_v59  ;;  %3005 = vmax.xlane.f32.xlu0 %v8608_v1  ;;  %vm10212_vm6 = vmmov %vm10203_vm0 }
 0x56f   : > { %vm10213_vm7 = vmmov %vm10203_vm0 }
 0x570   : > { %vm10214_vm8 = vmmov %vm10203_vm0 }
 0x571   : > { %vm10215_vm9 = vmmov %vm10203_vm0 }
 0x572   : > { %2991 = vmax.xlane.f32.xlu1 %v8614_v14  ;;  %3009 = vmax.xlane.f32.xlu0 %v8618_v21  ;;  %vm10216_vm10 = vmmov %vm10203_vm0 }
 0x573   : > { %vm10226_vm11 = vmmov %vm10203_vm0 }
 0x574   : > { %vm10229_vm12 = vmmov %vm10203_vm0 }
 0x575   : > { %vm10230_vm13 = vmmov %vm10203_vm0 }
 0x576   : > { %2995 = vmax.xlane.f32.xlu1 %v8624_v38  ;;  %vm10233_vm14 = vmmov %vm10203_vm0 }
 0x577   : > { %vm10235_vm15 = vmmov %vm10203_vm0 }
 0x57a   : > { %2999 = vmax.xlane.f32.xlu1 %v8629_v36 }
 0x57e   : > { %3003 = vmax.xlane.f32.xlu1 %v8634_v32  ;;  %v6110_v32 = vunpack.i.l.bf16 %v8355_v62 }
 0x582   : > { %3007 = vmax.xlane.f32.xlu1 %v8639_v57 }
 0x599   : > { %v2081_v44 = vpop.xlane.xlu0 %2080 }
 0x59a   : > { %v2111_v0 = vsub.f32 %v8406_v49, %v2081_v44  ;;  %v2079_v28 = vpop.xlane.xlu1 %2078 }
 0x59b   : > { %v2110_v25 = vsub.f32 %v8410_v48, %v2079_v28 }
 0x59c   : > { %v2128_v55 = vmul.f32 1.442695, %v2111_v0 }
 0x59d   : > { %v2126_v26 = vmul.f32 1.442695, %v2110_v25  ;;  %v2085_v37 = vpop.xlane.xlu0 %2084 }
 0x59e   : > { %6309 = vpow2.f32 %v2128_v55  ;;  %v2113_v47 = vsub.f32 %v8438_v41, %v2085_v37  ;;  %v2083_v22 = vpop.xlane.xlu1 %2082 }
 0x59f   : > { %6311 = vpow2.f32 %v2126_v26  ;;  %v2112_v8 = vsub.f32 %v8442_v5, %v2083_v22 }
 0x5a0   : > { %v2132_v9 = vmul.f32 1.442695, %v2113_v47 }
 0x5a1   : > { %v2130_v33 = vmul.f32 1.442695, %v2112_v8 }
 0x5a2   : > { %6313 = vpow2.f32 %v2132_v9  ;;  %v2089_v40 = vpop.xlane.xlu1 %2088  ;;  %v2087_v39 = vpop.xlane.xlu0 %2086 }
 0x5a3   : > { %v2115_v49 = vsub.f32 %v8450_v58, %v2089_v40  ;;  %v2114_v51 = vsub.f32 %v8464_v27, %v2087_v39  ;;  %6315 = vpow2.f32 %v2130_v33 }
 0x5a5   : > { %v2134_v48 = vmul.f32 1.442695, %v2114_v51  ;;  %v2136_v0 = vmul.f32 1.442695, %v2115_v49 }
 0x5a6   : > { %v2093_v6 = vpop.xlane.xlu1 %2092  ;;  %v2091_v44 = vpop.xlane.xlu0 %2090 }
 0x5a7   : > { %v2117_v41 = vsub.f32 %v8470_v30, %v2093_v6  ;;  %6317 = vpow2.f32 %v2134_v48  ;;  %v2116_v27 = vsub.f32 %v8479_v50, %v2091_v44 }
 0x5a8   : > { %v8649_v28 = vpop.eup %6309  ;;  %6319 = vpow2.f32 %v2136_v0 }
 0x5a9   : > { %v8651_v5 = vpop.eup %6311  ;;  %2160 = vadd.xlane.f32.xlu0 %v8649_v28  ;;  %v2140_v58 = vmul.f32 1.442695, %v2117_v41  ;;  %v2138_v8 = vmul.f32 1.442695, %v2116_v27 }
 0x5aa   : > { %v2097_v25 = vpop.xlane.xlu1 %2096  ;;  %v2095_v55 = vpop.xlane.xlu0 %2094  ;;  %2158 = vadd.xlane.f32.xlu1 %v8651_v5 }
 0x5ab   : > { %v2118_v26 = vsub.f32 %v8494_v12, %v2095_v55  ;;  %v2119_v47 = vsub.f32 %v8490_v23, %v2097_v25  ;;  %6321 = vpow2.f32 %v2140_v58 }
 0x5ac   : > { %v8657_v37 = vpop.eup %6313 }
 0x5ad   : > { %v2142_v30 = vmul.f32 1.442695, %v2118_v26  ;;  %v8661_v9 = vpop.eup %6315  ;;  %v2144_v39 = vmul.f32 1.442695, %v2119_v47 }
 0x5ae   : > { %v2101_v22 = vpop.xlane.xlu1 %2100  ;;  %2164 = vadd.xlane.f32.xlu1 %v8657_v37  ;;  %v2099_v33 = vpop.xlane.xlu0 %2098 }
 0x5af   : > { %6323 = vpow2.f32 %v2142_v30  ;;  %v2121_v12 = vsub.f32 %v8510_v10, %v2101_v22  ;;  %v2120_v6 = vsub.f32 %v8514_v3, %v2099_v33  ;;  %v2415_v22 = vld [vmem:[%s9938_s2 + $0x8] sm:$0xff] }
 0x5b0   : > { %6325 = vpow2.f32 %v2138_v8 }
 0x5b1   : > { %v8663_v40 = vpop.eup %6317  ;;  %6327 = vpow2.f32 %v2144_v39  ;;  %v2148_v48 = vmul.f32 1.442695, %v2121_v12  ;;  %v2146_v10 = vmul.f32 1.442695, %v2120_v6  ;;  %v8728_v6 = vld [vmem:[%s9937_s1 + $0x38] sm:$0xff] }
 0x5b2   : > { %v2105_v50 = vpop.xlane.xlu1 %2104  ;;  %2162 = vadd.xlane.f32.xlu1 %v8661_v9  ;;  %2166 = vadd.xlane.f32.xlu0 %v8663_v40  ;;  %v8669_v49 = vpop.eup %6319 }
 0x5b3   : > { %v2123_v23 = vsub.f32 %v8530_v56, %v2105_v50  ;;  %v2103_v44 = vpop.xlane.xlu0 %2102 }
 0x5b4   : > { %v2122_v56 = vsub.f32 %v8534_v46, %v2103_v44  ;;  %v8746_v44 = vld [vmem:[%s9937_s1 + $0x58] sm:$0xff] }
 0x5b5   : > { %v2152_v51 = vmul.f32 1.442695, %v2123_v23  ;;  %v8673_v0 = vpop.eup %6321 }
 0x5b6   : > { %2168 = vadd.xlane.f32.xlu1 %v8669_v49  ;;  %v2109_v25 = vpop.xlane.xlu1 %2108  ;;  %v2150_v3 = vmul.f32 1.442695, %v2122_v56  ;;  %v8774_v56 = vld [vmem:[%s9937_s1 + $0x78] sm:$0xff] }
 0x5b7   : > { %6329 = vpow2.f32 %v2152_v51  ;;  %v2125_v58 = vsub.f32 %v8550_v18, %v2109_v25  ;;  %v2107_v26 = vpop.xlane.xlu0 %2106  ;;  %v2416_v18 = vld [vmem:[%s9938_s2 + $0x18] sm:$0xff]  ;;  %v6641_v51 = vld [vmem:[%s9937_s1 + $0x8] sm:$0xff]  ;;  %10193 = vst [vmem:[#allocation54_spill] sm:$0xff] %v8774_v56 }
 0x5b8   : > { %6331 = vpow2.f32 %v2148_v48  ;;  %v2124_v47 = vsub.f32 %v8554_v35, %v2107_v26  ;;  %v8697_v8 = vpack.c.bf16 %v2416_v18, %v2415_v22  ;;  %v6642_v48 = vld [vmem:[%s9937_s1 + $0x18] sm:$0xff]  ;;  %v8781_v25 = vld [vmem:[%s9937_s1 + $0xa8] sm:$0xff]  ;;  %v3863_v54 = vmul.f32 %v6641_v51, %v7980_v4 }
 0x5b9   : > { %v8675_v41 = vpop.eup %6323  ;;  %6333 = vpow2.f32 %v2146_v10  ;;  %v2156_v46 = vmul.f32 1.442695, %v2125_v58  ;;  %v8767_v10 = vld [vmem:[%s9937_s1 + $0x88] sm:$0xff]  ;;  %10194 = vst [vmem:[#allocation16_spill] sm:$0xff] %v8781_v25  ;;  %v8820_v18 = vld [vmem:[%s9937_s1 + $0xd8] sm:$0xff] }
 0x5ba   : > { %2172 = vadd.xlane.f32.xlu1 %v8673_v0  ;;  %2174 = vadd.xlane.f32.xlu0 %v8675_v41  ;;  %v8680_v55 = vpop.eup %6325  ;;  %6335 = vpow2.f32 %v2150_v3  ;;  %v2154_v33 = vmul.f32 1.442695, %v2124_v47  ;;  %10192 = vst [vmem:[#allocation55_spill] sm:$0xff] %v8767_v10  ;;  %v8788_v3 = vld [vmem:[%s9937_s1 + $0x98] sm:$0xff]  ;;  %v8792_v58 = vpop.permute.xlu1 %6138  ;;  %v8797_v26 = vld [vmem:[%s9937_s1 + $0xc8] sm:$0xff]  ;;  %10200 = vst [vmem:[#allocation5_spill] sm:$0xff] %v8820_v18 }
 0x5bb   : > { %v8684_v27 = vpop.eup %6327  ;;  %5851 = vmatprep.subr.bf16.mxu0 %v8697_v8  ;;  %6337 = vpow2.f32 %v2156_v46  ;;  %10195 = vst [vmem:[#allocation24_spill] sm:$0xff] %v8788_v3  ;;  %10196 = vst [vmem:[#allocation25_spill] sm:$0xff] %v8792_v58  ;;  %v8804_v46 = vld [vmem:[%s9937_s1 + $0xb8] sm:$0xff]  ;;  %v8813_v22 = vld [vmem:[%s9937_s1 + $0xe8] sm:$0xff] }
 0x5bc   : > { %6339 = vpow2.f32 %v2154_v33  ;;  %10197 = vst [vmem:[#allocation21_spill] sm:$0xff] %v8797_v26  ;;  %10198 = vst [vmem:[#allocation6_spill] sm:$0xff] %v8804_v46 }
 0x5bd   : > { %10199 = vst [vmem:[#allocation23_spill] sm:$0xff] %v8813_v22 }
 0x5be   : > { %2170 = vadd.xlane.f32.xlu1 %v8680_v55 }
 0x5c1   : > { %v8686_v30 = vpop.eup %6329 }
 0x5c2   : > { %2176 = vadd.xlane.f32.xlu1 %v8684_v27  ;;  %2184 = vadd.xlane.f32.xlu0 %v8686_v30  ;;  %v8699_v39 = vpop.eup %6331 }
 0x5c3   : > { %v8703_v50 = vpop.eup %6333 }
 0x5c4   : > { %v8706_v35 = vpop.eup %6335 }
 0x5c5   : > { %v8709_v12 = vpop.eup %6337 }
 0x5c6   : > { %2180 = vadd.xlane.f32.xlu1 %v8699_v39  ;;  %v8712_v23 = vpop.eup %6339 }
 0x5ca   : > { %2178 = vadd.xlane.f32.xlu1 %v8703_v50 }
 0x5ce   : > { %2182 = vadd.xlane.f32.xlu1 %v8706_v35 }
 0x5d2   : > { %2188 = vadd.xlane.f32.xlu1 %v8709_v12 }
 0x5d6   : > { %2186 = vadd.xlane.f32.xlu1 %v8712_v23 }
 0x5d8   : > { %6148 = vrot.lane.b32.xlu0 %v8090_v16, %s6701_s18  ;;  %v8737_v16 = vld [vmem:[%s9937_s1 + $0x48] sm:$0xff] }
 0x5dc   : > { %4215 = vrot.lane.b32.xlu0 %v6641_v51, %s6707_s20 }
 0x5e0   : > { %4217 = vrot.lane.b32.xlu0 %v6642_v48, %s6707_s20 }
 0x5e4   : > { %4221 = vrot.lane.b32.xlu0 %v8728_v6, %s6707_s20 }
 0x5e7   : > { %6143 = vrot.lane.b32.xlu1 %v8086_v20, %s6701_s18  ;;  %v8753_v20 = vld [vmem:[%s9937_s1 + $0x28] sm:$0xff] }
 0x5e8   : > { %4223 = vrot.lane.b32.xlu0 %v8737_v16, %s6707_s20 }
 0x5eb   : > { %6153 = vrot.lane.b32.xlu1 %v8102_v63, %s6701_s18  ;;  %v8760_v63 = vld [vmem:[%s9937_s1 + $0x68] sm:$0xff]  ;;  %v8808_v47 = vpop.xlane.xlu1 %2981 }
 0x5ec   : > { %4225 = vrot.lane.b32.xlu0 %v8746_v44, %s6707_s20  ;;  %10191 = vst [vmem:[#allocation14_spill] sm:$0xff] %v8760_v63 }
 0x5ef   : > { %4219 = vrot.lane.b32.xlu1 %v8753_v20, %s6707_s20  ;;  %v8824_v33 = vpop.xlane.xlu1 %2979 }
 0x5f0   : > { %4227 = vrot.lane.b32.xlu0 %v8760_v63, %s6707_s20  ;;  %v3879_v63 = vsel %vm10204_vm1, %v3863_v54, 0.0  ;;  %v6659_v54 = vld [vmem:[%s9937_s1 + $0x30] sm:$0xff] }
 0x5f3   : > { %4231 = vrot.lane.b32.xlu1 %v8767_v10, %s6707_s20  ;;  %v8845_v10 = vpop.permute.xlu0 %6133 }
 0x5f4   : > { %4229 = vrot.lane.b32.xlu0 %v8774_v56, %s6707_s20  ;;  %10202 = vst [vmem:[#allocation22_spill] sm:$0xff] %v8845_v10 }
 0x5f7   : > { %4235 = vrot.lane.b32.xlu1 %v8781_v25, %s6707_s20  ;;  %v8841_v25 = vpop.xlane.xlu1 %2985 }
 0x5f8   : > { %4233 = vrot.lane.b32.xlu0 %v8788_v3, %s6707_s20 }
 0x5fb   : > { %4239 = vrot.lane.b32.xlu1 %v8797_v26, %s6707_s20  ;;  %v6656_v26 = vld [vmem:[%s9937_s1] sm:$0xff] }
 0x5fc   : > { %4237 = vrot.lane.b32.xlu0 %v8804_v46, %s6707_s20  ;;  %v8843_v46 = vpop.xlane.xlu1 %2983 }
 0x5ff   : > { %4243 = vrot.lane.b32.xlu1 %v8813_v22, %s6707_s20  ;;  %v8833_v22 = vld [vmem:[%s9937_s1 + $0xf8] sm:$0xff] }
 0x600   : > { %4241 = vrot.lane.b32.xlu0 %v8820_v18, %s6707_s20  ;;  %10201 = vst [vmem:[#allocation20_spill] sm:$0xff] %v8833_v22  ;;  %v6658_v18 = vld [vmem:[%s9937_s1 + $0x10] sm:$0xff]  ;;  %v8849_v29 = vpop.xlane.xlu1 %2987 }
 0x603   : > { %3591 = vrot.lane.b32.xlu1 %v6656_v26, %s6711_s14  ;;  %v8847_v26 = vpop.xlane.xlu0 %2989 }
 0x604   : > { %4245 = vrot.lane.b32.xlu0 %v8833_v22, %s6707_s20  ;;  %v8853_v34 = vpop.xlane.xlu1 %2991 }
 0x607   : > { %v8851_v58 = vpop.xlane.xlu0 %2993 }
 0x608   : > { %3593 = vrot.lane.b32.xlu0 %v6658_v18, %s6711_s14  ;;  %v8857_v3 = vpop.xlane.xlu1 %2995  ;;  %v3864_v18 = vmul.f32 %v6642_v48, %v7985_v31 }
 0x60a   : > { %v3882_v10 = vsel %vm10203_vm0, %v3864_v18, 0.0  ;;  %vm10240_vm0 = vmmov %vm10238_vm2 }
 0x60b   : > { %v8855_v22 = vpop.xlane.xlu0 %2997 }
 0x60c   : > { %v8865_v61 = vpop.xlane.xlu1 %2999 }
 0x60d   : > { %10205 = vst [vmem:[#allocation30_spill] sm:$0xff] %v8865_v61 }
 0x60f   : > { %v8861_v11 = vpop.xlane.xlu0 %3001 }
 0x610   : > { %v8869_v2 = vpop.xlane.xlu1 %3003 }
 0x611   : > { %10206 = vst [vmem:[#allocation31_spill] sm:$0xff] %v8869_v2 }
 0x613   : > { %v8867_v56 = vpop.xlane.xlu0 %3005 }
 0x614   : > { %v8873_v21 = vpop.xlane.xlu1 %3007 }
 0x615   : > { %10208 = vst [vmem:[#allocation7_spill] sm:$0xff] %v8873_v21 }
 0x617   : > { %v8871_v57 = vpop.xlane.xlu0 %3009 }
 0x618   : > { %10207 = vst [vmem:[#allocation27_spill] sm:$0xff] %v8871_v57  ;;  %v6111_v57 = vunpack.i.h.bf16 %v8355_v62 }
 0x627   : > { %3883 = vadd.xlane.f32.xlu0 %v3882_v10  ;;  %3880 = vadd.xlane.f32.xlu1 %v3879_v63  ;;  %v6660_v63 = vld [vmem:[%s9937_s1 + $0x20] sm:$0xff] }
 0x636   : > { %v2161_v48 = vpop.xlane.xlu0 %2160 }
 0x637   : > { %6341 = vrcp.f32 %v2161_v48  ;;  %v2159_v51 = vpop.xlane.xlu1 %2158 }
 0x638   : > { %6343 = vrcp.f32 %v2159_v51  ;;  %3597 = vrot.lane.b32.xlu1 %v6659_v54, %s6711_s14 }
 0x63b   : > { %v2165_v10 = vpop.xlane.xlu1 %2164 }
 0x63c   : > { %6345 = vrcp.f32 %v2165_v10 }
 0x63d   : > { %3595 = vrot.lane.b32.xlu0 %v6660_v63, %s6711_s14  ;;  %v8887_v63 = vpack.c.bf16 %v6111_v57, %v6110_v32 }
 0x63f   : > { %v2163_v18 = vpop.xlane.xlu1 %2162  ;;  %v2167_v21 = vpop.xlane.xlu0 %2166 }
 0x640   : > { %6347 = vrcp.f32 %v2163_v18 }
 0x641   : > { %v6342_v48 = vpop.eup %6341  ;;  %6349 = vrcp.f32 %v2167_v21 }
 0x642   : > { %v6344_v51 = vpop.eup %6343  ;;  %v2207_v36 = vmul.f32 %v6342_v48, %v8649_v28 }
 0x643   : > { %v2169_v2 = vpop.xlane.xlu1 %2168  ;;  %v2206_v54 = vmul.f32 %v6344_v51, %v8651_v5 }
 0x644   : > { %6351 = vrcp.f32 %v2169_v2 }
 0x645   : > { %5535 = vmatprep.mubr.f32.mxu0 %v2206_v54 }
 0x646   : > { %5536 = vmatmul.mubr.f32.vlgmr.msra.gmra.mrb[16].mxu0 %v2207_v36  ;;  %v6346_v18 = vpop.eup %6345 }
 0x647   : > { %5853 = vmatpush3.bf16.msra.mxu0 %v8697_v8  ;;  %v2173_v10 = vpop.xlane.xlu1 %2172  ;;  %v2175_v21 = vpop.xlane.xlu0 %2174  ;;  %v2209_v28 = vmul.f32 %v6346_v18, %v8657_v37 }
 0x648   : > { %5903 = vmatprep.subr.bf16.mxu0 %v8887_v63  ;;  %6353 = vrcp.f32 %v2173_v10 }
 0x649   : > { %6355 = vrcp.f32 %v2175_v21 }
 0x64a   : > { %v6348_v61 = vpop.eup %6347 }
 0x64b   : > { %v6350_v62 = vpop.eup %6349  ;;  %v2171_v38 = vpop.xlane.xlu1 %2170  ;;  %v2208_v2 = vmul.f32 %v6348_v61, %v8661_v9 }
 0x64c   : > { %6357 = vrcp.f32 %v2171_v38  ;;  %v2210_v36 = vmul.f32 %v6350_v62, %v8663_v40 }
 0x64d   : > { %5538 = vmatprep.mubr.f32.mxu0 %v2208_v2 }
 0x64e   : > { %v6352_v32 = vpop.eup %6351  ;;  %5539 = vmatmul.mubr.f32.gmra.mrb[18].mxu0 %v2209_v28 }
 0x64f   : > { %v2177_v57 = vpop.xlane.xlu1 %2176  ;;  %5541 = vmatprep.mubr.f32.mxu0 %v2210_v36  ;;  %v2185_v5 = vpop.xlane.xlu0 %2184  ;;  %v2211_v8 = vmul.f32 %v6352_v32, %v8669_v49 }
 0x650   : > { %6359 = vrcp.f32 %v2177_v57 }
 0x652   : > { %5542 = vmatmul.mubr.f32.gmra.mrb[20].mxu0 %v2211_v8  ;;  %v6354_v54 = vpop.eup %6353 }
 0x653   : > { %v2181_v48 = vpop.xlane.xlu1 %2180  ;;  %v8895_v51 = vpop.permute.xlu0 %6148  ;;  %v2213_v21 = vmul.f32 %v6354_v54, %v8673_v0 }
 0x654   : > { %v6356_v61 = vpop.eup %6355  ;;  %6361 = vrcp.f32 %v2181_v48 }
 0x655   : > { %v2214_v49 = vmul.f32 %v6356_v61, %v8675_v41  ;;  %v3865_v41 = vmul.f32 %v8753_v20, %v7990_v13 }
 0x656   : > { %v6358_v38 = vpop.eup %6357 }
 0x657   : > { %v2179_v37 = vpop.xlane.xlu1 %2178  ;;  %v4216_v9 = vpop.permute.xlu0 %4215  ;;  %v2212_v40 = vmul.f32 %v6358_v38, %v8680_v55  ;;  %v3866_v55 = vmul.f32 %v8728_v6, %v7995_v24  ;;  %v3885_v48 = vsel %vm10212_vm6, %v3865_v41, 0.0  ;;  %vm10248_vm6 = vmmov %vm10240_vm0 }
 0x658   : > { %6363 = vrcp.f32 %v2179_v37  ;;  %v4263_v10 = vmul.f32 %v4216_v9, %v7980_v4 }
 0x659   : > { %5544 = vmatprep.mubr.f32.mxu0 %v2212_v40  ;;  %6365 = vrcp.f32 %v2185_v5  ;;  %v3888_v5 = vsel %vm10211_vm5, %v3866_v55, 0.0  ;;  %vm10247_vm5 = vmmov %vm10240_vm0 }
 0x65a   : > { %v6360_v18 = vpop.eup %6359  ;;  %5545 = vmatmul.mubr.f32.gmra.mrb[22].mxu0 %v2213_v21  ;;  %v4279_v62 = vsel %vm10209_vm3, %v4263_v10, 0.0  ;;  %vm10243_vm3 = vmmov %vm10240_vm0 }
 0x65b   : > { %v2183_v2 = vpop.xlane.xlu1 %2182  ;;  %5547 = vmatprep.mubr.f32.mxu0 %v2214_v49  ;;  %v4218_v28 = vpop.permute.xlu0 %4217  ;;  %v2215_v36 = vmul.f32 %v6360_v18, %v8684_v27 }
 0x65c   : > { %6367 = vrcp.f32 %v2183_v2  ;;  %v4264_v32 = vmul.f32 %v4218_v28, %v7985_v31  ;;  %4280 = vadd.xlane.f32.xlu1 %v4279_v62  ;;  %v3015_v2 = vsub.f32 %v8604_v59, %v8849_v29  ;;  %v3013_v59 = vsub.f32 %v8594_v15, %v8843_v46 }
 0x65e   : > { %5548 = vmatmul.mubr.f32.gmra.mrb[24].mxu0 %v2215_v36  ;;  %v4282_v0 = vsel %vm10210_vm4, %v4264_v32, 0.0  ;;  %v6362_v8 = vpop.eup %6361  ;;  %v3014_v32 = vsub.f32 %v8584_v19, %v8841_v25  ;;  %v3022_v19 = vsub.f32 %v8598_v53, %v8861_v11  ;;  %v3867_v25 = vmul.f32 %v8737_v16, %v8000_v7  ;;  %vm10245_vm4 = vmmov %vm10240_vm0 }
 0x65f   : > { %v2189_v57 = vpop.xlane.xlu1 %2188  ;;  %4283 = vadd.xlane.f32.xlu0 %v4282_v0  ;;  %v2217_v61 = vmul.f32 %v6362_v8, %v8699_v39  ;;  %v6661_v39 = vld [vmem:[%s9937_s1 + $0x50] sm:$0xff]  ;;  %v4222_v28 = vpop.permute.xlu0 %4221  ;;  %v3020_v0 = vsub.f32 %v8588_v52, %v8855_v22  ;;  %v3024_v11 = vsub.f32 %v8608_v1, %v8867_v56  ;;  %v3017_v56 = vsub.f32 %v8614_v14, %v8853_v34  ;;  %v10218_v14 = vld [vmem:[#allocation30_spill] sm:$0xff] }
 0x660   : > { %3889 = vadd.xlane.f32.xlu1 %v3888_v5  ;;  %6369 = vrcp.f32 %v2189_v57  ;;  %v3033_v29 = vmul.f32 1.442695, %v3014_v32  ;;  %v3031_v57 = vmul.f32 1.442695, %v3013_v59  ;;  %v3049_v15 = vmul.f32 1.442695, %v3022_v19 }
 0x661   : > { %v3045_v41 = vmul.f32 1.442695, %v3020_v0  ;;  %v3891_v53 = vsel %vm10216_vm10, %v3867_v25, 0.0  ;;  %v3018_v5 = vsub.f32 %v8578_v45, %v8851_v58  ;;  %v6664_v19 = vld [vmem:[%s9937_s1 + $0x60] sm:$0xff]  ;;  %v10227_v25 = vld [vmem:[#allocation43_spill] sm:$0xff]  ;;  %vm10253_vm10 = vmmov %vm10240_vm0 }
 0x662   : > { %v6364_v27 = vpop.eup %6363 }
 0x663   : > { %v2187_v6 = vpop.xlane.xlu1 %2186  ;;  %3886 = vadd.xlane.f32.xlu0 %v3885_v48  ;;  %v2216_v54 = vmul.f32 %v6364_v27, %v8703_v50  ;;  %v6366_v38 = vpop.eup %6365  ;;  %v3041_v1 = vmul.f32 1.442695, %v3018_v5  ;;  %v3039_v27 = vmul.f32 1.442695, %v3017_v56  ;;  %v10217_v48 = vld [vmem:[#allocation51_spill] sm:$0xff] }
 0x664   : > { %6371 = vrcp.f32 %v2187_v6  ;;  %v2219_v9 = vmul.f32 %v6366_v38, %v8686_v30  ;;  %v6662_v30 = vld [vmem:[%s9937_s1 + $0x40] sm:$0xff]  ;;  %v3019_v6 = vsub.f32 %v10217_v48, %v8857_v3  ;;  %v10219_v38 = vld [vmem:[#allocation53_spill] sm:$0xff] }
 0x665   : > { %5550 = vmatprep.mubr.f32.mxu0 %v2216_v54 }
 0x666   : > { %v6368_v20 = vpop.eup %6367  ;;  %5551 = vmatmul.mubr.f32.gmra.mrb[26].mxu0 %v2217_v61  ;;  %v3043_v34 = vmul.f32 1.442695, %v3019_v6  ;;  %v10231_v6 = vld [vmem:[#allocation39_spill] sm:$0xff] }
 0x667   : > { %v2218_v37 = vmul.f32 %v6368_v20, %v8706_v35  ;;  %v8925_v50 = vpop.permute.xlu1 %6143  ;;  %v3021_v20 = vsub.f32 %v10219_v38, %v10218_v14 }
 0x669   : > { %5553 = vmatprep.mubr.f32.mxu0 %v2218_v37  ;;  %v3047_v3 = vmul.f32 1.442695, %v3021_v20 }
 0x66a   : > { %5554 = vmatmul.mubr.f32.gmra.mrb[28].mxu0 %v2219_v9  ;;  %v6370_v40 = vpop.eup %6369 }
 0x66b   : > { %v2221_v49 = vmul.f32 %v6370_v40, %v8709_v12  ;;  %v8927_v35 = vpop.permute.xlu1 %6153  ;;  %v3011_v12 = vsub.f32 %v8574_v60, %v8824_v33  ;;  %v3035_v60 = vmul.f32 1.442695, %v3015_v2  ;;  %v4266_v33 = vmul.f32 %v4222_v28, %v7995_v24  ;;  %v10220_v40 = vld [vmem:[#allocation31_spill] sm:$0xff]  ;;  %v10225_v28 = vld [vmem:[#allocation52_spill] sm:$0xff] }
 0x66c   : > { %v10224_v2 = vld [vmem:[#allocation7_spill] sm:$0xff] }
 0x66d   : > { %v3027_v62 = vmul.f32 1.442695, %v3011_v12  ;;  %v4288_v52 = vsel %vm10214_vm8, %v4266_v33, 0.0  ;;  %vm10251_vm8 = vmmov %vm10240_vm0 }
 0x66e   : > { %v6372_v10 = vpop.eup %6371 }
 0x66f   : > { %v2220_v21 = vmul.f32 %v6372_v10, %v8712_v23  ;;  %v3012_v23 = vsub.f32 %v8564_v17, %v8808_v47  ;;  %v4220_v18 = vpop.permute.xlu1 %4219  ;;  %6373 = vpow2.f32 %v3027_v62  ;;  %v3868_v47 = vmul.f32 %v8746_v44, %v8005_v42  ;;  %v10221_v10 = vld [vmem:[#allocation3_spill] sm:$0xff] }
 0x670   : > { %v4265_v36 = vmul.f32 %v4220_v18, %v7990_v13  ;;  %v3016_v44 = vsub.f32 %v8568_v43, %v8847_v26  ;;  %v3053_v43 = vmul.f32 1.442695, %v3024_v11 }
 0x671   : > { %5556 = vmatprep.mubr.f32.mxu0 %v2220_v21  ;;  %3601 = vrot.lane.b32.xlu1 %v6661_v39, %s6711_s14  ;;  %v3029_v55 = vmul.f32 1.442695, %v3012_v23  ;;  %v3894_v22 = vsel %vm10215_vm9, %v3868_v47, 0.0  ;;  %v3023_v21 = vsub.f32 %v10221_v10, %v10220_v40  ;;  %v10222_v39 = vld [vmem:[#allocation27_spill] sm:$0xff]  ;;  %vm10252_vm9 = vmmov %vm10240_vm0 }
 0x672   : > { %5557 = vmatmul.mubr.f32.gmra.mrb[30].mxu0 %v2221_v49  ;;  %v4285_v17 = vsel %vm10213_vm7, %v4265_v36, 0.0  ;;  %v3037_v16 = vmul.f32 1.442695, %v3016_v44  ;;  %v3025_v36 = vsub.f32 %v10225_v28, %v10224_v2  ;;  %v6666_v28 = vld [vmem:[%s9937_s1 + $0x80] sm:$0xff]  ;;  %vm10249_vm7 = vmmov %vm10240_vm0 }
 0x673   : > { %6375 = vpow2.f32 %v3029_v55  ;;  %v3051_v23 = vmul.f32 1.442695, %v3023_v21 }
 0x674   : > { %6377 = vpow2.f32 %v3035_v60  ;;  %v3055_v32 = vmul.f32 1.442695, %v3025_v36  ;;  %v6663_v60 = vld [vmem:[%s9937_s1 + $0x70] sm:$0xff] }
 0x675   : > { %6379 = vpow2.f32 %v3033_v29  ;;  %v4224_v29 = vpop.permute.xlu0 %4223  ;;  %v10234_v36 = vld [vmem:[#allocation12_spill] sm:$0xff] }
 0x676   : > { %6381 = vpow2.f32 %v3045_v41  ;;  %v4267_v59 = vmul.f32 %v4224_v29, %v8000_v7 }
 0x677   : > { %6383 = vpow2.f32 %v3031_v57 }
 0x678   : > { %6385 = vpow2.f32 %v3049_v15 }
 0x679   : > { %3599 = vrot.lane.b32.xlu0 %v6662_v30, %s6711_s14  ;;  %v8957_v46 = vpop.eup %6373  ;;  %6387 = vpow2.f32 %v3037_v16  ;;  %v10223_v30 = vld [vmem:[#allocation18_spill] sm:$0xff]  ;;  %v4226_v41 = vpop.permute.xlu0 %4225 }
 0x67a   : > { %6389 = vpow2.f32 %v3053_v43  ;;  %v3026_v12 = vsub.f32 %v10223_v30, %v10222_v39  ;;  %v9036_v16 = vpop.permute.xlu1 %4231  ;;  %v6665_v43 = vld [vmem:[%s9937_s1 + $0x90] sm:$0xff] }
 0x67b   : > { %6391 = vpow2.f32 %v3041_v1  ;;  %v4268_v1 = vmul.f32 %v4226_v41, %v8005_v42 }
 0x67c   : > { %6393 = vpow2.f32 %v3039_v27  ;;  %v3057_v62 = vmul.f32 1.442695, %v3026_v12 }
 0x67d   : > { %v8962_v26 = vpop.eup %6375  ;;  %6395 = vpow2.f32 %v3043_v34  ;;  %v4228_v57 = vpop.permute.xlu0 %4227  ;;  %v4294_v48 = vsel %vm10230_vm13, %v4268_v1, 0.0  ;;  %v10232_v34 = vld [vmem:[#allocation14_spill] sm:$0xff]  ;;  %vm10258_vm13 = vmmov %vm10240_vm0 }
 0x67e   : > { %v8964_v8 = vpop.eup %6377  ;;  %6397 = vpow2.f32 %v3047_v3  ;;  %v9045_v56 = vpop.permute.xlu1 %4235  ;;  %v3869_v14 = vmul.f32 %v10232_v34, %v10231_v6 }
 0x67f   : > { %v8970_v45 = vpop.eup %6379  ;;  %6399 = vpow2.f32 %v3051_v23 }
 0x680   : > { %v8972_v58 = vpop.eup %6381  ;;  %6401 = vpow2.f32 %v3057_v62  ;;  %v3897_v20 = vsel %vm10233_vm14, %v3869_v14, 0.0  ;;  %v4269_v62 = vmul.f32 %v4228_v57, %v10231_v6  ;;  %v10241_v14 = vld [vmem:[#allocation22_spill] sm:$0xff]  ;;  %vm10259_vm14 = vmmov %vm10240_vm0 }
 0x681   : > { %v8978_v54 = vpop.eup %6383  ;;  %6403 = vpow2.f32 %v3055_v32  ;;  %v9032_v11 = vpop.permute.xlu0 %4229  ;;  %v6116_v32 = vunpack.i.h.bf16 %v10234_v36 }
 0x682   : > { %v8980_v61 = vpop.eup %6385  ;;  %v9052_v38 = vpop.permute.xlu1 %4239 }
 0x683   : > { %v8986_v37 = vpop.eup %6387 }
 0x684   : > { %v8988_v9 = vpop.eup %6389 }
 0x685   : > { %v8994_v49 = vpop.eup %6391 }
 0x686   : > { %v8999_v18 = vpop.eup %6393  ;;  %v9057_v40 = vpop.permute.xlu1 %4243 }
 0x687   : > { %v9004_v55 = vpop.eup %6395 }
 0x688   : > { %v9007_v0 = vpop.eup %6397 }
 0x689   : > { %v9014_v33 = vpop.eup %6399 }
 0x68a   : > { %v9063_v39 = vpop.permute.xlu1 %3591 }
 0x695   : > { %4286 = vadd.xlane.f32.xlu1 %v4285_v17  ;;  %v9017_v17 = vpop.eup %6401 }
 0x696   : > { %v9020_v47 = vpop.eup %6403 }
 0x698   : > { %4289 = vadd.xlane.f32.xlu0 %v4288_v52  ;;  %v4291_v52 = vsel %vm10226_vm11, %v4267_v59, 0.0  ;;  %vm10254_vm11 = vmmov %vm10204_vm1 }
 0x699   : > { %3895 = vadd.xlane.f32.xlu1 %v3894_v22  ;;  %v10228_v22 = vld [vmem:[#allocation54_spill] sm:$0xff] }
 0x69a   : > { %v3870_v44 = vmul.f32 %v10228_v22, %v10227_v25  ;;  %v10237_v22 = vld [vmem:[#allocation24_spill] sm:$0xff] }
 0x69c   : > { %3892 = vadd.xlane.f32.xlu0 %v3891_v53  ;;  %v3900_v15 = vsel %vm10229_vm12, %v3870_v44, 0.0  ;;  %v9034_v53 = vpop.permute.xlu0 %4233  ;;  %vm10257_vm12 = vmmov %vm10204_vm1 }
 0x69d   : > { %3059 = vadd.xlane.f32.xlu1 %v8957_v46 }
 0x6a0   : > { %3061 = vadd.xlane.f32.xlu0 %v8962_v26  ;;  %v9038_v5 = vpop.permute.xlu0 %4237 }
 0x6a1   : > { %3067 = vadd.xlane.f32.xlu1 %v8964_v8 }
 0x6a4   : > { %3065 = vadd.xlane.f32.xlu0 %v8970_v45  ;;  %v9047_v27 = vpop.permute.xlu0 %4241 }
 0x6a5   : > { %3077 = vadd.xlane.f32.xlu1 %v8972_v58 }
 0x6a8   : > { %3063 = vadd.xlane.f32.xlu0 %v8978_v54  ;;  %v9055_v3 = vpop.permute.xlu0 %4245 }
 0x6a9   : > { %3081 = vadd.xlane.f32.xlu1 %v8980_v61 }
 0x6ac   : > { %3069 = vadd.xlane.f32.xlu0 %v8986_v37  ;;  %v9059_v10 = vpop.permute.xlu0 %3593 }
 0x6ad   : > { %3085 = vadd.xlane.f32.xlu1 %v8988_v9 }
 0x6b0   : > { %3073 = vadd.xlane.f32.xlu0 %v8994_v49 }
 0x6b4   : > { %3071 = vadd.xlane.f32.xlu0 %v8999_v18  ;;  %v9061_v21 = vpop.xlane.xlu0 %3883  ;;  %v9065_v30 = vpop.xlane.xlu1 %3880 }
 0x6b8   : > { %3075 = vadd.xlane.f32.xlu0 %v9004_v55  ;;  %v9067_v12 = vpop.permute.xlu0 %3595  ;;  %v9072_v2 = vpop.permute.xlu1 %3597 }
 0x6bc   : > { %3079 = vadd.xlane.f32.xlu0 %v9007_v0 }
 0x6be   : > { %3605 = vrot.lane.b32.xlu1 %v6663_v60, %s6711_s14  ;;  %v6115_v60 = vunpack.i.l.bf16 %v10234_v36 }
 0x6c0   : > { %3083 = vadd.xlane.f32.xlu0 %v9014_v33 }
 0x6c4   : > { %3089 = vadd.xlane.f32.xlu0 %v9017_v17 }
 0x6c8   : > { %3087 = vadd.xlane.f32.xlu0 %v9020_v47 }
 0x6de   : > { %3603 = vrot.lane.b32.xlu0 %v6664_v19, %s6711_s14  ;;  %v4297_v19 = vsel %vm10235_vm15, %v4269_v62, 0.0  ;;  %v6135_v62 = vunpack.i.l.bf16 %v10241_v14  ;;  %vm10260_vm15 = vmmov %vm10240_vm0 }
 0x6e2   : > { %4292 = vadd.xlane.f32.xlu1 %v4291_v52  ;;  %v10236_v52 = vld [vmem:[#allocation38_spill] sm:$0xff] }
 0x6e3   : > { %v3872_v44 = vmul.f32 %v10237_v22, %v10236_v52 }
 0x6e5   : > { %v3906_v34 = vsel %vm10204_vm1, %v3872_v44, 0.0  ;;  %vm10262_vm1 = vmmov %vm10240_vm0 }
 0x6e6   : > { %3901 = vadd.xlane.f32.xlu1 %v3900_v15  ;;  %v10239_v15 = vld [vmem:[#allocation17_spill] sm:$0xff] }
 0x6e7   : > { %v6120_v1 = vunpack.i.l.bf16 %v10239_v15 }
 0x6e9   : > { %v9080_v59 = vpop.xlane.xlu1 %4280 }
 0x6ec   : > { %v9069_v23 = vpop.xlane.xlu0 %4283 }
 0x6f0   : > { %v9085_v57 = vpop.xlane.xlu0 %3886 }
 0x6f7   : > { %3609 = vrot.lane.b32.xlu1 %v6665_v43, %s6711_s14  ;;  %v6121_v43 = vunpack.i.h.bf16 %v10239_v15 }
 0x6f9   : > { %v5910_v36 = vpack.c.bf16 %v6121_v43, %v6120_v1 }
 0x6fd   : > { %4295 = vadd.xlane.f32.xlu0 %v4294_v48  ;;  %v5906_v48 = vpack.c.bf16 %v6116_v32, %v6115_v60 }
 0x701   : > { %3898 = vadd.xlane.f32.xlu0 %v3897_v20  ;;  %v6136_v20 = vunpack.i.h.bf16 %v10241_v14 }
 0x703   : > { %v5914_v22 = vpack.c.bf16 %v6136_v20, %v6135_v62  ;;  %v6151_v62 = vunpack.i.h.bf16 %v8895_v51 }
 0x717   : > { %3607 = vrot.lane.b32.xlu0 %v6666_v28, %s6711_s14  ;;  %v9095_v28 = vpop.xlane.xlu1 %3889 }
 0x718   : > { %10242 = vst [vmem:[#allocation29_spill] sm:$0xff] %v9095_v28 }
 0x719   : > { %v5537_v29 = vpop.f32.mrb[16].mxu0 }
 0x71a   : > { %v2336_v41 = vpop.f32.mrb[17].mxu0 }
 0x71b   : > { %5563 = vmatprep.mubr.msk.f32.mxu0 %vm10238_vm2, %v2336_v41  ;;  %4298 = vadd.xlane.f32.xlu1 %v4297_v19  ;;  %v9097_v41 = vpop.permute.xlu0 %3599  ;;  %v9105_v43 = vpop.permute.xlu1 %3601  ;;  %vm10261_vm2 = vmmov %vm10240_vm0 }
 0x71c   : > { %5564 = vmatmul.mubr.msk.f32.vlgmr.msra.gmra.mrb[32].mxu0 %vm10240_vm0, %v5537_v29 }
 0x71d   : > { %5905 = vmatpush3.bf16.msra.mxu0 %v8887_v63  ;;  %v10244_v63 = vld [vmem:[#allocation25_spill] sm:$0xff] }
 0x71e   : > { %5907 = vmatprep.subr.bf16.mxu0 %v5906_v48  ;;  %v6141_v32 = vunpack.i.h.bf16 %v10244_v63  ;;  %v6140_v60 = vunpack.i.l.bf16 %v10244_v63 }
 0x71f   : > { %3907 = vadd.xlane.f32.xlu1 %v3906_v34  ;;  %v6145_v34 = vunpack.i.l.bf16 %v8925_v50 }
 0x720   : > { %v5918_v14 = vpack.c.bf16 %v6141_v32, %v6140_v60  ;;  %v6155_v32 = vunpack.i.l.bf16 %v8927_v35 }
 0x721   : > { %5909 = vmatpush3.bf16.msra.mxu0 %v5906_v48  ;;  %v5540_v19 = vpop.f32.mrb[18].mxu0  ;;  %v6146_v48 = vunpack.i.h.bf16 %v8925_v50  ;;  %v6156_v50 = vunpack.i.h.bf16 %v8927_v35 }
 0x722   : > { %5911 = vmatprep.subr.bf16.mxu0 %v5910_v36  ;;  %v2346_v29 = vpop.f32.mrb[19].mxu0  ;;  %v9113_v20 = vpop.xlane.xlu1 %4286 }
 0x723   : > { %5566 = vmatprep.mubr.msk.f32.mxu0 %vm10243_vm3, %v2346_v29  ;;  %v5922_v29 = vpack.c.bf16 %v6146_v48, %v6145_v34  ;;  %v5930_v35 = vpack.c.bf16 %v6156_v50, %v6155_v32  ;;  %vm10263_vm3 = vmmov %vm10254_vm11 }
 0x724   : > { %5567 = vmatmul.mubr.msk.f32.gmra.mrb[34].mxu0 %vm10245_vm4, %v5540_v19  ;;  %vm10266_vm4 = vmmov %vm10263_vm3 }
 0x725   : > { %5913 = vmatpush3.bf16.msra.mxu0 %v5910_v36  ;;  %v5543_v44 = vpop.f32.mrb[20].mxu0  ;;  %v9103_v15 = vpop.xlane.xlu0 %4289  ;;  %v6150_v36 = vunpack.i.l.bf16 %v8895_v51  ;;  %v6667_v51 = vld [vmem:[%s9937_s1 + $0xb0] sm:$0xff] }
 0x726   : > { %10246 = vst [vmem:[#allocation8_spill] sm:$0xff] %v9103_v15  ;;  %5915 = vmatprep.subr.bf16.mxu0 %v5914_v22  ;;  %v2356_v1 = vpop.f32.mrb[21].mxu0  ;;  %v9120_v60 = vpop.xlane.xlu1 %3895 }
 0x727   : > { %5569 = vmatprep.mubr.msk.f32.mxu0 %vm10247_vm5, %v2356_v1  ;;  %10250 = vst [vmem:[#allocation26_spill] sm:$0xff] %v9120_v60  ;;  %v10255_v60 = vld [vmem:[#allocation13_spill] sm:$0xff]  ;;  %vm10267_vm5 = vmmov %vm10263_vm3 }
 0x728   : > { %5570 = vmatmul.mubr.msk.f32.gmra.mrb[36].mxu0 %vm10248_vm6, %v5543_v44  ;;  %v4270_v44 = vmul.f32 %v9032_v11, %v10227_v25  ;;  %vm10270_vm6 = vmmov %vm10263_vm3 }
 0x729   : > { %5917 = vmatpush3.bf16.msra.mxu0 %v5914_v22  ;;  %v9111_v19 = vpop.xlane.xlu0 %3892  ;;  %v5926_v22 = vpack.c.bf16 %v6151_v62, %v6150_v36 }
 0x72a   : > { %5919 = vmatprep.subr.bf16.mxu0 %v5918_v14  ;;  %v3060_v11 = vpop.xlane.xlu1 %3059 }
 0x72b   : > { %6405 = vrcp.f32 %v3060_v11 }
 0x72d   : > { %5921 = vmatpush3.bf16.msra.mxu0 %v5918_v14  ;;  %v5546_v63 = vpop.f32.mrb[22].mxu0  ;;  %v3062_v1 = vpop.xlane.xlu0 %3061 }
 0x72e   : > { %5923 = vmatprep.subr.bf16.mxu0 %v5922_v29  ;;  %v2366_v15 = vpop.f32.mrb[23].mxu0  ;;  %6407 = vrcp.f32 %v3062_v1 }
 0x72f   : > { %5572 = vmatprep.mubr.msk.f32.mxu0 %vm10249_vm7, %v2366_v15  ;;  %vm10271_vm7 = vmmov %vm10263_vm3 }
 0x730   : > { %5573 = vmatmul.mubr.msk.f32.gmra.mrb[38].mxu0 %vm10251_vm8, %v5546_v63  ;;  %3613 = vrot.lane.b32.xlu1 %v6667_v51, %s6711_s14  ;;  %v4300_v63 = vsel %vm10254_vm11, %v4270_v44, 0.0  ;;  %v10256_v51 = vld [vmem:[#allocation55_spill] sm:$0xff]  ;;  %v3068_v44 = vpop.xlane.xlu1 %3067  ;;  %vm10274_vm8 = vmmov %vm10263_vm3 }
 0x731   : > { %5925 = vmatpush3.bf16.msra.mxu0 %v5922_v29  ;;  %v5549_v15 = vpop.f32.mrb[24].mxu0  ;;  %v3066_v48 = vpop.xlane.xlu0 %3065  ;;  %v3871_v62 = vmul.f32 %v10256_v51, %v10255_v60  ;;  %vm10279_vm11 = vmmov %vm10263_vm3 }
 0x732   : > { %5927 = vmatprep.subr.bf16.mxu0 %v5926_v22  ;;  %v2376_v34 = vpop.f32.mrb[25].mxu0 }
 0x733   : > { %5575 = vmatprep.mubr.msk.f32.mxu0 %vm10252_vm9, %v2376_v34  ;;  %v3903_v28 = vsel %vm10257_vm12, %v3871_v62, 0.0  ;;  %vm10275_vm9 = vmmov %vm10263_vm3 }
 0x734   : > { %5576 = vmatmul.mubr.msk.f32.gmra.mrb[40].mxu0 %vm10253_vm10, %v5549_v15  ;;  %v3078_v51 = vpop.xlane.xlu1 %3077  ;;  %vm10278_vm10 = vmmov %vm10263_vm3 }
 0x735   : > { %5929 = vmatpush3.bf16.msra.mxu0 %v5926_v22  ;;  %v3064_v14 = vpop.xlane.xlu0 %3063  ;;  %vm10282_vm12 = vmmov %vm10263_vm3 }
 0x736   : > { %5931 = vmatprep.subr.bf16.mxu0 %v5930_v35  ;;  %4301 = vadd.xlane.f32.xlu0 %v4300_v63  ;;  %6409 = vrcp.f32 %v3064_v14 }
 0x737   : > { %6411 = vrcp.f32 %v3066_v48 }
 0x738   : > { %6413 = vrcp.f32 %v3068_v44 }
 0x739   : > { %5933 = vmatpush3.bf16.msra.mxu0 %v5930_v35  ;;  %v5552_v36 = vpop.f32.mrb[26].mxu0  ;;  %v3070_v29 = vpop.xlane.xlu0 %3069 }
 0x73a   : > { %v2386_v34 = vpop.f32.mrb[27].mxu0  ;;  %3904 = vadd.xlane.f32.xlu0 %v3903_v28  ;;  %v6406_v35 = vpop.eup %6405  ;;  %6415 = vrcp.f32 %v3070_v29 }
 0x73b   : > { %5578 = vmatprep.mubr.msk.f32.mxu0 %vm10258_vm13, %v2386_v34  ;;  %v6408_v1 = vpop.eup %6407  ;;  %v3107_v14 = vmul.f32 %v6406_v35, %v8957_v46  ;;  %vm10283_vm13 = vmmov %vm10263_vm3 }
 0x73c   : > { %5579 = vmatmul.mubr.msk.f32.gmra.mrb[42].mxu0 %vm10259_vm14, %v5552_v36  ;;  %v3108_v36 = vmul.f32 %v6408_v1, %v8962_v26  ;;  %v6668_v26 = vld [vmem:[%s9937_s1 + $0xa0] sm:$0xff]  ;;  %vm10284_vm14 = vmmov %vm10263_vm3 }
 0x73d   : > { %v5555_v50 = vpop.f32.mrb[28].mxu0  ;;  %v3074_v32 = vpop.xlane.xlu0 %3073  ;;  %v10265_v1 = vld [vmem:[#allocation6_spill] sm:$0xff] }
 0x73e   : > { %v2396_v22 = vpop.f32.mrb[29].mxu0 }
 0x73f   : > { %5581 = vmatprep.mubr.msk.f32.mxu0 %vm10260_vm15, %v2396_v22  ;;  %v3082_v22 = vpop.xlane.xlu1 %3081  ;;  %vm10285_vm15 = vmmov %vm10263_vm3 }
 0x740   : > { %5582 = vmatmul.mubr.msk.f32.gmra.mrb[44].mxu0 %vm10261_vm2, %v5555_v50  ;;  %v6410_v11 = vpop.eup %6409  ;;  %vm10286_vm2 = vmmov %vm10263_vm3 }
 0x741   : > { %v3072_v15 = vpop.xlane.xlu0 %3071  ;;  %v6412_v29 = vpop.eup %6411  ;;  %v3109_v34 = vmul.f32 %v6410_v11, %v8978_v54 }
 0x742   : > { %6417 = vrcp.f32 %v3072_v15  ;;  %v6414_v50 = vpop.eup %6413  ;;  %v3110_v46 = vmul.f32 %v6412_v29, %v8970_v45 }
 0x743   : > { %6419 = vrcp.f32 %v3074_v32  ;;  %v4271_v32 = vmul.f32 %v9036_v16, %v10255_v60  ;;  %v3111_v35 = vmul.f32 %v6414_v50, %v8964_v8 }
 0x744   : > { %v6416_v15 = vpop.eup %6415 }
 0x745   : > { %v5558_v28 = vpop.f32.mrb[30].mxu0  ;;  %v3076_v63 = vpop.xlane.xlu0 %3075  ;;  %v3112_v45 = vmul.f32 %v6416_v15, %v8986_v37  ;;  %v4303_v16 = vsel %vm10263_vm3, %v4271_v32, 0.0 }
 0x746   : > { %v2406_v62 = vpop.f32.mrb[31].mxu0  ;;  %6421 = vrcp.f32 %v3076_v63  ;;  %v3086_v63 = vpop.xlane.xlu1 %3085 }
 0x747   : > { %5584 = vmatprep.mubr.msk.f32.mxu0 %vm10240_vm0, %v2406_v62  ;;  %6423 = vrcp.f32 %v3078_v51  ;;  %v10264_v62 = vld [vmem:[#allocation2_spill] sm:$0xff]  ;;  %vm10287_vm0 = vmmov %vm10286_vm2 }
 0x748   : > { %5585 = vmatmul.mubr.msk.f32.gmra.mrb[46].mxu0 %vm10262_vm1, %v5558_v28  ;;  %vm10288_vm1 = vmmov %vm10287_vm0 }
 0x749   : > { %5675 = vmatprep.mubr.f32.mxu0 %v3107_v14  ;;  %v3080_v48 = vpop.xlane.xlu0 %3079  ;;  %v3874_v14 = vmul.f32 %v10265_v1, %v10264_v62  ;;  %vm10291_vm3 = vmmov %vm10287_vm0 }
 0x74a   : > { %6425 = vrcp.f32 %v3080_v48 }
 0x74b   : > { %6427 = vrcp.f32 %v3082_v22  ;;  %v3912_v37 = vsel %vm10266_vm4, %v3874_v14, 0.0  ;;  %v3316_v14 = vld [vmem:[%s9938_s2 + $0x28] sm:$0xff]  ;;  %vm10292_vm4 = vmmov %vm10287_vm0 }
 0x74c   : > { %5676 = vmatmul.mubr.f32.vlgmr.msra.gmra.mrb[48].mxu0 %v3108_v36  ;;  %v6418_v28 = vpop.eup %6417 }
 0x74d   : > { %v3084_v44 = vpop.xlane.xlu0 %3083  ;;  %5678 = vmatprep.mubr.f32.mxu0 %v3109_v34  ;;  %v6420_v51 = vpop.eup %6419  ;;  %v3113_v8 = vmul.f32 %v6418_v28, %v8999_v18 }
 0x74e   : > { %6429 = vrcp.f32 %v3084_v44  ;;  %v3114_v36 = vmul.f32 %v6420_v51, %v8994_v49  ;;  %v10272_v51 = vld [vmem:[#allocation11_spill] sm:$0xff] }
 0x74f   : > { %6431 = vrcp.f32 %v3086_v63 }
 0x750   : > { %3611 = vrot.lane.b32.xlu0 %v6668_v26, %s6711_s14  ;;  %5679 = vmatmul.mubr.f32.gmra.mrb[50].mxu0 %v3110_v46  ;;  %v6422_v11 = vpop.eup %6421 }
 0x751   : > { %v3090_v54 = vpop.xlane.xlu0 %3089  ;;  %5681 = vmatprep.mubr.f32.mxu0 %v3111_v35  ;;  %v6424_v29 = vpop.eup %6423  ;;  %v3115_v34 = vmul.f32 %v6422_v11, %v9004_v55 }
 0x752   : > { %v3116_v18 = vmul.f32 %v6424_v29, %v8972_v58 }
 0x754   : > { %4304 = vadd.xlane.f32.xlu1 %v4303_v16  ;;  %5682 = vmatmul.mubr.f32.gmra.mrb[52].mxu0 %v3112_v45  ;;  %v6426_v50 = vpop.eup %6425  ;;  %v6670_v45 = vld [vmem:[%s9937_s1 + $0xc0] sm:$0xff]  ;;  %v10273_v16 = vld [vmem:[#allocation5_spill] sm:$0xff] }
 0x755   : > { %v3088_v48 = vpop.xlane.xlu0 %3087  ;;  %5684 = vmatprep.mubr.f32.mxu0 %v3113_v8  ;;  %v6428_v22 = vpop.eup %6427  ;;  %v3117_v44 = vmul.f32 %v6426_v50, %v9007_v0  ;;  %v4272_v0 = vmul.f32 %v9034_v53, %v10236_v52  ;;  %v3876_v8 = vmul.f32 %v10273_v16, %v10272_v51  ;;  %v10289_v16 = vld [vmem:[#allocation46_spill] sm:$0xff] }
 0x756   : > { %6433 = vrcp.f32 %v3088_v48  ;;  %v3118_v49 = vmul.f32 %v6428_v22, %v8980_v61  ;;  %v6669_v61 = vld [vmem:[%s9937_s1 + $0xd0] sm:$0xff]  ;;  %v3606_v22 = vpop.permute.xlu1 %3605 }
 0x757   : > { %6435 = vrcp.f32 %v3090_v54  ;;  %v10269_v54 = vld [vmem:[#allocation16_spill] sm:$0xff]  ;;  %v3918_v1 = vsel %vm10274_vm8, %v3876_v8, 0.0  ;;  %v10290_v8 = vld [vmem:[#allocation23_spill] sm:$0xff]  ;;  %vm10296_vm8 = vmmov %vm10287_vm0 }
 0x758   : > { %3913 = vadd.xlane.f32.xlu1 %v3912_v37  ;;  %5685 = vmatmul.mubr.f32.gmra.mrb[54].mxu0 %v3114_v36  ;;  %v6430_v46 = vpop.eup %6429  ;;  %v6671_v48 = vld [vmem:[%s9937_s1 + $0xf0] sm:$0xff]  ;;  %v4274_v36 = vmul.f32 %v9038_v5, %v10264_v62 }
 0x759   : > { %5687 = vmatprep.mubr.f32.mxu0 %v3115_v34  ;;  %v6432_v15 = vpop.eup %6431  ;;  %v3119_v32 = vmul.f32 %v6430_v46, %v9014_v33  ;;  %v4306_v33 = vsel %vm10267_vm5, %v4272_v0, 0.0  ;;  %v10276_v37 = vld [vmem:[#allocation40_spill] sm:$0xff]  ;;  %v10277_v34 = vld [vmem:[#allocation21_spill] sm:$0xff]  ;;  %v3642_v0 = vmul.f32 %v9072_v2, %v7995_v24  ;;  %v4276_v24 = vmul.f32 %v9047_v27, %v10272_v51  ;;  %vm10293_vm5 = vmmov %vm10287_vm0 }
 0x75a   : > { %v3120_v55 = vmul.f32 %v6432_v15, %v8988_v9  ;;  %v10268_v9 = vld [vmem:[#allocation41_spill] sm:$0xff]  ;;  %v4312_v29 = vsel %vm10275_vm9, %v4274_v36, 0.0  ;;  %v3875_v50 = vmul.f32 %v10277_v34, %v10276_v37  ;;  %v10280_v15 = vld [vmem:[#allocation42_spill] sm:$0xff]  ;;  %vm10297_vm9 = vmmov %vm10287_vm0 }
 0x75b   : > { %v3873_v63 = vmul.f32 %v10269_v54, %v10268_v9 }
 0x75c   : > { %5688 = vmatmul.mubr.f32.gmra.mrb[56].mxu0 %v3116_v18  ;;  %v3915_v18 = vsel %vm10278_vm10, %v3875_v50, 0.0  ;;  %vm10298_vm10 = vmmov %vm10287_vm0 }
 0x75d   : > { %5690 = vmatprep.mubr.f32.mxu0 %v3117_v44  ;;  %v4275_v44 = vmul.f32 %v9052_v38, %v10276_v37 }
 0x75f   : > { %v4315_v5 = vsel %vm10279_vm11, %v4275_v44, 0.0  ;;  %vm10299_vm11 = vmmov %vm10287_vm0 }
 0x760   : > { %v6434_v35 = vpop.eup %6433  ;;  %5691 = vmatmul.mubr.f32.gmra.mrb[58].mxu0 %v3118_v49  ;;  %v6672_v49 = vld [vmem:[%s9937_s1 + $0xe0] sm:$0xff] }
 0x761   : > { %5693 = vmatprep.mubr.f32.mxu0 %v3119_v32  ;;  %v6436_v28 = vpop.eup %6435  ;;  %v3121_v26 = vmul.f32 %v6434_v35, %v9020_v47  ;;  %v3909_v47 = vsel %vm10270_vm6, %v3873_v63, 0.0  ;;  %v10281_v32 = vld [vmem:[#allocation20_spill] sm:$0xff]  ;;  %v3664_v63 = vsel %vm10285_vm15, %v3642_v0, 0.0  ;;  %vm10294_vm6 = vmmov %vm10287_vm0  ;;  %vm10303_vm15 = vcmask 130048  }
 0x762   : > { %v3122_v58 = vmul.f32 %v6436_v28, %v9017_v17  ;;  %v4273_v17 = vmul.f32 %v9045_v56, %v10268_v9  ;;  %v3317_v56 = vld [vmem:[%s9938_s2 + $0x38] sm:$0xff]  ;;  %v3878_v35 = vmul.f32 %v10281_v32, %v10280_v15  ;;  %v4278_v28 = vmul.f32 %v9055_v3, %v10280_v15 }
 0x763   : > { %v5934_v11 = vpack.c.bf16 %v3317_v56, %v3316_v14  ;;  %v3644_v3 = vmul.f32 %v9105_v43, %v8005_v42  ;;  %v4318_v43 = vsel %vm10288_vm1, %v4276_v24, 0.0 }
 0x764   : > { %5694 = vmatmul.mubr.f32.gmra.mrb[60].mxu0 %v3120_v55  ;;  %v4309_v53 = vsel %vm10271_vm7, %v4273_v17, 0.0  ;;  %v3924_v38 = vsel %vm10282_vm12, %v3878_v35, 0.0  ;;  %vm10295_vm7 = vmmov %vm10287_vm0 }
 0x765   : > { %5696 = vmatprep.mubr.f32.mxu0 %v3121_v26  ;;  %5935 = vmatprep.subr.bf16.mxu0 %v5934_v11  ;;  %v3640_v26 = vmul.f32 %v9059_v10, %v7985_v31  ;;  %v3604_v31 = vpop.permute.xlu0 %3603  ;;  %v3646_v10 = vmul.f32 %v3606_v22, %v10227_v25  ;;  %v3670_v17 = vsel %vm10286_vm2, %v3644_v3, 0.0  ;;  %vm10300_vm12 = vmmov %vm10287_vm0 }
 0x766   : > { %5937 = vmatpush3.bf16.msra.mxu0 %v5934_v11  ;;  %vm10304_vm2 = vmmov %vm10303_vm15 }
 0x767   : > { %v3658_v54 = vsel %vm10284_vm14, %v3640_v26, 0.0  ;;  %v3676_v42 = vsel %vm10287_vm0, %v3646_v10, 0.0  ;;  %vm10302_vm14 = vmmov %vm10287_vm0 }
 0x768   : > { %5697 = vmatmul.mubr.f32.gmra.mrb[62].mxu0 %v3122_v58 }
 0x769   : > { %3617 = vrot.lane.b32.xlu1 %v6669_v61, %s6711_s14  ;;  %v4324_v61 = vsel %vm10283_vm13, %v4278_v28, 0.0  ;;  %vm10301_vm13 = vmmov %vm10287_vm0 }
 0x76a   : > { %vm10305_vm0 = vmmov %vm10304_vm2 }
 0x76f   : > { %4307 = vadd.xlane.f32.xlu0 %v4306_v33  ;;  %v9205_v46 = vpop.xlane.xlu1 %4292 }
 0x773   : > { %3910 = vadd.xlane.f32.xlu0 %v3909_v47  ;;  %v9214_v55 = vpop.xlane.xlu1 %3901 }
 0x777   : > { %v3610_v58 = vpop.permute.xlu1 %3609 }
 0x789   : > { %3615 = vrot.lane.b32.xlu0 %v6670_v45, %s6711_s14  ;;  %v3648_v45 = vmul.f32 %v3610_v58, %v10236_v52  ;;  %v4277_v52 = vmul.f32 %v9057_v40, %v10289_v16  ;;  %v3641_v40 = vmul.f32 %v9067_v12, %v7990_v13  ;;  %v3645_v13 = vmul.f32 %v3604_v31, %v10231_v6 }
 0x78a   : > { %v9236_v2 = vpop.xlane.xlu0 %4295 }
 0x78b   : > { %v3682_v27 = vsel %vm10291_vm3, %v3648_v45, 0.0  ;;  %v4321_v34 = vsel %vm10294_vm6, %v4277_v52, 0.0  ;;  %vm10306_vm3 = vmmov %vm10305_vm0 }
 0x78c   : > { %vm10309_vm6 = vmmov %vm10305_vm0 }
 0x78d   : > { %4310 = vadd.xlane.f32.xlu1 %v4309_v53 }
 0x78e   : > { %v9247_v56 = vpop.xlane.xlu0 %3898 }
 0x791   : > { %3919 = vadd.xlane.f32.xlu1 %v3918_v1  ;;  %v3877_v1 = vmul.f32 %v10290_v8, %v10289_v16 }
 0x793   : > { %v3921_v11 = vsel %vm10292_vm4, %v3877_v1, 0.0  ;;  %vm10307_vm4 = vmmov %vm10305_vm0 }
 0x7a2   : > { %3621 = vrot.lane.b32.xlu1 %v6671_v48, %s6711_s14 }
 0x7a8   : > { %4313 = vadd.xlane.f32.xlu0 %v4312_v29  ;;  %v9224_v33 = vpop.xlane.xlu1 %4298  ;;  %v3608_v29 = vpop.permute.xlu0 %3607 }
 0x7a9   : > { %v3647_v28 = vmul.f32 %v3608_v29, %v10255_v60 }
 0x7ab   : > { %v3679_v0 = vsel %vm10300_vm12, %v3647_v28, 0.0  ;;  %vm10315_vm12 = vmmov %vm10305_vm0 }
 0x7ac   : > { %3916 = vadd.xlane.f32.xlu0 %v3915_v18  ;;  %v9230_v47 = vpop.xlane.xlu1 %3907 }
 0x7b0   : > { %v3614_v53 = vpop.permute.xlu1 %3613 }
 0x7b1   : > { %v3650_v25 = vmul.f32 %v3614_v53, %v10264_v62  ;;  %v3639_v62 = vmul.f32 %v9063_v39, %v7980_v4  ;;  %v3643_v4 = vmul.f32 %v9097_v41, %v8000_v7  ;;  %v3673_v7 = vsel %vm10299_vm11, %v3645_v13, 0.0  ;;  %vm10314_vm11 = vmmov %vm10305_vm0 }
 0x7b3   : > { %v3688_v36 = vsel %vm10293_vm5, %v3650_v25, 0.0  ;;  %v3655_v44 = vsel %vm10295_vm7, %v3639_v62, 0.0  ;;  %v3667_v12 = vsel %vm10298_vm10, %v3643_v4, 0.0  ;;  %vm10308_vm5 = vmmov %vm10305_vm0 }
 0x7b4   : > { %vm10310_vm7 = vmmov %vm10305_vm0 }
 0x7b5   : > { %vm10313_vm10 = vmmov %vm10305_vm0 }
 0x7c2   : > { %3619 = vrot.lane.b32.xlu0 %v6672_v49, %s6711_s14 }
 0x7c3   : > { %v9261_v22 = vpop.xlane.xlu0 %4301 }
 0x7c6   : > { %4316 = vadd.xlane.f32.xlu1 %v4315_v5 }
 0x7c7   : > { %v9272_v32 = vpop.xlane.xlu0 %3904 }
 0x7ca   : > { %3925 = vadd.xlane.f32.xlu1 %v3924_v38 }
 0x7cb   : > { %v3612_v38 = vpop.permute.xlu0 %3611 }
 0x7cc   : > { %v3649_v58 = vmul.f32 %v3612_v38, %v10268_v9 }
 0x7ce   : > { %4325 = vadd.xlane.f32.xlu1 %v4324_v61  ;;  %v3685_v60 = vsel %vm10301_vm13, %v3649_v58, 0.0  ;;  %vm10316_vm13 = vmmov %vm10305_vm0 }
 0x7d2   : > { %3659 = vadd.xlane.f32.xlu1 %v3658_v54 }
 0x7d6   : > { %3665 = vadd.xlane.f32.xlu1 %v3664_v63 }
 0x7da   : > { %3671 = vadd.xlane.f32.xlu1 %v3670_v17 }
 0x7de   : > { %3677 = vadd.xlane.f32.xlu1 %v3676_v42  ;;  %v9310_v42 = vld [vmem:[%s9937_s1 + $0x8] sm:$0xff] }
 0x7e1   : > { %v9244_v14 = vpop.xlane.xlu1 %4304  ;;  %4319 = vadd.xlane.f32.xlu0 %v4318_v43  ;;  %v3927_v43 = vadd.f32 %v9310_v42, %v9065_v30 }
 0x7e2   : > { %3683 = vadd.xlane.f32.xlu1 %v3682_v27  ;;  %v4327_v27 = vadd.f32 %v9310_v42, %v9080_v59 }
 0x7e3   : > { %v5175_v1 = vmul.f32 -1.442695, %v3927_v43 }
 0x7e4   : > { %v5191_v62 = vmul.f32 -1.442695, %v4327_v27 }
 0x7e5   : > { %v9252_v48 = vpop.xlane.xlu1 %3913  ;;  %3922 = vadd.xlane.f32.xlu0 %v3921_v11  ;;  %6437 = vpow2.f32 %v5175_v1 }
 0x7e6   : > { %3689 = vadd.xlane.f32.xlu1 %v3688_v36  ;;  %6439 = vpow2.f32 %v5191_v62 }
 0x7e9   : > { %v3618_v50 = vpop.permute.xlu1 %3617  ;;  %4322 = vadd.xlane.f32.xlu0 %v4321_v34 }
 0x7ea   : > { %v3652_v18 = vmul.f32 %v3618_v50, %v10272_v51  ;;  %v3661_v51 = vsel %vm10297_vm9, %v3641_v40, 0.0  ;;  %v9333_v50 = vld [vmem:[%s9937_s1 + $0x28] sm:$0xff]  ;;  %vm10312_vm9 = vmmov %vm10305_vm0 }
 0x7eb   : > { %v3929_v59 = vadd.f32 %v9333_v50, %v9085_v57  ;;  %v4329_v57 = vadd.f32 %v9333_v50, %v9113_v20 }
 0x7ec   : > { %v3694_v49 = vsel %vm10296_vm8, %v3652_v18, 0.0  ;;  %vm10311_vm8 = vmmov %vm10305_vm0 }
 0x7ed   : > { %3656 = vadd.xlane.f32.xlu0 %v3655_v44  ;;  %3695 = vadd.xlane.f32.xlu1 %v3694_v49  ;;  %v5193_v58 = vmul.f32 -1.442695, %v4329_v57 }
 0x7ef   : > { %v9265_v5 = vpop.f32.mrb[32].mxu0  ;;  %v6438_v49 = vpop.eup %6437 }
 0x7f0   : > { %v9269_v39 = vpop.f32.mrb[33].mxu0 }
 0x7f1   : > { %3662 = vadd.xlane.f32.xlu0 %v3661_v51  ;;  %v5177_v51 = vmul.f32 -1.442695, %v3929_v59 }
 0x7f3   : > { %6441 = vpow2.f32 %v5177_v51 }
 0x7f5   : > { %3668 = vadd.xlane.f32.xlu0 %v3667_v12  ;;  %v3991_v12 = vadd.f32 1.0, %v6438_v49 }
 0x7f7   : > { %v9276_v35 = vpop.f32.mrb[34].mxu0  ;;  %6443 = vrcp.f32 %v3991_v12 }
 0x7f8   : > { %v9279_v26 = vpop.f32.mrb[35].mxu0  ;;  %6445 = vpow2.f32 %v5193_v58  ;;  %v9385_v58 = vld [vmem:[%s9937_s1 + $0x38] sm:$0xff] }
 0x7f9   : > { %3674 = vadd.xlane.f32.xlu0 %v3673_v7  ;;  %v6440_v7 = vpop.eup %6439 }
 0x7fb   : > { %v9282_v41 = vpop.f32.mrb[36].mxu0 }
 0x7fc   : > { %v9285_v61 = vpop.f32.mrb[37].mxu0  ;;  %v9287_v6 = vpop.xlane.xlu0 %4307 }
 0x7fd   : > { %3680 = vadd.xlane.f32.xlu0 %v3679_v0  ;;  %v6442_v62 = vpop.eup %6441 }
 0x800   : > { %v9290_v54 = vpop.xlane.xlu0 %3910 }
 0x801   : > { %3686 = vadd.xlane.f32.xlu0 %v3685_v60  ;;  %v4391_v60 = vadd.f32 1.0, %v6440_v7 }
 0x803   : > { %v9293_v3 = vpop.f32.mrb[38].mxu0  ;;  %6447 = vrcp.f32 %v4391_v60 }
 0x804   : > { %v9295_v63 = vpop.f32.mrb[39].mxu0  ;;  %v3616_v31 = vpop.permute.xlu0 %3615 }
 0x805   : > { %v3651_v10 = vmul.f32 %v3616_v31, %v10276_v37 }
 0x807   : > { %v9298_v9 = vpop.f32.mrb[40].mxu0  ;;  %v3691_v17 = vsel %vm10302_vm14, %v3651_v10, 0.0  ;;  %v9350_v10 = vld [vmem:[%s9937_s1 + $0x18] sm:$0xff]  ;;  %vm10317_vm14 = vmmov %vm10305_vm0 }
 0x808   : > { %v9301_v24 = vpop.f32.mrb[41].mxu0  ;;  %3692 = vadd.xlane.f32.xlu0 %v3691_v17  ;;  %v3928_v20 = vadd.f32 %v9350_v10, %v9061_v21  ;;  %v9359_v17 = vld [vmem:[%s9937_s1 + $0x48] sm:$0xff]  ;;  %v6444_v21 = vpop.eup %6443 }
 0x809   : > { %v3931_v43 = vadd.f32 %v9359_v17, %v9111_v19  ;;  %v4328_v19 = vadd.f32 %v9350_v10, %v9069_v23  ;;  %v4119_v49 = vmul.f32 %v6444_v21, %v6444_v21  ;;  %v6446_v12 = vpop.eup %6445 }
 0x80a   : > { %v4393_v7 = vadd.f32 1.0, %v6446_v12 }
 0x80d   : > { %v6448_v23 = vpop.eup %6447 }
 0x80f   : > { %v9303_v45 = vpop.f32.mrb[42].mxu0 }
 0x810   : > { %v9305_v53 = vpop.f32.mrb[43].mxu0 }
 0x813   : > { %v9314_v37 = vpop.f32.mrb[44].mxu0 }
 0x814   : > { %v9316_v8 = vpop.f32.mrb[45].mxu0 }
 0x81a   : > { %v9318_v25 = vpop.xlane.xlu1 %4310 }
 0x81b   : > { %v9322_v52 = vpop.f32.mrb[46].mxu0 }
 0x81c   : > { %v9324_v11 = vpop.f32.mrb[47].mxu0 }
 0x81e   : > { %v9326_v36 = vpop.xlane.xlu1 %3919 }
 0x81f   : > { %v5677_v29 = vpop.f32.mrb[48].mxu0 }
 0x820   : > { %v3237_v30 = vpop.f32.mrb[49].mxu0 }
 0x821   : > { %5703 = vmatprep.mubr.msk.f32.mxu0 %vm10303_vm15, %v3237_v30  ;;  %vm10318_vm15 = vmmov %vm10305_vm0 }
 0x822   : > { %v3622_v34 = vpop.permute.xlu1 %3621  ;;  %5704 = vmatmul.mubr.msk.f32.vlgmr.msra.gmra.mrb[64].mxu0 %vm10304_vm2, %v5677_v29  ;;  %v5176_v29 = vmul.f32 -1.442695, %v3928_v20  ;;  %vm10319_vm2 = vmmov %vm10288_vm1  ;;  %v9392_v20 = vld [vmem:[%s9937_s1 + $0x68] sm:$0xff] }
 0x823   : > { %v3654_v18 = vmul.f32 %v3622_v34, %v10280_v15  ;;  %v5680_v40 = vpop.f32.mrb[50].mxu0  ;;  %v5179_v34 = vmul.f32 -1.442695, %v3931_v43  ;;  %v3933_v43 = vadd.f32 %v9392_v20, %v9247_v56  ;;  %v4333_v56 = vadd.f32 %v9392_v20, %v9224_v33 }
 0x824   : > { %v3247_v44 = vpop.f32.mrb[51].mxu0  ;;  %6449 = vpow2.f32 %v5176_v29 }
 0x825   : > { %5706 = vmatprep.mubr.msk.f32.mxu0 %vm10305_vm0, %v3247_v44  ;;  %v3700_v4 = vsel %vm10288_vm1, %v3654_v18, 0.0  ;;  %v3993_v18 = vadd.f32 1.0, %v6442_v62  ;;  %6451 = vpow2.f32 %v5179_v34  ;;  %v5197_v12 = vmul.f32 -1.442695, %v4333_v56 }
 0x826   : > { %3701 = vadd.xlane.f32.xlu1 %v3700_v4  ;;  %5707 = vmatmul.mubr.msk.f32.gmra.mrb[66].mxu0 %vm10306_vm3, %v5680_v40  ;;  %v4331_v4 = vadd.f32 %v9359_v17, %v9205_v46  ;;  %vm4827_vm1 = vcmask 269312   ;;  %vm10326_vm3 = vmmov %vm10319_vm2 }
 0x827   : > { %v5683_v13 = vpop.f32.mrb[52].mxu0  ;;  %6453 = vrcp.f32 %v3993_v18 }
 0x828   : > { %v3257_v28 = vpop.f32.mrb[53].mxu0 }
 0x829   : > { %5709 = vmatprep.mubr.msk.f32.mxu0 %vm10307_vm4, %v3257_v28  ;;  %v5192_v28 = vmul.f32 -1.442695, %v4328_v19  ;;  %vm10327_vm4 = vmmov %vm10319_vm2 }
 0x82a   : > { %5710 = vmatmul.mubr.msk.f32.gmra.mrb[68].mxu0 %vm10308_vm5, %v5683_v13  ;;  %vm10328_vm5 = vmmov %vm10319_vm2 }
 0x82b   : > { %v5686_v15 = vpop.f32.mrb[54].mxu0  ;;  %6455 = vpow2.f32 %v5192_v28 }
 0x82c   : > { %v3267_v38 = vpop.f32.mrb[55].mxu0 }
 0x82d   : > { %5712 = vmatprep.mubr.msk.f32.mxu0 %vm10309_vm6, %v3267_v38  ;;  %v5195_v38 = vmul.f32 -1.442695, %v4331_v4  ;;  %vm10329_vm6 = vmmov %vm10319_vm2 }
 0x82e   : > { %5713 = vmatmul.mubr.msk.f32.gmra.mrb[70].mxu0 %vm10310_vm7, %v5686_v15  ;;  %vm10330_vm7 = vmmov %vm10319_vm2 }
 0x82f   : > { %v5689_v0 = vpop.f32.mrb[56].mxu0  ;;  %6457 = vpow2.f32 %v5195_v38 }
 0x830   : > { %v3277_v31 = vpop.f32.mrb[57].mxu0  ;;  %6459 = vrcp.f32 %v4393_v7  ;;  %v9414_v7 = vld [vmem:[%s9937_s1 + $0x88] sm:$0xff] }
 0x831   : > { %5715 = vmatprep.mubr.msk.f32.mxu0 %vm10311_vm8, %v3277_v31  ;;  %v4519_v31 = vmul.f32 %v6448_v23, %v6448_v23  ;;  %vm10331_vm8 = vmmov %vm10319_vm2 }
 0x832   : > { %5716 = vmatmul.mubr.msk.f32.gmra.mrb[72].mxu0 %vm10312_vm9, %v5689_v0  ;;  %v10320_v0 = vld [vmem:[#allocation29_spill] sm:$0xff]  ;;  %vm10332_vm9 = vmmov %vm10319_vm2 }
 0x833   : > { %v5692_v1 = vpop.f32.mrb[58].mxu0  ;;  %v3930_v60 = vadd.f32 %v9385_v58, %v10320_v0 }
 0x834   : > { %v3287_v27 = vpop.f32.mrb[59].mxu0 }
 0x835   : > { %v9363_v30 = vpop.xlane.xlu0 %4313  ;;  %5718 = vmatprep.mubr.msk.f32.mxu0 %vm10313_vm10, %v3287_v27  ;;  %v5178_v27 = vmul.f32 -1.442695, %v3930_v60  ;;  %vm10333_vm10 = vmmov %vm10319_vm2 }
 0x836   : > { %5719 = vmatmul.mubr.msk.f32.gmra.mrb[74].mxu0 %vm10314_vm11, %v5692_v1  ;;  %vm10334_vm11 = vmmov %vm10319_vm2 }
 0x837   : > { %4055 = vrot.lane.b32.xlu1 %v6444_v21, %s6703_s4  ;;  %v5695_v59 = vpop.f32.mrb[60].mxu0  ;;  %v5181_v21 = vmul.f32 -1.442695, %v3933_v43  ;;  %6461 = vpow2.f32 %v5178_v27 }
 0x838   : > { %v3297_v40 = vpop.f32.mrb[61].mxu0 }
 0x839   : > { %v9370_v44 = vpop.xlane.xlu0 %3916  ;;  %5721 = vmatprep.mubr.msk.f32.mxu0 %vm10315_vm12, %v3297_v40  ;;  %vm10335_vm12 = vmmov %vm10319_vm2 }
 0x83a   : > { %5722 = vmatmul.mubr.msk.f32.gmra.mrb[76].mxu0 %vm10316_vm13, %v5695_v59  ;;  %v10321_v59 = vld [vmem:[#allocation8_spill] sm:$0xff]  ;;  %vm10336_vm13 = vmmov %vm10319_vm2 }
 0x83b   : > { %4151 = vrot.lane.b32.xlu1 %v4119_v49, %s6703_s4  ;;  %v5698_v51 = vpop.f32.mrb[62].mxu0  ;;  %v4330_v18 = vadd.f32 %v9385_v58, %v10321_v59 }
 0x83c   : > { %v3307_v13 = vpop.f32.mrb[63].mxu0 }
 0x83d   : > { %v3620_v57 = vpop.permute.xlu0 %3619  ;;  %5724 = vmatprep.mubr.msk.f32.mxu0 %vm10317_vm14, %v3307_v13  ;;  %v5194_v4 = vmul.f32 -1.442695, %v4330_v18  ;;  %vm10337_vm14 = vmmov %vm10319_vm2 }
 0x83e   : > { %v3653_v15 = vmul.f32 %v3620_v57, %v10289_v16  ;;  %5725 = vmatmul.mubr.msk.f32.gmra.mrb[78].mxu0 %vm10318_vm15, %v5698_v51  ;;  %v6450_v16 = vpop.eup %6449  ;;  %v9407_v57 = vld [vmem:[%s9937_s1 + $0x58] sm:$0xff]  ;;  %vm10338_vm15 = vmmov %vm10319_vm2 }
 0x83f   : > { %4455 = vrot.lane.b32.xlu1 %v6448_v23, %s6704_s5  ;;  %v6452_v1 = vpop.eup %6451  ;;  %v3992_v29 = vadd.f32 1.0, %v6450_v16  ;;  %v10322_v23 = vld [vmem:[#allocation26_spill] sm:$0xff] }
 0x840   : > { %v3697_v46 = vsel %vm10319_vm2, %v3653_v15, 0.0  ;;  %v6454_v62 = vpop.eup %6453  ;;  %v3995_v34 = vadd.f32 1.0, %v6452_v1  ;;  %v3932_v33 = vadd.f32 %v9407_v57, %v10322_v23 }
 0x841   : > { %3698 = vadd.xlane.f32.xlu0 %v3697_v46  ;;  %v4121_v40 = vmul.f32 %v6454_v62, %v6454_v62  ;;  %6463 = vrcp.f32 %v3992_v29  ;;  %v6456_v19 = vpop.eup %6455  ;;  %v3935_v46 = vadd.f32 %v9414_v7, %v9272_v32 }
 0x842   : > { %6465 = vpow2.f32 %v5181_v21  ;;  %v6458_v49 = vpop.eup %6457  ;;  %v4392_v13 = vadd.f32 1.0, %v6456_v19 }
 0x843   : > { %4551 = vrot.lane.b32.xlu1 %v4519_v31, %s6704_s5  ;;  %6467 = vrcp.f32 %v3995_v34  ;;  %v6460_v51 = vpop.eup %6459  ;;  %v4395_v28 = vadd.f32 1.0, %v6458_v49  ;;  %v5180_v31 = vmul.f32 -1.442695, %v3932_v33  ;;  %v5183_v1 = vmul.f32 -1.442695, %v3935_v46 }
 0x844   : > { %6469 = vpow2.f32 %v5194_v4  ;;  %v4521_v15 = vmul.f32 %v6460_v51, %v6460_v51  ;;  %v6462_v38 = vpop.eup %6461  ;;  %v4335_v34 = vadd.f32 %v9414_v7, %v9244_v14  ;;  %v9432_v14 = vld [vmem:[%s9937_s1 + $0x78] sm:$0xff] }
 0x845   : > { %6471 = vrcp.f32 %v4392_v13  ;;  %v3994_v43 = vadd.f32 1.0, %v6462_v38  ;;  %v3934_v4 = vadd.f32 %v9432_v14, %v9214_v55 }
 0x846   : > { %6473 = vpow2.f32 %v5197_v12  ;;  %v5199_v49 = vmul.f32 -1.442695, %v4335_v34 }
 0x847   : > { %4059 = vrot.lane.b32.xlu1 %v6454_v62, %s6703_s4  ;;  %6475 = vrcp.f32 %v4395_v28  ;;  %v4332_v62 = vadd.f32 %v9407_v57, %v9236_v2  ;;  %v9439_v28 = vld [vmem:[%s9937_s1 + $0xa8] sm:$0xff] }
 0x848   : > { %6477 = vpow2.f32 %v5180_v31  ;;  %v3937_v23 = vadd.f32 %v9439_v28, %v9290_v54  ;;  %v4334_v54 = vadd.f32 %v9432_v14, %v9261_v22 }
 0x849   : > { %6479 = vrcp.f32 %v3994_v43 }
 0x84a   : > { %6481 = vpow2.f32 %v5183_v1  ;;  %v4337_v1 = vadd.f32 %v9439_v28, %v9318_v25  ;;  %v9458_v25 = vld [vmem:[%s9937_s1 + $0x98] sm:$0xff] }
 0x84b   : > { %4155 = vrot.lane.b32.xlu1 %v4121_v40, %s6703_s4  ;;  %v6464_v0 = vpop.eup %6463  ;;  %v5196_v40 = vmul.f32 -1.442695, %v4332_v62 }
 0x84c   : > { %v6466_v60 = vpop.eup %6465  ;;  %v4120_v32 = vmul.f32 %v6464_v0, %v6464_v0  ;;  %v5201_v34 = vmul.f32 -1.442695, %v4337_v1 }
 0x84d   : > { %v6468_v16 = vpop.eup %6467  ;;  %v3997_v27 = vadd.f32 1.0, %v6466_v60 }
 0x84e   : > { %v4123_v29 = vmul.f32 %v6468_v16, %v6468_v16  ;;  %v6470_v21 = vpop.eup %6469 }
 0x84f   : > { %4459 = vrot.lane.b32.xlu1 %v6460_v51, %s6704_s5  ;;  %v6472_v59 = vpop.eup %6471  ;;  %6483 = vrcp.f32 %v3997_v27  ;;  %v4394_v56 = vadd.f32 1.0, %v6470_v21 }
 0x850   : > { %v6474_v18 = vpop.eup %6473  ;;  %6485 = vpow2.f32 %v5196_v40  ;;  %v4520_v13 = vmul.f32 %v6472_v59, %v6472_v59 }
 0x851   : > { %v6476_v19 = vpop.eup %6475  ;;  %v4397_v2 = vadd.f32 1.0, %v6474_v18  ;;  %6487 = vrcp.f32 %v4394_v56  ;;  %v9465_v56 = vld [vmem:[%s9937_s1 + $0xc8] sm:$0xff] }
 0x852   : > { %v4523_v51 = vmul.f32 %v6476_v19, %v6476_v19  ;;  %v6478_v12 = vpop.eup %6477  ;;  %6489 = vpow2.f32 %v5199_v49  ;;  %v3939_v49 = vadd.f32 %v9465_v56, %v9370_v44  ;;  %v4336_v44 = vadd.f32 %v9458_v25, %v9287_v6 }
 0x853   : > { %4555 = vrot.lane.b32.xlu1 %v4521_v15, %s6704_s5  ;;  %v6480_v33 = vpop.eup %6479  ;;  %6491 = vrcp.f32 %v4397_v2  ;;  %v5182_v15 = vmul.f32 -1.442695, %v3934_v4  ;;  %v3996_v46 = vadd.f32 1.0, %v6478_v12 }
 0x854   : > { %v6482_v55 = vpop.eup %6481  ;;  %v5187_v12 = vmul.f32 -1.442695, %v3939_v49 }
 0x855   : > { %v3999_v60 = vadd.f32 1.0, %v6482_v55  ;;  %6493 = vpow2.f32 %v5182_v15 }
 0x856   : > { %6495 = vrcp.f32 %v3996_v46 }
 0x857   : > { %4063 = vrot.lane.b32.xlu1 %v6468_v16, %s6703_s4  ;;  %4057 = vrot.lane.b32.xlu0 %v6464_v0, %s6703_s4  ;;  %v5185_v0 = vmul.f32 -1.442695, %v3937_v23  ;;  %v4122_v16 = vmul.f32 %v6480_v33, %v6480_v33 }
 0x859   : > { %v6484_v38 = vpop.eup %6483  ;;  %6497 = vpow2.f32 %v5185_v0 }
 0x85a   : > { %v4125_v31 = vmul.f32 %v6484_v38, %v6484_v38  ;;  %v6486_v43 = vpop.eup %6485  ;;  %6499 = vrcp.f32 %v3999_v60 }
 0x85b   : > { %4159 = vrot.lane.b32.xlu1 %v4123_v29, %s6703_s4  ;;  %4153 = vrot.lane.b32.xlu0 %v4120_v32, %s6703_s4  ;;  %v6488_v27 = vpop.eup %6487  ;;  %v5198_v29 = vmul.f32 -1.442695, %v4334_v54  ;;  %v4396_v21 = vadd.f32 1.0, %v6486_v43 }
 0x85c   : > { %v6490_v62 = vpop.eup %6489  ;;  %v4522_v40 = vmul.f32 %v6488_v27, %v6488_v27 }
 0x85d   : > { %v6492_v32 = vpop.eup %6491  ;;  %v4399_v22 = vadd.f32 1.0, %v6490_v62  ;;  %6501 = vpow2.f32 %v5198_v29  ;;  %v9485_v62 = vld [vmem:[%s9937_s1 + $0xb8] sm:$0xff] }
 0x85e   : > { %v4525_v18 = vmul.f32 %v6492_v32, %v6492_v32  ;;  %6503 = vrcp.f32 %v4396_v21  ;;  %v3938_v29 = vadd.f32 %v9485_v62, %v9252_v48 }
 0x85f   : > { %4463 = vrot.lane.b32.xlu1 %v6476_v19, %s6704_s5  ;;  %4457 = vrot.lane.b32.xlu0 %v6472_v59, %s6704_s5  ;;  %v3936_v59 = vadd.f32 %v9458_v25, %v9230_v47  ;;  %v6494_v19 = vpop.eup %6493  ;;  %6505 = vpow2.f32 %v5201_v34 }
 0x860   : > { %v6496_v2 = vpop.eup %6495  ;;  %6507 = vrcp.f32 %v4399_v22 }
 0x861   : > { %v5184_v4 = vmul.f32 -1.442695, %v3936_v59  ;;  %v4124_v15 = vmul.f32 %v6496_v2, %v6496_v2  ;;  %v9494_v59 = vld [vmem:[%s9937_s1 + $0xe8] sm:$0xff] }
 0x863   : > { %4559 = vrot.lane.b32.xlu1 %v4523_v51, %s6704_s5  ;;  %4553 = vrot.lane.b32.xlu0 %v4520_v13, %s6704_s5  ;;  %v6498_v47 = vpop.eup %6497  ;;  %v3998_v13 = vadd.f32 1.0, %v6494_v19  ;;  %6509 = vpow2.f32 %v5184_v4  ;;  %v5186_v19 = vmul.f32 -1.442695, %v3938_v29 }
 0x864   : > { %v6500_v51 = vpop.eup %6499  ;;  %v4001_v23 = vadd.f32 1.0, %v6498_v47 }
 0x865   : > { %v4127_v55 = vmul.f32 %v6500_v51, %v6500_v51  ;;  %6511 = vrcp.f32 %v3998_v13 }
 0x866   : > { %6513 = vpow2.f32 %v5187_v12  ;;  %v4338_v12 = vadd.f32 %v9485_v62, %v9363_v30 }
 0x867   : > { %4067 = vrot.lane.b32.xlu1 %v6484_v38, %s6703_s4  ;;  %4061 = vrot.lane.b32.xlu0 %v6480_v33, %s6703_s4  ;;  %v4317_v33 = vpop.xlane.xlu1 %4316  ;;  %v6502_v46 = vpop.eup %6501  ;;  %6515 = vrcp.f32 %v4001_v23 }
 0x868   : > { %v4339_v0 = vadd.f32 %v9465_v56, %v4317_v33  ;;  %v6504_v60 = vpop.eup %6503  ;;  %v4398_v43 = vadd.f32 1.0, %v6502_v46 }
 0x869   : > { %v6506_v54 = vpop.eup %6505  ;;  %v4524_v34 = vmul.f32 %v6504_v60, %v6504_v60 }
 0x86a   : > { %v5203_v6 = vmul.f32 -1.442695, %v4339_v0  ;;  %v4401_v1 = vadd.f32 1.0, %v6506_v54  ;;  %v5202_v0 = vmul.f32 -1.442695, %v4338_v12 }
 0x86b   : > { %4163 = vrot.lane.b32.xlu1 %v4125_v31, %s6703_s4  ;;  %4157 = vrot.lane.b32.xlu0 %v4122_v16, %s6703_s4  ;;  %v5200_v31 = vmul.f32 -1.442695, %v4336_v44  ;;  %v6508_v16 = vpop.eup %6507 }
 0x86c   : > { %v4527_v21 = vmul.f32 %v6508_v16, %v6508_v16 }
 0x86d   : > { %6517 = vpow2.f32 %v5200_v31  ;;  %v6510_v22 = vpop.eup %6509 }
 0x86e   : > { %v9475_v38 = vpop.xlane.xlu0 %4319  ;;  %6519 = vrcp.f32 %v4398_v43 }
 0x86f   : > { %4467 = vrot.lane.b32.xlu1 %v6492_v32, %s6704_s5  ;;  %4461 = vrot.lane.b32.xlu0 %v6488_v27, %s6704_s5  ;;  %v9489_v32 = vpop.xlane.xlu1 %3925  ;;  %6521 = vpow2.f32 %v5203_v6  ;;  %v6512_v48 = vpop.eup %6511 }
 0x870   : > { %6523 = vrcp.f32 %v4401_v1  ;;  %v4126_v33 = vmul.f32 %v6512_v48, %v6512_v48 }
 0x871   : > { %6525 = vpow2.f32 %v5186_v19 }
 0x872   : > { %v3923_v27 = vpop.xlane.xlu0 %3922 }
 0x873   : > { %4563 = vrot.lane.b32.xlu1 %v4525_v18, %s6704_s5  ;;  %4557 = vrot.lane.b32.xlu0 %v4522_v40, %s6704_s5  ;;  %v3941_v18 = vadd.f32 %v9494_v59, %v3923_v27  ;;  %v6514_v40 = vpop.eup %6513  ;;  %v9499_v47 = vpop.xlane.xlu1 %4325  ;;  %v9515_v27 = vld [vmem:[%s9937_s1 + $0xd8] sm:$0xff] }
 0x874   : > { %v6516_v49 = vpop.eup %6515  ;;  %v3940_v29 = vadd.f32 %v9515_v27, %v9326_v36 }
 0x875   : > { %v5189_v4 = vmul.f32 -1.442695, %v3941_v18  ;;  %v4129_v23 = vmul.f32 %v6516_v49, %v6516_v49 }
 0x876   : > { %v4323_v13 = vpop.xlane.xlu0 %4322 }
 0x877   : > { %4071 = vrot.lane.b32.xlu1 %v6500_v51, %s6703_s4  ;;  %4065 = vrot.lane.b32.xlu0 %v6496_v2, %s6703_s4  ;;  %v4000_v2 = vadd.f32 1.0, %v6510_v22  ;;  %v4003_v51 = vadd.f32 1.0, %v6514_v40  ;;  %v6518_v44 = vpop.eup %6517  ;;  %v5188_v40 = vmul.f32 -1.442695, %v3940_v29 }
 0x878   : > { %v4400_v31 = vadd.f32 1.0, %v6518_v44 }
 0x879   : > { %6527 = vrcp.f32 %v4000_v2 }
 0x87a   : > { %6529 = vpow2.f32 %v5189_v4  ;;  %v9548_v29 = vpop.xlane.xlu0 %3656 }
 0x87b   : > { %4167 = vrot.lane.b32.xlu1 %v4127_v55, %s6703_s4  ;;  %4161 = vrot.lane.b32.xlu0 %v4124_v15, %s6703_s4  ;;  %v4341_v55 = vadd.f32 %v9494_v59, %v4323_v13  ;;  %v6520_v15 = vpop.eup %6519  ;;  %6531 = vrcp.f32 %v4003_v51  ;;  %v4340_v51 = vadd.f32 %v9515_v27, %v9475_v38  ;;  %v9538_v38 = vld [vmem:[%s9937_s1 + $0xf8] sm:$0xff] }
 0x87c   : > { %v6522_v46 = vpop.eup %6521  ;;  %6533 = vpow2.f32 %v5202_v0  ;;  %v4526_v6 = vmul.f32 %v6520_v15, %v6520_v15 }
 0x87d   : > { %v6524_v54 = vpop.eup %6523  ;;  %v5205_v30 = vmul.f32 -1.442695, %v4341_v55  ;;  %6535 = vrcp.f32 %v4400_v31  ;;  %v5204_v55 = vmul.f32 -1.442695, %v4340_v51 }
 0x87e   : > { %v4529_v43 = vmul.f32 %v6524_v54, %v6524_v54  ;;  %v6526_v1 = vpop.eup %6525 }
 0x87f   : > { %4471 = vrot.lane.b32.xlu1 %v6508_v16, %s6704_s5  ;;  %4465 = vrot.lane.b32.xlu0 %v6504_v60, %s6704_s5  ;;  %v9508_v60 = vpop.xlane.xlu1 %3659  ;;  %v4403_v16 = vadd.f32 1.0, %v6522_v46  ;;  %6537 = vpow2.f32 %v5205_v30 }
 0x881   : > { %6539 = vrcp.f32 %v4403_v16 }
 0x883   : > { %4567 = vrot.lane.b32.xlu1 %v4527_v21, %s6704_s5  ;;  %4561 = vrot.lane.b32.xlu0 %v4524_v34, %s6704_s5  ;;  %v9519_v21 = vpop.xlane.xlu1 %3665  ;;  %v6528_v34 = vpop.eup %6527 }
 0x884   : > { %v6530_v22 = vpop.eup %6529  ;;  %v4128_v2 = vmul.f32 %v6528_v34, %v6528_v34 }
 0x885   : > { %v6532_v18 = vpop.eup %6531  ;;  %v4005_v19 = vadd.f32 1.0, %v6530_v22  ;;  %v4342_v22 = vadd.f32 %v9538_v38, %v9499_v47 }
 0x886   : > { %v4131_v36 = vmul.f32 %v6532_v18, %v6532_v18  ;;  %v6534_v4 = vpop.eup %6533 }
 0x887   : > { %4075 = vrot.lane.b32.xlu1 %v6516_v49, %s6703_s4  ;;  %4069 = vrot.lane.b32.xlu0 %v6512_v48, %s6703_s4  ;;  %v4002_v48 = vadd.f32 1.0, %v6526_v1  ;;  %v9525_v49 = vpop.xlane.xlu1 %3671  ;;  %v6536_v13 = vpop.eup %6535 }
 0x888   : > { %v4528_v0 = vmul.f32 %v6536_v13, %v6536_v13 }
 0x889   : > { %6541 = vrcp.f32 %v4002_v48  ;;  %v6538_v12 = vpop.eup %6537 }
 0x88a   : > { %6543 = vpow2.f32 %v5188_v40 }
 0x88b   : > { %4171 = vrot.lane.b32.xlu1 %v4129_v23, %s6703_s4  ;;  %4165 = vrot.lane.b32.xlu0 %v4126_v33, %s6703_s4  ;;  %6545 = vrcp.f32 %v4005_v19  ;;  %v6540_v23 = vpop.eup %6539  ;;  %v4402_v33 = vadd.f32 1.0, %v6534_v4  ;;  %v9531_v44 = vpop.xlane.xlu1 %3677 }
 0x88c   : > { %v4531_v46 = vmul.f32 %v6540_v23, %v6540_v23 }
 0x88d   : > { %6547 = vrcp.f32 %v4402_v33 }
 0x88e   : > { %6549 = vpow2.f32 %v5204_v55 }
 0x88f   : > { %4475 = vrot.lane.b32.xlu1 %v6524_v54, %s6704_s5  ;;  %4469 = vrot.lane.b32.xlu0 %v6520_v15, %s6704_s5  ;;  %v4405_v15 = vadd.f32 1.0, %v6538_v12  ;;  %v3942_v54 = vadd.f32 %v9538_v38, %v9489_v32  ;;  %v9544_v16 = vpop.xlane.xlu1 %3683 }
 0x891   : > { %6551 = vrcp.f32 %v4405_v15 }
 0x893   : > { %4571 = vrot.lane.b32.xlu1 %v4529_v43, %s6704_s5  ;;  %4565 = vrot.lane.b32.xlu0 %v4526_v6, %s6704_s5  ;;  %v6542_v31 = vpop.eup %6541  ;;  %v5190_v6 = vmul.f32 -1.442695, %v3942_v54 }
 0x894   : > { %v6544_v30 = vpop.eup %6543  ;;  %v4130_v32 = vmul.f32 %v6542_v31, %v6542_v31 }
 0x895   : > { %v6546_v43 = vpop.eup %6545  ;;  %v4004_v1 = vadd.f32 1.0, %v6544_v30  ;;  %6553 = vpow2.f32 %v5190_v6 }
 0x897   : > { %4079 = vrot.lane.b32.xlu1 %v6532_v18, %s6703_s4  ;;  %4073 = vrot.lane.b32.xlu0 %v6528_v34, %s6703_s4  ;;  %v4133_v34 = vmul.f32 %v6546_v43, %v6546_v43  ;;  %v9552_v18 = vpop.xlane.xlu1 %3689  ;;  %v6548_v48 = vpop.eup %6547  ;;  %6555 = vrcp.f32 %v4004_v1 }
 0x898   : > { %v6550_v40 = vpop.eup %6549  ;;  %v4530_v51 = vmul.f32 %v6548_v48, %v6548_v48 }
 0x899   : > { %v4404_v47 = vadd.f32 1.0, %v6550_v40 }
 0x89b   : > { %4175 = vrot.lane.b32.xlu1 %v4131_v36, %s6703_s4  ;;  %4169 = vrot.lane.b32.xlu0 %v4128_v2, %s6703_s4  ;;  %v9556_v19 = vpop.eup %6551  ;;  %v9558_v36 = vpop.xlane.xlu0 %3662  ;;  %v5206_v2 = vmul.f32 -1.442695, %v4342_v22 }
 0x89c   : > { %v9560_v4 = vpop.xlane.xlu1 %3695 }
 0x89d   : > { %6557 = vpow2.f32 %v5206_v2 }
 0x89e   : > { %6559 = vrcp.f32 %v4404_v47 }
 0x89f   : > { %4479 = vrot.lane.b32.xlu1 %v6540_v23, %s6704_s5  ;;  %4473 = vrot.lane.b32.xlu0 %v6536_v13, %s6704_s5  ;;  %v9570_v12 = vpop.xlane.xlu0 %3668  ;;  %v6554_v23 = vpop.eup %6553 }
 0x8a0   : > { %v4006_v15 = vadd.f32 1.0, %v6554_v23 }
 0x8a1   : > { %v6556_v33 = vpop.eup %6555 }
 0x8a2   : > { %6561 = vrcp.f32 %v4006_v15 }
 0x8a3   : > { %4575 = vrot.lane.b32.xlu1 %v4531_v46, %s6704_s5  ;;  %4569 = vrot.lane.b32.xlu0 %v4528_v0, %s6704_s5  ;;  %v4132_v46 = vmul.f32 %v6556_v33, %v6556_v33  ;;  %v9577_v0 = vpop.xlane.xlu0 %3674 }
 0x8a7   : > { %4077 = vrot.lane.b32.xlu0 %v6542_v31, %s6703_s4  ;;  %4083 = vrot.lane.b32.xlu1 %v6546_v43, %s6703_s4  ;;  %v3681_v43 = vpop.xlane.xlu0 %3680 }
 0x8a8   : > { %v3711_v23 = vadd.f32 %v9414_v7, %v3681_v43 }
 0x8ab   : > { %4173 = vrot.lane.b32.xlu0 %v4130_v32, %s6703_s4  ;;  %4179 = vrot.lane.b32.xlu1 %v4133_v34, %s6703_s4  ;;  %v3687_v32 = vpop.xlane.xlu0 %3686 }
 0x8af   : > { %4477 = vrot.lane.b32.xlu0 %v6548_v48, %s6704_s5  ;;  %4483 = vrot.lane.b32.xlu1 %v9556_v19, %s6704_s5  ;;  %v9599_v22 = vpop.xlane.xlu0 %3692 }
 0x8b3   : > { %v9565_v13 = vpop.xlane.xlu1 %3701  ;;  %4573 = vrot.lane.b32.xlu0 %v4530_v51, %s6704_s5  ;;  %2628 = vrot.lane.b32.xlu1 %v9265_v5, %s6707_s20  ;;  %v6558_v5 = vpop.eup %6557 }
 0x8b4   : > { %v6560_v31 = vpop.eup %6559 }
 0x8b5   : > { %v4532_v6 = vmul.f32 %v6560_v31, %v6560_v31 }
 0x8b7   : > { %v9572_v55 = vpop.permute.xlu1 %4055  ;;  %4081 = vrot.lane.b32.xlu0 %v6556_v33, %s6703_s4  ;;  %2630 = vrot.lane.b32.xlu1 %v9279_v26, %s6707_s20  ;;  %v4406_v26 = vadd.f32 1.0, %v6558_v5 }
 0x8b9   : > { %6563 = vrcp.f32 %v4406_v26 }
 0x8bb   : > { %v9579_v54 = vpop.permute.xlu1 %4151  ;;  %4177 = vrot.lane.b32.xlu0 %v4132_v46, %s6703_s4  ;;  %2634 = vrot.lane.b32.xlu1 %v9285_v61, %s6707_s20  ;;  %v6562_v61 = vpop.eup %6561 }
 0x8bf   : > { %v9584_v30 = vpop.permute.xlu1 %4455  ;;  %4481 = vrot.lane.b32.xlu0 %v6560_v31, %s6704_s5  ;;  %2638 = vrot.lane.b32.xlu1 %v9295_v63, %s6707_s20  ;;  %v4134_v63 = vmul.f32 %v6562_v61, %v6562_v61 }
 0x8c3   : > { %v9589_v1 = vpop.permute.xlu1 %4551  ;;  %4577 = vrot.lane.b32.xlu0 %v4532_v6, %s6704_s5  ;;  %2642 = vrot.lane.b32.xlu1 %v9301_v24, %s6707_s20  ;;  %v9606_v24 = vpop.eup %6563 }
 0x8c7   : > { %v9594_v34 = vpop.permute.xlu1 %4059  ;;  %4085 = vrot.lane.b32.xlu0 %v6562_v61, %s6703_s4  ;;  %2646 = vrot.lane.b32.xlu1 %v9305_v53, %s6707_s20  ;;  %v3703_v61 = vadd.f32 %v9310_v42, %v9548_v29 }
 0x8c9   : > { %v5159_v42 = vmul.f32 -1.442695, %v3703_v61 }
 0x8cb   : > { %v9601_v48 = vpop.permute.xlu1 %4155  ;;  %4181 = vrot.lane.b32.xlu0 %v4134_v63, %s6703_s4  ;;  %2650 = vrot.lane.b32.xlu1 %v9316_v8, %s6707_s20  ;;  %s6712_s4 = smov 97  }
 0x8ce   : > { %v9608_v40 = vpop.xlane.xlu0 %3698 }
 0x8cf   : > { %v9610_v2 = vpop.permute.xlu1 %4459  ;;  %4485 = vrot.lane.b32.xlu0 %v9606_v24, %s6704_s5  ;;  %2654 = vrot.lane.b32.xlu1 %v9324_v11, %s6707_s20  ;;  %v5167_v11 = vmul.f32 -1.442695, %v3711_v23 }
 0x8d1   : > { %6565 = vpow2.f32 %v5167_v11 }
 0x8d2   : > { %v9616_v53 = vpop.permute.xlu0 %4057 }
 0x8d3   : > { %v9618_v47 = vpop.permute.xlu1 %4555  ;;  %2626 = vrot.lane.b32.xlu0 %v9269_v39, %s6707_s20 }
 0x8d6   : > { %v9622_v8 = vpop.permute.xlu0 %4153 }
 0x8d7   : > { %v9624_v51 = vpop.permute.xlu1 %4063  ;;  %2632 = vrot.lane.b32.xlu0 %v9276_v35, %s6707_s20 }
 0x8da   : > { %v9629_v33 = vpop.permute.xlu0 %4457 }
 0x8db   : > { %v9631_v15 = vpop.permute.xlu1 %4159  ;;  %2636 = vrot.lane.b32.xlu0 %v9282_v41, %s6707_s20  ;;  %v3704_v41 = vadd.f32 %v9350_v10, %v9508_v60  ;;  %v3708_v60 = vadd.f32 %v9407_v57, %v9525_v49  ;;  %v3709_v57 = vadd.f32 %v9392_v20, %v9577_v0 }
 0x8dd   : > { %v5160_v6 = vmul.f32 -1.442695, %v3704_v41 }
 0x8de   : > { %v9635_v46 = vpop.permute.xlu0 %4553 }
 0x8df   : > { %v9637_v39 = vpop.permute.xlu1 %4463  ;;  %2640 = vrot.lane.b32.xlu0 %v9293_v3, %s6707_s20  ;;  %v3713_v3 = vadd.f32 %v9439_v28, %v3687_v32  ;;  %6567 = vpow2.f32 %v5160_v6  ;;  %v3712_v32 = vadd.f32 %v9458_v25, %v9544_v16 }
 0x8e1   : > { %v5169_v63 = vmul.f32 -1.442695, %v3713_v3  ;;  %v5168_v16 = vmul.f32 -1.442695, %v3712_v32 }
 0x8e2   : > { %v9641_v5 = vpop.permute.xlu0 %4061 }
 0x8e3   : > { %v9643_v35 = vpop.permute.xlu1 %4559  ;;  %2644 = vrot.lane.b32.xlu0 %v9298_v9, %s6707_s20  ;;  %v6566_v9 = vpop.eup %6565  ;;  %6569 = vpow2.f32 %v5169_v63 }
 0x8e4   : > { %v3775_v10 = vadd.f32 1.0, %v6566_v9 }
 0x8e6   : > { %v9647_v7 = vpop.permute.xlu0 %4157  ;;  %6571 = vrcp.f32 %v3775_v10 }
 0x8e7   : > { %v9649_v31 = vpop.permute.xlu1 %4067  ;;  %2648 = vrot.lane.b32.xlu0 %v9303_v45, %s6707_s20  ;;  %v3706_v45 = vadd.f32 %v9385_v58, %v9519_v21  ;;  %v3710_v58 = vadd.f32 %v9432_v14, %v9531_v44  ;;  %6573 = vpow2.f32 %v5159_v42 }
 0x8e9   : > { %v5162_v29 = vmul.f32 -1.442695, %v3706_v45  ;;  %v5166_v14 = vmul.f32 -1.442695, %v3710_v58  ;;  %v6568_v6 = vpop.eup %6567 }
 0x8ea   : > { %v9656_v26 = vpop.permute.xlu0 %4461 }
 0x8eb   : > { %v9658_v43 = vpop.permute.xlu1 %4163  ;;  %2652 = vrot.lane.b32.xlu0 %v9314_v37, %s6707_s20  ;;  %v3705_v37 = vadd.f32 %v9333_v50, %v9558_v36  ;;  %v3707_v50 = vadd.f32 %v9359_v17, %v9570_v12  ;;  %v5164_v36 = vmul.f32 -1.442695, %v3708_v60  ;;  %6575 = vpow2.f32 %v5162_v29 }
 0x8ec   : > { %v3715_v17 = vadd.f32 %v9465_v56, %v9599_v22  ;;  %v5165_v12 = vmul.f32 -1.442695, %v3709_v57  ;;  %v3714_v56 = vadd.f32 %v9485_v62, %v9552_v18 }
 0x8ed   : > { %v5161_v11 = vmul.f32 -1.442695, %v3705_v37  ;;  %v5163_v3 = vmul.f32 -1.442695, %v3707_v50  ;;  %v6570_v45 = vpop.eup %6569  ;;  %v3768_v50 = vadd.f32 1.0, %v6568_v6 }
 0x8ee   : > { %v9666_v23 = vpop.permute.xlu0 %4557  ;;  %v5171_v63 = vmul.f32 -1.442695, %v3715_v17  ;;  %v3777_v58 = vadd.f32 1.0, %v6570_v45  ;;  %v5170_v62 = vmul.f32 -1.442695, %v3714_v56 }
 0x8ef   : > { %v9668_v28 = vpop.permute.xlu1 %4467  ;;  %2656 = vrot.lane.b32.xlu0 %v9322_v52, %s6707_s20  ;;  %6577 = vpow2.f32 %v5161_v11 }
 0x8f0   : > { %6579 = vpow2.f32 %v5164_v36  ;;  %v6572_v10 = vpop.eup %6571 }
 0x8f1   : > { %6581 = vpow2.f32 %v5166_v14  ;;  %v6574_v29 = vpop.eup %6573  ;;  %v3839_v36 = vmul.f32 %v6572_v10, %v6572_v10 }
 0x8f2   : > { %v9678_v21 = vpop.permute.xlu0 %4065  ;;  %6583 = vpow2.f32 %v5168_v16  ;;  %v3767_v14 = vadd.f32 1.0, %v6574_v29 }
 0x8f3   : > { %v9682_v52 = vpop.permute.xlu1 %4563  ;;  %6585 = vpow2.f32 %v5163_v3 }
 0x8f4   : > { %6587 = vpow2.f32 %v5165_v12 }
 0x8f5   : > { %v5705_v49 = vpop.f32.mrb[64].mxu0  ;;  %v6576_v11 = vpop.eup %6575  ;;  %6589 = vpow2.f32 %v5171_v63 }
 0x8f6   : > { %v9688_v44 = vpop.permute.xlu0 %4161  ;;  %3529 = vrot.lane.b32.xlu0 %v5705_v49, %s6707_s20  ;;  %v3432_v25 = vpop.f32.mrb[65].mxu0  ;;  %v3770_v17 = vadd.f32 1.0, %v6576_v11  ;;  %6591 = vrcp.f32 %v3777_v58 }
 0x8f7   : > { %v4072_v41 = vpop.permute.xlu1 %4071  ;;  %3527 = vrot.lane.b32.xlu1 %v3432_v25, %s6707_s20  ;;  %6593 = vrcp.f32 %v3768_v50 }
 0x8f8   : > { %v4111_v37 = vadd.f32 %v6572_v10, %v4072_v41  ;;  %6595 = vpow2.f32 %v5170_v62  ;;  %v3717_v62 = vadd.f32 %v9494_v59, %v9608_v40 }
 0x8f9   : > { %v5708_v20 = vpop.f32.mrb[66].mxu0  ;;  %v6578_v49 = vpop.eup %6577  ;;  %6597 = vrcp.f32 %v3767_v14 }
 0x8fa   : > { %v9694_v0 = vpop.permute.xlu0 %4465  ;;  %3533 = vrot.lane.b32.xlu0 %v5708_v20, %s6707_s20  ;;  %v3442_v9 = vpop.f32.mrb[67].mxu0  ;;  %v3769_v45 = vadd.f32 1.0, %v6578_v49  ;;  %6599 = vrcp.f32 %v3770_v17  ;;  %v5173_v59 = vmul.f32 -1.442695, %v3717_v62 }
 0x8fb   : > { %v4168_v61 = vpop.permute.xlu1 %4167  ;;  %3531 = vrot.lane.b32.xlu1 %v3442_v9, %s6707_s20  ;;  %v6580_v3 = vpop.eup %6579 }
 0x8fc   : > { %v4207_v25 = vadd.f32 %v4168_v61, %v3839_v36  ;;  %v6582_v20 = vpop.eup %6581  ;;  %v3772_v10 = vadd.f32 1.0, %v6580_v3  ;;  %6601 = vrcp.f32 %v3769_v45 }
 0x8fd   : > { %v5711_v22 = vpop.f32.mrb[68].mxu0  ;;  %v6584_v6 = vpop.eup %6583 }
 0x8fe   : > { %v9700_v60 = vpop.permute.xlu0 %4561  ;;  %3537 = vrot.lane.b32.xlu0 %v5711_v22, %s6707_s20  ;;  %v3452_v42 = vpop.f32.mrb[69].mxu0  ;;  %v3776_v58 = vadd.f32 1.0, %v6584_v6  ;;  %6603 = vrcp.f32 %v3772_v10 }
 0x8ff   : > { %v4472_v32 = vpop.permute.xlu1 %4471  ;;  %3535 = vrot.lane.b32.xlu1 %v3452_v42, %s6707_s20  ;;  %v6586_v61 = vpop.eup %6585  ;;  %v3774_v42 = vadd.f32 1.0, %v6582_v20 }
 0x900   : > { %v9704_v57 = vadd.f32 %v4472_v32, %v4111_v37  ;;  %v6588_v37 = vpop.eup %6587  ;;  %v3771_v32 = vadd.f32 1.0, %v6586_v61 }
 0x901   : > { %v5714_v18 = vpop.f32.mrb[70].mxu0  ;;  %v6590_v50 = vpop.eup %6589  ;;  %v3773_v36 = vadd.f32 1.0, %v6588_v37  ;;  %6605 = vrcp.f32 %v3774_v42 }
 0x902   : > { %v9706_v16 = vpop.permute.xlu0 %4069  ;;  %3541 = vrot.lane.b32.xlu0 %v5714_v18, %s6707_s20  ;;  %v3462_v41 = vpop.f32.mrb[71].mxu0  ;;  %6607 = vrcp.f32 %v3776_v58 }
 0x903   : > { %v4568_v12 = vpop.permute.xlu1 %4567  ;;  %3539 = vrot.lane.b32.xlu1 %v3462_v41, %s6707_s20  ;;  %6609 = vrcp.f32 %v3771_v32  ;;  %v3779_v41 = vadd.f32 1.0, %v6590_v50 }
 0x904   : > { %v9710_v9 = vadd.f32 %v4568_v12, %v4207_v25  ;;  %v6592_v25 = vpop.eup %6591  ;;  %v3716_v12 = vadd.f32 %v9515_v27, %v9560_v4  ;;  %6611 = vrcp.f32 %v3773_v36 }
 0x905   : > { %v5717_v63 = vpop.f32.mrb[72].mxu0  ;;  %v6594_v17 = vpop.eup %6593  ;;  %v3841_v10 = vmul.f32 %v6592_v25, %v6592_v25  ;;  %6613 = vrcp.f32 %v3779_v41  ;;  %v4534_v41 = vmul.f32 %v9606_v24, %v9606_v24 }
 0x906   : > { %v9712_v56 = vpop.permute.xlu0 %4165  ;;  %3545 = vrot.lane.b32.xlu0 %v5717_v63, %s6707_s20  ;;  %v3472_v22 = vpop.f32.mrb[73].mxu0  ;;  %v3832_v42 = vmul.f32 %v6594_v17, %v6594_v17  ;;  %v5172_v4 = vmul.f32 -1.442695, %v3716_v12  ;;  %6615 = vpow2.f32 %v5173_v59 }
 0x907   : > { %v4076_v29 = vpop.permute.xlu1 %4075  ;;  %3543 = vrot.lane.b32.xlu1 %v3472_v22, %s6707_s20  ;;  %v6596_v45 = vpop.eup %6595 }
 0x908   : > { %v4113_v40 = vadd.f32 %v6592_v25, %v4076_v29  ;;  %v6598_v61 = vpop.eup %6597  ;;  %v4104_v29 = vadd.f32 %v6594_v17, %v9616_v53  ;;  %v3778_v36 = vadd.f32 1.0, %v6596_v45  ;;  %6617 = vpow2.f32 %v5172_v4 }
 0x909   : > { %v5720_v11 = vpop.f32.mrb[74].mxu0  ;;  %v6600_v37 = vpop.eup %6599  ;;  %v3831_v62 = vmul.f32 %v6598_v61, %v6598_v61  ;;  %v4103_v12 = vadd.f32 %v6598_v61, %v9572_v55 }
 0x90a   : > { %v9718_v18 = vpop.permute.xlu0 %4469  ;;  %3549 = vrot.lane.b32.xlu0 %v5720_v11, %s6707_s20  ;;  %v3482_v49 = vpop.f32.mrb[75].mxu0  ;;  %v4504_v53 = vadd.f32 %v9629_v33, %v4104_v29  ;;  %6619 = vrcp.f32 %v3778_v36 }
 0x90b   : > { %v4172_v14 = vpop.permute.xlu1 %4171  ;;  %3547 = vrot.lane.b32.xlu1 %v3482_v49, %s6707_s20  ;;  %v6602_v50 = vpop.eup %6601  ;;  %v4200_v49 = vadd.f32 %v9622_v8, %v3832_v42  ;;  %v4533_v8 = vmul.f32 %v9556_v19, %v9556_v19  ;;  %v4503_v24 = vadd.f32 %v9584_v30, %v4103_v12 }
 0x90c   : > { %v4209_v58 = vadd.f32 %v4172_v14, %v3841_v10  ;;  %v3834_v14 = vmul.f32 %v6600_v37, %v6600_v37  ;;  %v4105_v29 = vadd.f32 %v6602_v50, %v9594_v34 }
 0x90d   : > { %v5723_v3 = vpop.f32.mrb[76].mxu0  ;;  %v6157_v30 = vpack.i.bf16 %v4504_v53, %v4503_v24 }
 0x90e   : > { %v9724_v20 = vpop.permute.xlu0 %4565  ;;  %3553 = vrot.lane.b32.xlu0 %v5723_v3, %s6707_s20  ;;  %v3492_v6 = vpop.f32.mrb[77].mxu0  ;;  %v4202_v55 = vadd.f32 %v9647_v7, %v3834_v14 }
 0x90f   : > { %v4476_v63 = vpop.permute.xlu1 %4475  ;;  %3551 = vrot.lane.b32.xlu1 %v3492_v6, %s6707_s20  ;;  %v6604_v3 = vpop.eup %6603  ;;  %v4600_v6 = vadd.f32 %v9635_v46, %v4200_v49 }
 0x910   : > { %v9728_v22 = vadd.f32 %v4476_v63, %v4113_v40  ;;  %v6606_v59 = vpop.eup %6605  ;;  %v4199_v40 = vadd.f32 %v9579_v54, %v3831_v62  ;;  %v3833_v63 = vmul.f32 %v6602_v50, %v6602_v50  ;;  %v4106_v54 = vadd.f32 %v6600_v37, %v9641_v5 }
 0x911   : > { %v5726_v27 = vpop.f32.mrb[78].mxu0  ;;  %v6608_v45 = vpop.eup %6607  ;;  %v3836_v46 = vmul.f32 %v6604_v3, %v6604_v3  ;;  %v4602_v4 = vadd.f32 %v9666_v23, %v4202_v55  ;;  %v3838_v7 = vmul.f32 %v6606_v59, %v6606_v59  ;;  %v4108_v37 = vadd.f32 %v6604_v3, %v9678_v21 }
 0x912   : > { %v4074_v32 = vpop.permute.xlu0 %4073  ;;  %3557 = vrot.lane.b32.xlu0 %v5726_v27, %s6707_s20  ;;  %v3502_v11 = vpop.f32.mrb[79].mxu0  ;;  %v4599_v10 = vadd.f32 %v9589_v1, %v4199_v40  ;;  %v4201_v27 = vadd.f32 %v9601_v48, %v3833_v63  ;;  %v3840_v62 = vmul.f32 %v6608_v45, %v6608_v45 }
 0x913   : > { %v4572_v25 = vpop.permute.xlu1 %4571  ;;  %3555 = vrot.lane.b32.xlu1 %v3502_v11, %s6707_s20  ;;  %v6610_v33 = vpop.eup %6609  ;;  %v4506_v11 = vadd.f32 %v9656_v26, %v4106_v54  ;;  %v4112_v36 = vadd.f32 %v6608_v45, %v4074_v32  ;;  %v4508_v3 = vadd.f32 %v9694_v0, %v4108_v37  ;;  %v4206_v40 = vadd.f32 %v9712_v56, %v3838_v7 }
 0x914   : > { %v9738_v17 = vadd.f32 %v4572_v25, %v4209_v58  ;;  %v6612_v19 = vpop.eup %6611  ;;  %v6162_v58 = vpack.i.bf16 %v4600_v6, %v4599_v10  ;;  %v4601_v1 = vadd.f32 %v9618_v47, %v4201_v27  ;;  %v3835_v5 = vmul.f32 %v6610_v33, %v6610_v33 }
 0x915   : > { %v6614_v48 = vpop.eup %6613  ;;  %v4505_v25 = vadd.f32 %v9610_v2, %v4105_v29  ;;  %v3837_v23 = vmul.f32 %v6612_v19, %v6612_v19  ;;  %v4107_v26 = vadd.f32 %v6610_v33, %v9624_v51  ;;  %v4110_v0 = vadd.f32 %v6606_v59, %v9706_v16 }
 0x916   : > { %v4170_v61 = vpop.permute.xlu0 %4169  ;;  %4581 = vrot.lane.b32.xlu0 %v4534_v41, %s6704_s5  ;;  %v4204_v41 = vadd.f32 %v9688_v44, %v3836_v46  ;;  %v6616_v47 = vpop.eup %6615  ;;  %v4203_v21 = vadd.f32 %v9631_v15, %v3835_v5  ;;  %v6172_v32 = vpack.i.bf16 %v4602_v4, %v4601_v1  ;;  %v4606_v56 = vadd.f32 %v9724_v20, %v4206_v40 }
 0x917   : > { %v4080_v42 = vpop.permute.xlu1 %4079  ;;  %4579 = vrot.lane.b32.xlu1 %v4533_v8, %s6704_s5  ;;  %v6167_v12 = vpack.i.bf16 %v4506_v11, %v4505_v25  ;;  %v4208_v53 = vadd.f32 %v4170_v61, %v3840_v62  ;;  %v4507_v14 = vadd.f32 %v9637_v39, %v4107_v26  ;;  %v3843_v8 = vmul.f32 %v6614_v48, %v6614_v48  ;;  %v6618_v63 = vpop.eup %6617 }
 0x918   : > { %v4604_v2 = vadd.f32 %v9700_v60, %v4204_v41  ;;  %v4115_v6 = vadd.f32 %v6614_v48, %v4080_v42  ;;  %v3781_v51 = vadd.f32 1.0, %v6616_v47  ;;  %v4603_v15 = vadd.f32 %v9643_v35, %v4203_v21  ;;  %v6620_v33 = vpop.eup %6619 }
 0x919   : > { %v4205_v39 = vadd.f32 %v9658_v43, %v3837_v23  ;;  %v6177_v55 = vpack.i.bf16 %v4508_v3, %v4507_v14  ;;  %v4109_v10 = vadd.f32 %v6612_v19, %v9649_v31  ;;  %v4510_v35 = vadd.f32 %v9718_v18, %v4110_v0 }
 0x91a   : > { %v4474_v49 = vpop.permute.xlu0 %4473  ;;  %6158 = vrot.lane.b32.xlu0 %v6157_v30, %s6707_s20  ;;  %v6182_v54 = vpack.i.bf16 %v4604_v2, %v4603_v15  ;;  %6621 = vrcp.f32 %v3781_v51  ;;  %v3718_v18 = vadd.f32 %v9538_v38, %v9565_v13  ;;  %v3780_v29 = vadd.f32 1.0, %v6618_v63 }
 0x91b   : > { %v9759_v34 = vadd.f32 %v4474_v49, %v4112_v36  ;;  %v4176_v50 = vpop.permute.xlu1 %4175  ;;  %6163 = vrot.lane.b32.xlu1 %v6162_v58, %s6712_s4  ;;  %v4605_v59 = vadd.f32 %v9682_v52, %v4205_v39  ;;  %v4509_v43 = vadd.f32 %v9668_v28, %v4109_v10  ;;  %v3842_v58 = vmul.f32 %v6620_v33, %v6620_v33 }
 0x91c   : > { %v4211_v46 = vadd.f32 %v4176_v50, %v3843_v8  ;;  %v5174_v4 = vmul.f32 -1.442695, %v3718_v18 }
 0x91d   : > { %v6207_v44 = vpack.i.bf16 %v9759_v34, %v9704_v57  ;;  %v6192_v27 = vpack.i.bf16 %v4606_v56, %v4605_v59  ;;  %v6187_v19 = vpack.i.bf16 %v4510_v35, %v4509_v43 }
 0x91e   : > { %v4570_v45 = vpop.permute.xlu0 %4569  ;;  %6173 = vrot.lane.b32.xlu0 %v6172_v32, %s6712_s4  ;;  %6623 = vpow2.f32 %v5174_v4  ;;  %v6689_v4 = vld [vmem:[%s9938_s2 + $0x40] ss:$0 sm:$0xff] }
 0x91f   : > { %v9773_v24 = vadd.f32 %v4570_v45, %v4208_v53  ;;  %v4480_v60 = vpop.permute.xlu1 %4479  ;;  %6168 = vrot.lane.b32.xlu1 %v6167_v12, %s6707_s20  ;;  %6625 = vrcp.f32 %v3780_v29 }
 0x920   : > { %v9778_v61 = vadd.f32 %v4480_v60, %v4115_v6 }
 0x921   : > { %v6212_v16 = vpack.i.bf16 %v9773_v24, %v9710_v9 }
 0x922   : > { %v4078_v42 = vpop.permute.xlu0 %4077  ;;  %6178 = vrot.lane.b32.xlu0 %v6177_v55, %s6707_s20 }
 0x923   : > { %v4576_v20 = vpop.permute.xlu1 %4575  ;;  %6183 = vrot.lane.b32.xlu1 %v6182_v54, %s6712_s4  ;;  %v4114_v7 = vadd.f32 %v6620_v33, %v4078_v42 }
 0x924   : > { %v9788_v31 = vadd.f32 %v4576_v20, %v4211_v46  ;;  %v9798_v1 = vpop.eup %6621 }
 0x926   : > { %v4174_v30 = vpop.permute.xlu0 %4173  ;;  %6193 = vrot.lane.b32.xlu0 %v6192_v27, %s6712_s4 }
 0x927   : > { %v4084_v52 = vpop.permute.xlu1 %4083  ;;  %6188 = vrot.lane.b32.xlu1 %v6187_v19, %s6707_s20  ;;  %v4210_v38 = vadd.f32 %v4174_v30, %v3842_v58 }
 0x928   : > { %v4117_v5 = vadd.f32 %v9798_v1, %v4084_v52  ;;  %v6624_v50 = vpop.eup %6623 }
 0x929   : > { %v6626_v47 = vpop.eup %6625  ;;  %v3782_v21 = vadd.f32 1.0, %v6624_v50 }
 0x92a   : > { %v4478_v28 = vpop.permute.xlu0 %4477  ;;  %v3844_v12 = vmul.f32 %v6626_v47, %v6626_v47 }
 0x92b   : > { %v9794_v11 = vadd.f32 %v4478_v28, %v4114_v7  ;;  %v9796_v36 = vpop.permute.xlu1 %4179  ;;  %6627 = vrcp.f32 %v3782_v21 }
 0x92d   : > { %v6222_v13 = vpack.i.bf16 %v9794_v11, %v9728_v22 }
 0x92e   : > { %v4574_v37 = vpop.permute.xlu0 %4573 }
 0x92f   : > { %v9803_v62 = vadd.f32 %v4574_v37, %v4210_v38  ;;  %v4484_v49 = vpop.permute.xlu1 %4483 }
 0x930   : > { %v9805_v48 = vadd.f32 %v4484_v49, %v4117_v5 }
 0x931   : > { %v6232_v25 = vpack.i.bf16 %v9803_v62, %v9738_v17 }
 0x932   : > { %v4082_v23 = vpop.permute.xlu0 %4081 }
 0x933   : > { %v4116_v26 = vadd.f32 %v6626_v47, %v4082_v23  ;;  %v2629_v3 = vpop.permute.xlu1 %2628 }
 0x934   : > { %v2675_v7 = vadd.f32 %v6689_v4, %v2629_v3 }
 0x935   : > { %v9819_v60 = vpop.eup %6627 }
 0x936   : > { %v4178_v41 = vpop.permute.xlu0 %4177 }
 0x937   : > { %v4212_v53 = vadd.f32 %v4178_v41, %v3844_v12  ;;  %v2631_v8 = vpop.permute.xlu1 %2630 }
 0x938   : > { %v2676_v37 = vadd.f32 %v6689_v4, %v2631_v8 }
 0x93a   : > { %v4482_v32 = vpop.permute.xlu0 %4481 }
 0x93b   : > { %v9809_v2 = vadd.f32 %v4482_v32, %v4116_v26  ;;  %v2635_v0 = vpop.permute.xlu1 %2634 }
 0x93c   : > { %v2678_v21 = vadd.f32 %v6689_v4, %v2635_v0 }
 0x93d   : > { %v6247_v14 = vpack.i.bf16 %v9809_v2, %v9778_v61 }
 0x93e   : > { %v4578_v40 = vpop.permute.xlu0 %4577 }
 0x93f   : > { %v9813_v6 = vadd.f32 %v4578_v40, %v4212_v53  ;;  %v2639_v56 = vpop.permute.xlu1 %2638 }
 0x940   : > { %v2680_v8 = vadd.f32 %v6689_v4, %v2639_v56 }
 0x941   : > { %v6252_v45 = vpack.i.bf16 %v9813_v6, %v9788_v31  ;;  %v10323_v6 = vld [vmem:[#allocation4_spill] sm:$0xff] }
 0x942   : > { %v4086_v51 = vpop.permute.xlu0 %4085 }
 0x943   : > { %v4118_v63 = vadd.f32 %v9819_v60, %v4086_v51  ;;  %v2643_v35 = vpop.permute.xlu1 %2642 }
 0x946   : > { %v9817_v15 = vpop.permute.xlu0 %4181 }
 0x947   : > { %v2647_v46 = vpop.permute.xlu1 %2646 }
 0x948   : > { %v2684_v56 = vadd.f32 %v6689_v4, %v2647_v46 }
 0x94a   : > { %v4486_v39 = vpop.permute.xlu0 %4485 }
 0x94b   : > { %v9822_v55 = vadd.f32 %v4486_v39, %v4118_v63  ;;  %v2651_v20 = vpop.permute.xlu1 %2650 }
 0x94d   : > { %v6262_v33 = vpack.i.bf16 %v9822_v55, %v9805_v48 }
 0x94e   : > { %v2627_v10 = vpop.permute.xlu0 %2626 }
 0x94f   : > { %v9826_v18 = vpop.permute.xlu1 %2654  ;;  %v2674_v29 = vadd.f32 %v6689_v4, %v2627_v10 }
 0x950   : > { %v2688_v46 = vadd.f32 %v6689_v4, %v9826_v18 }
 0x952   : > { %v2633_v54 = vpop.permute.xlu0 %2632 }
 0x953   : > { %v2677_v49 = vadd.f32 %v6689_v4, %v2633_v54 }
 0x956   : > { %v2637_v59 = vpop.permute.xlu0 %2636 }
 0x957   : > { %v2679_v32 = vadd.f32 %v6689_v4, %v2637_v59  ;;  %v2682_v59 = vadd.f32 %v6689_v4, %v2643_v35 }
 0x95a   : > { %v2641_v42 = vpop.permute.xlu0 %2640 }
 0x95b   : > { %v2681_v63 = vadd.f32 %v6689_v4, %v2641_v42 }
 0x95e   : > { %v2645_v43 = vpop.permute.xlu0 %2644 }
 0x962   : > { %v2649_v27 = vpop.permute.xlu0 %2648 }
 0x963   : > { %v2685_v42 = vadd.f32 %v6689_v4, %v2649_v27  ;;  %v3845_v27 = vmul.f32 %v9798_v1, %v9798_v1  ;;  %v6713_v1 = vmov 1.0  }
 0x966   : > { %v2653_v19 = vpop.permute.xlu0 %2652 }
 0x969   : > { %v3528_v30 = vpop.permute.xlu1 %3527 }
 0x96a   : > { %v2657_v52 = vpop.permute.xlu0 %2656  ;;  %v3575_v38 = vadd.f32 %v3528_v30, %v2674_v29 }
 0x96b   : > { %v2689_v17 = vadd.f32 %v6689_v4, %v2657_v52 }
 0x96d   : > { %v3532_v28 = vpop.permute.xlu1 %3531 }
 0x96e   : > { %v3530_v58 = vpop.permute.xlu0 %3529  ;;  %v3577_v47 = vadd.f32 %v3532_v28, %v2676_v37 }
 0x96f   : > { %v3576_v5 = vadd.f32 %v3530_v58, %v2675_v7  ;;  %v2683_v7 = vadd.f32 %v6689_v4, %v2645_v43  ;;  %v2686_v43 = vadd.f32 %v6689_v4, %v2651_v20 }
 0x971   : > { %v6197_v23 = vpack.i.bf16 %v3576_v5, %v3575_v38  ;;  %v3536_v41 = vpop.permute.xlu1 %3535  ;;  %v2687_v38 = vadd.f32 %v6689_v4, %v2653_v19 }
 0x972   : > { %v3534_v50 = vpop.permute.xlu0 %3533  ;;  %v3579_v3 = vadd.f32 %v3536_v41, %v2678_v21 }
 0x973   : > { %v3578_v26 = vadd.f32 %v3534_v50, %v2677_v49  ;;  %6198 = vrot.lane.b32.xlu1 %v6197_v23, %s6711_s14 }
 0x975   : > { %v6202_v12 = vpack.i.bf16 %v3578_v26, %v3577_v47  ;;  %v3540_v53 = vpop.permute.xlu1 %3539 }
 0x976   : > { %v3538_v40 = vpop.permute.xlu0 %3537  ;;  %v3581_v30 = vadd.f32 %v3540_v53, %v2680_v8 }
 0x977   : > { %v3580_v51 = vadd.f32 %v3538_v40, %v2679_v32  ;;  %6203 = vrot.lane.b32.xlu0 %v6202_v12, %s6711_s14  ;;  %6213 = vrot.lane.b32.xlu1 %v6212_v16, %s6712_s4 }
 0x979   : > { %v6217_v39 = vpack.i.bf16 %v3580_v51, %v3579_v3  ;;  %v3544_v10 = vpop.permute.xlu1 %3543 }
 0x97a   : > { %v3542_v54 = vpop.permute.xlu0 %3541  ;;  %v3583_v24 = vadd.f32 %v3544_v10, %v2682_v59 }
 0x97b   : > { %v3582_v0 = vadd.f32 %v3542_v54, %v2681_v63  ;;  %6208 = vrot.lane.b32.xlu0 %v6207_v44, %s6707_s20  ;;  %6218 = vrot.lane.b32.xlu1 %v6217_v39, %s6711_s14 }
 0x97d   : > { %v6227_v29 = vpack.i.bf16 %v3582_v0, %v3581_v30  ;;  %v3548_v28 = vpop.permute.xlu1 %3547 }
 0x97e   : > { %v3546_v9 = vpop.permute.xlu0 %3545  ;;  %v3585_v58 = vadd.f32 %v3548_v28, %v2684_v56 }
 0x97f   : > { %v3584_v16 = vadd.f32 %v3546_v9, %v2683_v7  ;;  %6228 = vrot.lane.b32.xlu0 %v6227_v29, %s6711_s14  ;;  %6223 = vrot.lane.b32.xlu1 %v6222_v13, %s6707_s20 }
 0x981   : > { %v6237_v57 = vpack.i.bf16 %v3584_v16, %v3583_v24  ;;  %v3552_v34 = vpop.permute.xlu1 %3551 }
 0x982   : > { %v3550_v44 = vpop.permute.xlu0 %3549  ;;  %v3587_v11 = vadd.f32 %v3552_v34, %v2686_v43 }
 0x983   : > { %v3586_v35 = vadd.f32 %v3550_v44, %v2685_v42  ;;  %6233 = vrot.lane.b32.xlu0 %v6232_v25, %s6712_s4  ;;  %6238 = vrot.lane.b32.xlu1 %v6237_v57, %s6711_s14  ;;  %v3846_v25 = vmul.f32 %v9819_v60, %v9819_v60  ;;  %v4213_v60 = vadd.f32 %v9796_v36, %v3845_v27 }
 0x985   : > { %v6242_v5 = vpack.i.bf16 %v3586_v35, %v3585_v58  ;;  %v3556_v37 = vpop.permute.xlu1 %3555  ;;  %v4214_v52 = vadd.f32 %v9817_v15, %v3846_v25 }
 0x986   : > { %v3554_v22 = vpop.permute.xlu0 %3553  ;;  %v3589_v19 = vadd.f32 %v3556_v37, %v2688_v46 }
 0x987   : > { %v3588_v13 = vadd.f32 %v3554_v22, %v2687_v38  ;;  %6243 = vrot.lane.b32.xlu0 %v6242_v5, %s6711_s14  ;;  %6253 = vrot.lane.b32.xlu1 %v6252_v45, %s6712_s4  ;;  %v10324_v45 = vld [vmem:[#allocation19_spill] sm:$0xff] }
 0x988   : > { %v10325_v18 = vcvt.s32.f32 %v10324_v45 }
 0x989   : > { %v6257_v62 = vpack.i.bf16 %v3588_v13, %v3587_v11  ;;  %v4580_v31 = vpop.permute.xlu1 %4579 }
 0x98a   : > { %v3558_v20 = vpop.permute.xlu0 %3557  ;;  %vm4615_vm0 = vcmp.eq.f32.partialorder %v10325_v18, %v10323_v6  ;;  %v4613_v41 = vadd.f32 %v4580_v31, %v4213_v60 }
 0x98b   : > { %v3590_v49 = vadd.f32 %v3558_v20, %v2689_v17  ;;  %6248 = vrot.lane.b32.xlu0 %v6247_v14, %s6707_s20  ;;  %6258 = vrot.lane.b32.xlu1 %v6257_v62, %s6711_s14 }
 0x98c   : > { %5759 = vmatprep.mubr.msk.f32.mxu1 %vm4615_vm0, %v6713_v1  ;;  %vm10339_vm0 = vmmov %vm10319_vm2 }
 0x98d   : > { %v6267_v4 = vpack.i.bf16 %v3590_v49, %v3589_v19  ;;  %v6164_v36 = vpop.permute.xlu1 %6163 }
 0x98e   : > { %v4582_v23 = vpop.permute.xlu0 %4581  ;;  %v6166_v55 = vunpack.i.h.bf16 %v6164_v36 }
 0x98f   : > { %v4614_v50 = vadd.f32 %v4582_v23, %v4214_v52  ;;  %6263 = vrot.lane.b32.xlu1 %v6262_v33, %s6707_s20  ;;  %6268 = vrot.lane.b32.xlu0 %v6267_v4, %s6711_s14  ;;  %v6165_v33 = vunpack.i.l.bf16 %v6164_v36 }
 0x991   : > { %v6272_v61 = vpack.i.bf16 %v4614_v50, %v4613_v41  ;;  %v6169_v14 = vpop.permute.xlu1 %6168 }
 0x992   : > { %v6159_v2 = vpop.permute.xlu0 %6158  ;;  %v6171_v30 = vunpack.i.h.bf16 %v6169_v14  ;;  %v6170_v0 = vunpack.i.l.bf16 %v6169_v14 }
 0x993   : > { %6273 = vrot.lane.b32.xlu0 %v6272_v61, %s6712_s4  ;;  %v6161_v53 = vunpack.i.h.bf16 %v6159_v2  ;;  %v6160_v40 = vunpack.i.l.bf16 %v6159_v2 }
 0x995   : > { %v6184_v47 = vpop.permute.xlu1 %6183 }
 0x996   : > { %v6174_v15 = vpop.permute.xlu0 %6173  ;;  %v6186_v38 = vunpack.i.h.bf16 %v6184_v47  ;;  %v6185_v5 = vunpack.i.l.bf16 %v6184_v47 }
 0x997   : > { %v6176_v29 = vunpack.i.h.bf16 %v6174_v15  ;;  %v6175_v28 = vunpack.i.l.bf16 %v6174_v15 }
 0x999   : > { %v6189_v21 = vpop.permute.xlu1 %6188 }
 0x99a   : > { %v6179_v26 = vpop.permute.xlu0 %6178  ;;  %v6191_v25 = vunpack.i.h.bf16 %v6189_v21  ;;  %v6190_v20 = vunpack.i.l.bf16 %v6189_v21 }
 0x99b   : > { %v6181_v44 = vunpack.i.h.bf16 %v6179_v26  ;;  %v6180_v58 = vunpack.i.l.bf16 %v6179_v26 }
 0x99e   : > { %v6194_v32 = vpop.permute.xlu0 %6193 }
 0x99f   : > { %v6196_v49 = vunpack.i.h.bf16 %v6194_v32  ;;  %v6195_v31 = vunpack.i.l.bf16 %v6194_v32 }
 0x9e5   : > { %v6199_v12 = vpop.permute.xlu1 %6198 }
 0x9e6   : > { %v6201_v3 = vunpack.i.h.bf16 %v6199_v12  ;;  %v6200_v48 = vunpack.i.l.bf16 %v6199_v12 }
 0x9e8   : > { %v4812_v51 = vsel %vm10326_vm3, %v6201_v3, %v6161_v53  ;;  %v4811_v8 = vsel %vm10327_vm4, %v6200_v48, %v6160_v40  ;;  %vm10340_vm3 = vmmov %vm10339_vm0 }
 0x9e9   : > { %v6204_v63 = vpop.permute.xlu0 %6203  ;;  %v9881_v39 = vpop.permute.xlu1 %6213  ;;  %v4828_v10 = vsel %vm4827_vm1, %v4811_v8, %v6165_v33  ;;  %v4829_v54 = vsel %vm4827_vm1, %v4812_v51, %v6166_v55 }
 0x9ea   : > { %v6206_v59 = vunpack.i.h.bf16 %v6204_v63  ;;  %v6205_v7 = vunpack.i.l.bf16 %v6204_v63  ;;  %v5938_v9 = vpack.c.bf16 %v4829_v54, %v4828_v10  ;;  %v6216_v14 = vunpack.i.h.bf16 %v9881_v39 }
 0x9eb   : > { %v6215_v15 = vunpack.i.l.bf16 %v9881_v39 }
 0x9ec   : > { %v4813_v24 = vsel %vm10328_vm5, %v6205_v7, %v6170_v0  ;;  %v4814_v16 = vsel %vm10329_vm6, %v6206_v59, %v6171_v30  ;;  %5939 = vmatprep.subr.bf16.mxu1 %v5938_v9  ;;  %vm10344_vm5 = vmmov %vm10339_vm0  ;;  %vm4968_vm6 = vcmask 7168  }
 0x9ed   : > { %v6209_v56 = vpop.permute.xlu0 %6208  ;;  %v6219_v42 = vpop.permute.xlu1 %6218  ;;  %v4830_v57 = vsel %vm4827_vm1, %v4813_v24, %v6175_v28  ;;  %v4831_v34 = vsel %vm4827_vm1, %v4814_v16, %v6176_v29  ;;  %5941 = vmatpush3.bf16.msra.mxu1 %v5938_v9 }
 0x9ee   : > { %v6221_v35 = vunpack.i.h.bf16 %v6219_v42  ;;  %v6220_v43 = vunpack.i.l.bf16 %v6219_v42  ;;  %v5942_v37 = vpack.c.bf16 %v4831_v34, %v4830_v57  ;;  %v6211_v50 = vunpack.i.h.bf16 %v6209_v56 }
 0x9ef   : > { %v6210_v61 = vunpack.i.l.bf16 %v6209_v56 }
 0x9f0   : > { %v4816_v22 = vsel %vm10330_vm7, %v6221_v35, %v6181_v44  ;;  %v4815_v11 = vsel %vm10331_vm8, %v6220_v43, %v6180_v58  ;;  %5943 = vmatprep.subr.bf16.mxu1 %v5942_v37  ;;  %vm4979_vm7 = vcmask 15368  }
 0x9f1   : > { %v6229_v13 = vpop.permute.xlu0 %6228  ;;  %v6224_v46 = vpop.permute.xlu1 %6223  ;;  %v4832_v17 = vsel %vm4827_vm1, %v4815_v11, %v6185_v5  ;;  %v4833_v62 = vsel %vm4827_vm1, %v4816_v22, %v6186_v38  ;;  %5945 = vmatpush3.bf16.msra.mxu1 %v5942_v37 }
 0x9f2   : > { %v6231_v27 = vunpack.i.h.bf16 %v6229_v13  ;;  %v6230_v19 = vunpack.i.l.bf16 %v6229_v13  ;;  %v5946_v45 = vpack.c.bf16 %v4833_v62, %v4832_v17  ;;  %v6226_v3 = vunpack.i.h.bf16 %v6224_v46 }
 0x9f3   : > { %v6225_v48 = vunpack.i.l.bf16 %v6224_v46 }
 0x9f4   : > { %v4817_v18 = vsel %vm10332_vm9, %v6230_v19, %v6190_v20  ;;  %v4818_v60 = vsel %vm10333_vm10, %v6231_v27, %v6191_v25  ;;  %5947 = vmatprep.subr.bf16.mxu1 %v5946_v45  ;;  %v10341_v19 = vld [vmem:[#allocation15_spill] sm:$0xff] }
 0x9f5   : > { %v6234_v52 = vpop.permute.xlu0 %6233  ;;  %v6239_v4 = vpop.permute.xlu1 %6238  ;;  %v4834_v23 = vsel %vm4827_vm1, %v4817_v18, %v6195_v31  ;;  %v4835_v41 = vsel %vm4827_vm1, %v4818_v60, %v6196_v49  ;;  %5949 = vmatpush3.bf16.msra.mxu1 %v5946_v45  ;;  %v10342_v49 = vcvt.s32.f32 %v10341_v19  ;;  %v4921_v45 = vld [vmem:[%s9938_s2 + $0x48] ss:$0 sm:$0xff] }
 0x9f6   : > { %v6241_v36 = vunpack.i.h.bf16 %v6239_v4  ;;  %v6240_v2 = vunpack.i.l.bf16 %v6239_v4  ;;  %v5950_v47 = vpack.c.bf16 %v4835_v41, %v4834_v23  ;;  %v6236_v51 = vunpack.i.h.bf16 %v6234_v52 }
 0x9f7   : > { %v6235_v8 = vunpack.i.l.bf16 %v6234_v52  ;;  %vm4616_vm4 = vcmp.eq.f32.partialorder %v10342_v49, %v10323_v6 }
 0x9f8   : > { %v4820_v26 = vsel %vm10334_vm11, %v6241_v36, %v6211_v50  ;;  %v4819_v21 = vsel %vm10335_vm12, %v6240_v2, %v6210_v61  ;;  %5951 = vmatprep.subr.bf16.mxu1 %v5950_v47 }
 0x9f9   : > { %v6244_v32 = vpop.permute.xlu0 %6243  ;;  %v6254_v12 = vpop.permute.xlu1 %6253  ;;  %v4836_v53 = vsel %vm4827_vm1, %v4819_v21, %v6215_v15  ;;  %v4837_v40 = vsel %vm4827_vm1, %v4820_v26, %v6216_v14  ;;  %5953 = vmatpush3.bf16.msra.mxu1 %v5950_v47 }
 0x9fa   : > { %v6246_v55 = vunpack.i.h.bf16 %v6244_v32  ;;  %v6245_v33 = vunpack.i.l.bf16 %v6244_v32  ;;  %v5954_v63 = vpack.c.bf16 %v4837_v40, %v4836_v53  ;;  %v6256_v24 = vunpack.i.h.bf16 %v6254_v12 }
 0x9fb   : > { %v6255_v16 = vunpack.i.l.bf16 %v6254_v12 }
 0x9fc   : > { %v4821_v39 = vsel %vm10336_vm13, %v6245_v33, %v6225_v48  ;;  %v4822_v10 = vsel %vm10337_vm14, %v6246_v55, %v6226_v3  ;;  %5955 = vmatprep.subr.bf16.mxu1 %v5954_v63 }
 0x9fd   : > { %v6249_v54 = vpop.permute.xlu0 %6248  ;;  %v6259_v30 = vpop.permute.xlu1 %6258  ;;  %v4838_v0 = vsel %vm4827_vm1, %v4821_v39, %v6235_v8  ;;  %v4839_v59 = vsel %vm4827_vm1, %v4822_v10, %v6236_v51  ;;  %5957 = vmatpush3.bf16.msra.mxu1 %v5954_v63 }
 0x9fe   : > { %v6251_v7 = vunpack.i.h.bf16 %v6249_v54  ;;  %v6250_v29 = vunpack.i.l.bf16 %v6249_v54  ;;  %v6261_v28 = vunpack.i.h.bf16 %v6259_v30  ;;  %v6260_v9 = vunpack.i.l.bf16 %v6259_v30 }
 0x9ff   : > { %v5958_v56 = vpack.c.bf16 %v4839_v59, %v4838_v0 }
 0xa00   : > { %v4824_v42 = vsel %vm10338_vm15, %v6261_v28, %v6251_v7  ;;  %v4823_v57 = vsel %vm10319_vm2, %v6260_v9, %v6250_v29 }
 0xa01   : > { %5959 = vmatprep.subr.bf16.mxu1 %v5958_v56  ;;  %v6269_v34 = vpop.permute.xlu0 %6268  ;;  %v6264_v44 = vpop.permute.xlu1 %6263  ;;  %v4840_v58 = vsel %vm4827_vm1, %v4823_v57, %v6255_v16  ;;  %v4841_v35 = vsel %vm4827_vm1, %v4824_v42, %v6256_v24 }
 0xa02   : > { %v6271_v43 = vunpack.i.h.bf16 %v6269_v34  ;;  %5961 = vmatpush3.bf16.msra.mxu1 %v5958_v56  ;;  %v6270_v38 = vunpack.i.l.bf16 %v6269_v34  ;;  %v6266_v5 = vunpack.i.h.bf16 %v6264_v44  ;;  %v6265_v37 = vunpack.i.l.bf16 %v6264_v44 }
 0xa03   : > { %v5962_v22 = vpack.c.bf16 %v4841_v35, %v4840_v58 }
 0xa04   : > { %v4826_v17 = vsel %vm10339_vm0, %v6271_v43, %v6266_v5  ;;  %v4825_v62 = vsel %vm10340_vm3, %v6270_v38, %v6265_v37 }
 0xa05   : > { %5963 = vmatprep.subr.bf16.mxu1 %v5962_v22  ;;  %v6274_v11 = vpop.permute.xlu0 %6273 }
 0xa06   : > { %v6276_v13 = vunpack.i.h.bf16 %v6274_v11  ;;  %v6275_v46 = vunpack.i.l.bf16 %v6274_v11  ;;  %5965 = vmatpush3.bf16.msra.mxu1 %v5962_v22 }
 0xa08   : > { %v4842_v25 = vsel %vm4827_vm1, %v4825_v62, %v6275_v46  ;;  %v4843_v20 = vsel %vm4827_vm1, %v4826_v17, %v6276_v13  ;;  %vm10343_vm1 = vmmov %vm10339_vm0 }
 0xa09   : > { %v5966_v27 = vpack.c.bf16 %v4843_v20, %v4842_v25 }
 0xa0b   : > { %5967 = vmatprep.subr.bf16.mxu1 %v5966_v27 }
 0xa0c   : > { %5969 = vmatpush3.bf16.msra.mxu1 %v5966_v27 }
 0xa0f   : > { %5760 = vmatmul.mubr.msk.f32.vlgmr.msra.gmra.mrb[32].mxu1 %vm4616_vm4, %v6713_v1 }
 0xae2   : > { %v5761_v31 = vpop.f32.mrb[32].mxu1 }
 0xae3   : > { %v4920_v18 = vmul.f32 0.125, %v5761_v31  ;;  %v4910_v60 = vpop.f32.mrb[33].mxu1  ;;  %v4945_v61 = vmul.f32 %v5761_v31, %v5761_v31 }
 0xae4   : > { %v4919_v52 = vmul.f32 0.125, %v4910_v60  ;;  %v4944_v36 = vmul.f32 %v4910_v60, %v4910_v60 }
 0xae5   : > { %v4923_v4 = vmul.f32 %v4921_v45, %v4920_v18  ;;  %v4947_v6 = vmul.f32 0.041666668, %v4945_v61 }
 0xae6   : > { %v4922_v23 = vmul.f32 %v4921_v45, %v4919_v52  ;;  %v4946_v1 = vmul.f32 0.041666668, %v4944_v36 }
 0xae7   : > { %v4927_v41 = vsel %vm10343_vm1, %v4923_v4, 0.0 }
 0xae8   : > { %4928 = vadd.xlane.f32.xlu0 %v4927_v41  ;;  %v4924_v50 = vsel %vm10344_vm5, %v4922_v23, 0.0 }
 0xae9   : > { %4925 = vadd.xlane.f32.xlu1 %v4924_v50 }
 0xafa   : > { %4952 = vrot.lane.b32.xlu1 %v4947_v6, %s6714_s24 }
 0xafe   : > { %4950 = vrot.lane.b32.xlu0 %v4946_v1, %s6714_s24 }
 0xb75   : > { %v4929_v2 = vpop.xlane.xlu0 %4928 }
 0xb76   : > { %v4931_v14 = vadd.f32 %v4929_v2, %v4921_v45  ;;  %v4926_v15 = vpop.xlane.xlu1 %4925 }
 0xb77   : > { %v4930_v47 = vadd.f32 %v4926_v15, %v4921_v45 }
 0xb78   : > { %v5210_v26 = vmul.f32 -1.442695, %v4931_v14 }
 0xb79   : > { %v5209_v21 = vmul.f32 -1.442695, %v4930_v47  ;;  %v4951_v48 = vpop.permute.xlu0 %4950 }
 0xb7a   : > { %6629 = vpow2.f32 %v5210_v26  ;;  %v4953_v3 = vpop.permute.xlu1 %4952  ;;  %v4956_v51 = vsub.f32 %v4910_v60, %v4951_v48 }
 0xb7b   : > { %6631 = vpow2.f32 %v5209_v21  ;;  %v4957_v55 = vsub.f32 %v5761_v31, %v4953_v3 }
 0xb7c   : > { %v4958_v39 = vmul.f32 0.04347826, %v4956_v51 }
 0xb7d   : > { %v4959_v63 = vmul.f32 0.04347826, %v4957_v55 }
 0xb84   : > { %v6630_v32 = vpop.eup %6629 }
 0xb85   : > { %v6632_v12 = vpop.eup %6631  ;;  %v4939_v53 = vadd.f32 1.0, %v6630_v32 }
 0xb86   : > { %v4938_v40 = vadd.f32 1.0, %v6632_v12 }
 0xb87   : > { %6633 = vrcp.f32 %v4939_v53 }
 0xb88   : > { %6635 = vrcp.f32 %v4938_v40 }
 0xb91   : > { %v6634_v33 = vpop.eup %6633 }
 0xb92   : > { %v6636_v8 = vpop.eup %6635  ;;  %4964 = vrot.lane.b32.xlu0 %v6634_v33, %s6707_s20 }
 0xb93   : > { %4962 = vrot.lane.b32.xlu1 %v6636_v8, %s6707_s20 }
 0xb96   : > { %4975 = vrot.lane.b32.xlu0 %v4959_v63, %s6707_s20 }
 0xb97   : > { %4973 = vrot.lane.b32.xlu1 %v4958_v39, %s6707_s20 }
 0xc04   : > { %v4965_v10 = vpop.permute.xlu0 %4964 }
 0xc05   : > { %v4963_v54 = vpop.permute.xlu1 %4962  ;;  %4970 = vst.msk [vmem:[%s172_s28 + $0x8] sm:$0xff] %vm4968_vm6, %v4965_v10 }
 0xc06   : > { %4969 = vst.msk [vmem:[%s172_s28] sm:$0xff] %vm4968_vm6, %v4963_v54 }
 0xc08   : > { %v4976_v0 = vpop.permute.xlu0 %4975 }
 0xc09   : > { %v4974_v30 = vpop.permute.xlu1 %4973  ;;  %4981 = vst.msk [vmem:[%s172_s28 + $0x8] sm:$0xff] %vm4979_vm7, %v4976_v0 }
 0xc0a   : > { %4980 = vst.msk [vmem:[%s172_s28] sm:$0xff] %vm4979_vm7, %v4974_v30 }
 0xc0b PF: > { %s13_s12 = sadd.s32 1, %s6696_s12  }
 0xc0c   : > { %p10_p5 = scmp.ge.s32.totalorder %s13_s12, 5  }
 0xc0e   :  { %12 = sbr.rel (!%p10_p5) target bundleno = 1 (0x1), region = 62 }

</bundles_post_ra>
